<compile_context>
chip_gen: v7x
topology: tpu7x:2x2x1
jax: 0.10.0
libtpu: 0.0.40
codegen_flags: <defaults>
</compile_context>

<pallas_src>
import numpy as np
import jax
import jax.numpy as jnp
from jax import lax
from jax.experimental import pallas as pl
from jax.experimental.pallas import tpu as pltpu

OUT_DIM = 10
K = 5
IMG = 28                              # spatial size fixed by the 8*4*4 flatten in the torch module
C1_OUT, C2_OUT = 4, 8
P1_SP = 12                            # 28 -conv5-> 24 -pool2-> 12
P2_SP = 4                             # 12 -conv5->  8 -pool2->  4
G1_BLK = 640                          # stage-1 per-pool-position column block (>= 4*12*12=576, lane aligned)
N_P1 = C1_OUT * P1_SP * P1_SP         # 576 real pooled1 columns; col 576 is the 1.0 bias marker
G2_BLK = C2_OUT * P2_SP * P2_SP       # 128 == fc1 input width (matches torch .view(-1, 8*4*4) order)
FC_PAD = 128                          # lane-padded fc hidden / logits width


def _round_up(n, m):
    return (n + m - 1) // m * m


# -----------------------------------------------------------------------------
# Trace-time weight folding: conv(5x5, valid) + bias + maxpool(2,2) as 4 dense
# per-pool-position matrices of shape (4, n_rows, block_cols).  For an input
# row-vector v that is (c,h,w)-flattened and carries 1.0 at `bias_row`,
#   max_g (v @ M[g])
# equals conv + bias + maxpool in (cout, ph, pw) column order (zero padded).
# Bias lands identically in every g-block, so max(a_g + b) == max(a_g) + b.
# If `marker_col` is given, that output column is forced to 1.0 so the next
# stage can use it as its own bias row.
# -----------------------------------------------------------------------------
def _conv_pool_matrices(w, b, hw_in, block_cols, n_rows, bias_row, marker_col=None):
    cout, cin, k, _ = w.shape
    hp = (hw_in - k + 1) // 2
    G, O, PH, PW, C, KI, KJ = np.meshgrid(
        np.arange(4), np.arange(cout), np.arange(hp), np.arange(hp),
        np.arange(cin), np.arange(k), np.arange(k), indexing="ij")
    DY, DX = G // 2, G % 2
    rows = (C * (hw_in * hw_in) + (2 * PH + DY + KI) * hw_in + (2 * PW + DX + KJ)).ravel()
    cols = (O * (hp * hp) + PH * hp + PW).ravel()
    vals = w[O.ravel(), C.ravel(), KI.ravel(), KJ.ravel()]
    m = jnp.zeros((4, n_rows, block_cols), jnp.float32)
    m = m.at[G.ravel(), rows, cols].set(vals)
    nreal = cout * hp * hp
    m = m.at[:, bias_row, :nreal].set(
        jnp.broadcast_to(jnp.repeat(b, hp * hp)[None, :], (4, nreal)))
    if marker_col is not None:
        m = m.at[:, bias_row, marker_col].set(1.0)
    return m


# -----------------------------------------------------------------------------
# Fused kernel: entire forward pass for one batch tile.
# -----------------------------------------------------------------------------
def _fused_mnist_kernel(x_ref, m1_ref, m2_ref, w3_ref, b3_ref, w4_ref, b4_ref, o_ref):
    x = x_ref[...]                                                    # (TB, K1) bf16, bias lane included

    # conv1 + bias + maxpool: 4 per-pool-position matmuls, running max (no wide intermediate)
    p1 = jnp.dot(x, m1_ref[0], preferred_element_type=jnp.float32)    # (TB, 640)
    for g in range(1, 4):
        p1 = jnp.maximum(p1, jnp.dot(x, m1_ref[g], preferred_element_type=jnp.float32))
    p1 = p1.astype(jnp.bfloat16)                                      # col 576 == 1.0 (bias marker)

    # conv2 + bias + maxpool (columns already in torch (c,h,w) flatten order == fc input)
    p2 = jnp.dot(p1, m2_ref[0], preferred_element_type=jnp.float32)   # (TB, 128)
    for g in range(1, 4):
        p2 = jnp.maximum(p2, jnp.dot(p1, m2_ref[g], preferred_element_type=jnp.float32))
    p2 = p2.astype(jnp.bfloat16)

    # fc1 -> relu -> fc2 (both padded to 128 lanes -> lane-dense, unmasked stores)
    h = jnp.maximum(jnp.dot(p2, w3_ref[...], preferred_element_type=jnp.float32) + b3_ref[...], 0.0)
    o_ref[...] = (jnp.dot(h.astype(jnp.bfloat16), w4_ref[...],
                          preferred_element_type=jnp.float32) + b4_ref[...]).astype(o_ref.dtype)


# -----------------------------------------------------------------------------
# Wrapper: weight folding + batch-gridded pallas_call.
# -----------------------------------------------------------------------------
@jax.jit
def mnist_forward(params, x):
    B, cin = x.shape[0], x.shape[1]
    in_feat = cin * IMG * IMG
    k1 = _round_up(in_feat + 1, 8)                 # input features + 1.0 bias lane, sublane aligned

    # input: flatten, append bias lane, pad, cast to bf16 in the wrapper (halves HBM read)
    x_flat = jnp.pad(x.reshape(B, in_feat).astype(jnp.float32), ((0, 0), (0, k1 - in_feat)))
    x_flat = x_flat.at[:, in_feat].set(1.0).astype(jnp.bfloat16)

    # fold conv+bias+pool stages into per-pool-position matmul weights (weight-only, trace time)
    m1 = _conv_pool_matrices(params["conv1_w"], params["conv1_b"], IMG, G1_BLK,
                             n_rows=k1, bias_row=in_feat, marker_col=N_P1).astype(jnp.bfloat16)
    m2 = _conv_pool_matrices(params["conv2_w"], params["conv2_b"], P1_SP, G2_BLK,
                             n_rows=G1_BLK, bias_row=N_P1).astype(jnp.bfloat16)
    w3 = jnp.pad(params["lin1_w"].T, ((0, 0), (0, FC_PAD - 32))).astype(jnp.bfloat16)          # (128,128)
    b3 = jnp.pad(params["lin1_b"], (0, FC_PAD - 32))[None, :].astype(jnp.float32)              # (1,128)
    w4 = jnp.pad(params["lin2_w"].T, ((0, FC_PAD - 32), (0, FC_PAD - OUT_DIM))).astype(jnp.bfloat16)
    b4 = jnp.pad(params["lin2_b"], (0, FC_PAD - OUT_DIM))[None, :].astype(jnp.float32)

    # batch tile: 256 fills the 256-row MXU on v6e/v7x; keep >=2 grid steps when possible
    # so both v7x TensorCores get work.
    if B <= 8:
        tb = _round_up(max(B, 1), 8)
    else:
        tb = min(256, _round_up(B, 8))
        if _round_up(B, tb) == tb:                 # would be a single step -> split for megacore
            tb = max(8, _round_up((B + 1) // 2, 8))
    b_pad = _round_up(B, tb)
    if b_pad != B:
        x_flat = jnp.pad(x_flat, ((0, b_pad - B), (0, 0)))
    grid = (b_pad // tb,)

    def resident(arr):
        # whole-array block, constant index map -> fetched once; single VMEM buffer
        nd = arr.ndim
        try:
            return pl.BlockSpec(arr.shape, lambda i, _nd=nd: (0,) * _nd,
                                pipeline_mode=pl.Buffered(buffer_count=1))
        except (AttributeError, TypeError):        # older jax without pipeline_mode / Buffered
            return pl.BlockSpec(arr.shape, lambda i, _nd=nd: (0,) * _nd)

    flops = 2 * b_pad * (k1 * 4 * G1_BLK + G1_BLK * 4 * G2_BLK + G2_BLK * FC_PAD + FC_PAD * FC_PAD)
    bytes_accessed = (b_pad * k1 * 2 + b_pad * FC_PAD * 4 +
                      (m1.size + m2.size + w3.size + w4.size) * 2 + (b3.size + b4.size) * 4)

    out = pl.pallas_call(
        _fused_mnist_kernel,
        out_shape=jax.ShapeDtypeStruct((b_pad, FC_PAD), jnp.float32),
        grid=grid,
        in_specs=[pl.BlockSpec((tb, k1), lambda i: (i, 0)),
                  resident(m1), resident(m2),
                  resident(w3), resident(b3), resident(w4), resident(b4)],
        out_specs=pl.BlockSpec((tb, FC_PAD), lambda i: (i, 0)),
        compiler_params=pltpu.CompilerParams(
            dimension_semantics=("parallel",),
            vmem_limit_bytes=32 * 1024 * 1024),
        cost_estimate=pl.CostEstimate(flops=int(flops), transcendentals=0,
                                      bytes_accessed=int(bytes_accessed)),
    )(x_flat, m1, m2, w3, b3, w4, b4)
    return out[:B, :OUT_DIM]


# -----------------------------------------------------------------------------
# Deterministic parameter init (PyTorch-style uniform(-1/sqrt(fan_in), +)).
# -----------------------------------------------------------------------------
def init_params(key, in_dim):
    def uinit(k, shape, fan_in):
        bound = 1.0 / np.sqrt(fan_in)
        return jax.random.uniform(k, shape, jnp.float32, -bound, bound)

    ks = jax.random.split(key, 8)
    return dict(
        conv1_w=uinit(ks[0], (C1_OUT, in_dim, K, K), in_dim * K * K),
        conv1_b=uinit(ks[1], (C1_OUT,), in_dim * K * K),
        conv2_w=uinit(ks[2], (C2_OUT, C1_OUT, K, K), C1_OUT * K * K),
        conv2_b=uinit(ks[3], (C2_OUT,), C1_OUT * K * K),
        lin1_w=uinit(ks[4], (32, C2_OUT * P2_SP * P2_SP), C2_OUT * P2_SP * P2_SP),
        lin1_b=uinit(ks[5], (32,), C2_OUT * P2_SP * P2_SP),
        lin2_w=uinit(ks[6], (OUT_DIM, 32), 32),
        lin2_b=uinit(ks[7], (OUT_DIM,), 32),
    )


# Pure-JAX (f32) reference used only to verify the kernel.
def reference_forward(params, x):
    dn = ("NCHW", "OIHW", "NCHW")
    out = lax.conv_general_dilated(x, params["conv1_w"], (1, 1), "VALID",
                                   dimension_numbers=dn, precision=lax.Precision.HIGHEST)
    out = out + params["conv1_b"][None, :, None, None]
    out = lax.reduce_window(out, -jnp.inf, lax.max, (1, 1, 2, 2), (1, 1, 2, 2), "VALID")
    out = lax.conv_general_dilated(out, params["conv2_w"], (1, 1), "VALID",
                                   dimension_numbers=dn, precision=lax.Precision.HIGHEST)
    out = out + params["conv2_b"][None, :, None, None]
    out = lax.reduce_window(out, -jnp.inf, lax.max, (1, 1, 2, 2), (1, 1, 2, 2), "VALID")
    out = out.reshape(x.shape[0], C2_OUT * P2_SP * P2_SP)
    out = jnp.maximum(out @ params["lin1_w"].T + params["lin1_b"], 0.0)
    return out @ params["lin2_w"].T + params["lin2_b"]


if __name__ == "__main__":
    B, in_dim = 2, 1  # MNIST-style: spatial 28x28 is fixed by the 8*4*4 flatten
    key = jax.random.PRNGKey(0)
    kx, kp = jax.random.split(key)
    x = jax.random.normal(kx, (B, in_dim, IMG, IMG), jnp.float32)
    params = init_params(kp, in_dim)

    out = jax.block_until_ready(mnist_forward(params, x))
    ref = jax.block_until_ready(reference_forward(params, x))

    assert out.shape == (B, OUT_DIM) and out.dtype == jnp.float32
    # bf16 MXU operands with f32 accumulation -> relaxed tolerance vs f32 reference
    np.testing.assert_allclose(np.asarray(out), np.asarray(ref), rtol=5e-2, atol=5e-2)
    print("KERNEL_OK")
</pallas_src>

<mosaic_0001>
module attributes {stable_mosaic.version = 11 : i64} {
  func.func @_fused_mnist_kernel(%arg0: i32, %arg1: memref<8x792xbf16, #tpu.memory_space<vmem>>, %arg2: memref<4x792x640xbf16, #tpu.memory_space<vmem>>, %arg3: memref<4x640x128xbf16, #tpu.memory_space<vmem>>, %arg4: memref<128x128xbf16, #tpu.memory_space<vmem>>, %arg5: memref<1x128xf32, #tpu.memory_space<vmem>>, %arg6: memref<128x128xbf16, #tpu.memory_space<vmem>>, %arg7: memref<1x128xf32, #tpu.memory_space<vmem>>, %arg8: memref<8x128xf32, #tpu.memory_space<vmem>>) attributes {dimension_semantics = [#tpu.dimension_semantics<parallel>], iteration_bounds = array<i64: 1>, scalar_prefetch = 0 : i64, scratch_operands = 0 : i64, tpu.core_type = #tpu.core_type<tc>, window_params = [{transform_indices = @transform_0, window_bounds = array<i64: 8, 792>}, {pipeline_mode = #tpu.pipeline_mode<synchronous>, transform_indices = @transform_1, window_bounds = array<i64: 4, 792, 640>}, {pipeline_mode = #tpu.pipeline_mode<synchronous>, transform_indices = @transform_2, window_bounds = array<i64: 4, 640, 128>}, {pipeline_mode = #tpu.pipeline_mode<synchronous>, transform_indices = @transform_3, window_bounds = array<i64: 128, 128>}, {pipeline_mode = #tpu.pipeline_mode<synchronous>, transform_indices = @transform_4, window_bounds = array<i64: 1, 128>}, {pipeline_mode = #tpu.pipeline_mode<synchronous>, transform_indices = @transform_5, window_bounds = array<i64: 128, 128>}, {pipeline_mode = #tpu.pipeline_mode<synchronous>, transform_indices = @transform_6, window_bounds = array<i64: 1, 128>}, {transform_indices = @transform_7, window_bounds = array<i64: 8, 128>}]} {
    %c0 = arith.constant 0 : index
    %c0_0 = arith.constant 0 : index
    %0 = vector.load %arg1[%c0, %c0_0] : memref<8x792xbf16, #tpu.memory_space<vmem>>, vector<8x792xbf16>
    %c0_1 = arith.constant 0 : index
    %c0_2 = arith.constant 0 : index
    %c0_3 = arith.constant 0 : index
    %1 = vector.load %arg2[%c0_1, %c0_2, %c0_3] : memref<4x792x640xbf16, #tpu.memory_space<vmem>>, vector<1x792x640xbf16>
    %2 = vector.shape_cast %1 : vector<1x792x640xbf16> to vector<792x640xbf16>
    %cst = arith.constant dense<0.000000e+00> : vector<8x640xf32>
    %3 = tpu.matmul %0, %2, %cst {dimension_numbers = #tpu.dot_dimension_numbers<[1], [0], [0], [1], [0, 0, 1, 1], [], []>} : vector<8x792xbf16>, vector<792x640xbf16>, vector<8x640xf32> -> vector<8x640xf32>
    %c1 = arith.constant 1 : index
    %c0_4 = arith.constant 0 : index
    %c0_5 = arith.constant 0 : index
    %4 = vector.load %arg2[%c1, %c0_4, %c0_5] : memref<4x792x640xbf16, #tpu.memory_space<vmem>>, vector<1x792x640xbf16>
    %5 = vector.shape_cast %4 : vector<1x792x640xbf16> to vector<792x640xbf16>
    %cst_6 = arith.constant dense<0.000000e+00> : vector<8x640xf32>
    %6 = tpu.matmul %0, %5, %cst_6 {dimension_numbers = #tpu.dot_dimension_numbers<[1], [0], [0], [1], [0, 0, 1, 1], [], []>} : vector<8x792xbf16>, vector<792x640xbf16>, vector<8x640xf32> -> vector<8x640xf32>
    %7 = arith.maximumf %3, %6 : vector<8x640xf32>
    %c2 = arith.constant 2 : index
    %c0_7 = arith.constant 0 : index
    %c0_8 = arith.constant 0 : index
    %8 = vector.load %arg2[%c2, %c0_7, %c0_8] : memref<4x792x640xbf16, #tpu.memory_space<vmem>>, vector<1x792x640xbf16>
    %9 = vector.shape_cast %8 : vector<1x792x640xbf16> to vector<792x640xbf16>
    %cst_9 = arith.constant dense<0.000000e+00> : vector<8x640xf32>
    %10 = tpu.matmul %0, %9, %cst_9 {dimension_numbers = #tpu.dot_dimension_numbers<[1], [0], [0], [1], [0, 0, 1, 1], [], []>} : vector<8x792xbf16>, vector<792x640xbf16>, vector<8x640xf32> -> vector<8x640xf32>
    %11 = arith.maximumf %7, %10 : vector<8x640xf32>
    %c3 = arith.constant 3 : index
    %c0_10 = arith.constant 0 : index
    %c0_11 = arith.constant 0 : index
    %12 = vector.load %arg2[%c3, %c0_10, %c0_11] : memref<4x792x640xbf16, #tpu.memory_space<vmem>>, vector<1x792x640xbf16>
    %13 = vector.shape_cast %12 : vector<1x792x640xbf16> to vector<792x640xbf16>
    %cst_12 = arith.constant dense<0.000000e+00> : vector<8x640xf32>
    %14 = tpu.matmul %0, %13, %cst_12 {dimension_numbers = #tpu.dot_dimension_numbers<[1], [0], [0], [1], [0, 0, 1, 1], [], []>} : vector<8x792xbf16>, vector<792x640xbf16>, vector<8x640xf32> -> vector<8x640xf32>
    %15 = arith.maximumf %11, %14 : vector<8x640xf32>
    %16 = arith.truncf %15 : vector<8x640xf32> to vector<8x640xbf16>
    %c0_13 = arith.constant 0 : index
    %c0_14 = arith.constant 0 : index
    %c0_15 = arith.constant 0 : index
    %17 = vector.load %arg3[%c0_13, %c0_14, %c0_15] : memref<4x640x128xbf16, #tpu.memory_space<vmem>>, vector<1x640x128xbf16>
    %18 = vector.shape_cast %17 : vector<1x640x128xbf16> to vector<640x128xbf16>
    %cst_16 = arith.constant dense<0.000000e+00> : vector<8x128xf32>
    %19 = tpu.matmul %16, %18, %cst_16 {dimension_numbers = #tpu.dot_dimension_numbers<[1], [0], [0], [1], [0, 0, 1, 1], [], []>} : vector<8x640xbf16>, vector<640x128xbf16>, vector<8x128xf32> -> vector<8x128xf32>
    %c1_17 = arith.constant 1 : index
    %c0_18 = arith.constant 0 : index
    %c0_19 = arith.constant 0 : index
    %20 = vector.load %arg3[%c1_17, %c0_18, %c0_19] : memref<4x640x128xbf16, #tpu.memory_space<vmem>>, vector<1x640x128xbf16>
    %21 = vector.shape_cast %20 : vector<1x640x128xbf16> to vector<640x128xbf16>
    %cst_20 = arith.constant dense<0.000000e+00> : vector<8x128xf32>
    %22 = tpu.matmul %16, %21, %cst_20 {dimension_numbers = #tpu.dot_dimension_numbers<[1], [0], [0], [1], [0, 0, 1, 1], [], []>} : vector<8x640xbf16>, vector<640x128xbf16>, vector<8x128xf32> -> vector<8x128xf32>
    %23 = arith.maximumf %19, %22 : vector<8x128xf32>
    %c2_21 = arith.constant 2 : index
    %c0_22 = arith.constant 0 : index
    %c0_23 = arith.constant 0 : index
    %24 = vector.load %arg3[%c2_21, %c0_22, %c0_23] : memref<4x640x128xbf16, #tpu.memory_space<vmem>>, vector<1x640x128xbf16>
    %25 = vector.shape_cast %24 : vector<1x640x128xbf16> to vector<640x128xbf16>
    %cst_24 = arith.constant dense<0.000000e+00> : vector<8x128xf32>
    %26 = tpu.matmul %16, %25, %cst_24 {dimension_numbers = #tpu.dot_dimension_numbers<[1], [0], [0], [1], [0, 0, 1, 1], [], []>} : vector<8x640xbf16>, vector<640x128xbf16>, vector<8x128xf32> -> vector<8x128xf32>
    %27 = arith.maximumf %23, %26 : vector<8x128xf32>
    %c3_25 = arith.constant 3 : index
    %c0_26 = arith.constant 0 : index
    %c0_27 = arith.constant 0 : index
    %28 = vector.load %arg3[%c3_25, %c0_26, %c0_27] : memref<4x640x128xbf16, #tpu.memory_space<vmem>>, vector<1x640x128xbf16>
    %29 = vector.shape_cast %28 : vector<1x640x128xbf16> to vector<640x128xbf16>
    %cst_28 = arith.constant dense<0.000000e+00> : vector<8x128xf32>
    %30 = tpu.matmul %16, %29, %cst_28 {dimension_numbers = #tpu.dot_dimension_numbers<[1], [0], [0], [1], [0, 0, 1, 1], [], []>} : vector<8x640xbf16>, vector<640x128xbf16>, vector<8x128xf32> -> vector<8x128xf32>
    %31 = arith.maximumf %27, %30 : vector<8x128xf32>
    %32 = arith.truncf %31 : vector<8x128xf32> to vector<8x128xbf16>
    %c0_29 = arith.constant 0 : index
    %c0_30 = arith.constant 0 : index
    %33 = vector.load %arg4[%c0_29, %c0_30] : memref<128x128xbf16, #tpu.memory_space<vmem>>, vector<128x128xbf16>
    %cst_31 = arith.constant dense<0.000000e+00> : vector<8x128xf32>
    %34 = tpu.matmul %32, %33, %cst_31 {dimension_numbers = #tpu.dot_dimension_numbers<[1], [0], [0], [1], [0, 0, 1, 1], [], []>} : vector<8x128xbf16>, vector<128x128xbf16>, vector<8x128xf32> -> vector<8x128xf32>
    %c0_32 = arith.constant 0 : index
    %c0_33 = arith.constant 0 : index
    %35 = vector.load %arg5[%c0_32, %c0_33] : memref<1x128xf32, #tpu.memory_space<vmem>>, vector<1x128xf32>
    %36 = vector.broadcast %35 : vector<1x128xf32> to vector<8x128xf32>
    %37 = arith.addf %34, %36 : vector<8x128xf32>
    %cst_34 = arith.constant 0.000000e+00 : f32
    %38 = vector.broadcast %cst_34 : f32 to vector<8x128xf32>
    %39 = arith.maximumf %37, %38 : vector<8x128xf32>
    %40 = arith.truncf %39 : vector<8x128xf32> to vector<8x128xbf16>
    %c0_35 = arith.constant 0 : index
    %c0_36 = arith.constant 0 : index
    %41 = vector.load %arg6[%c0_35, %c0_36] : memref<128x128xbf16, #tpu.memory_space<vmem>>, vector<128x128xbf16>
    %cst_37 = arith.constant dense<0.000000e+00> : vector<8x128xf32>
    %42 = tpu.matmul %40, %41, %cst_37 {dimension_numbers = #tpu.dot_dimension_numbers<[1], [0], [0], [1], [0, 0, 1, 1], [], []>} : vector<8x128xbf16>, vector<128x128xbf16>, vector<8x128xf32> -> vector<8x128xf32>
    %c0_38 = arith.constant 0 : index
    %c0_39 = arith.constant 0 : index
    %43 = vector.load %arg7[%c0_38, %c0_39] : memref<1x128xf32, #tpu.memory_space<vmem>>, vector<1x128xf32>
    %44 = vector.broadcast %43 : vector<1x128xf32> to vector<8x128xf32>
    %45 = arith.addf %42, %44 : vector<8x128xf32>
    %c0_40 = arith.constant 0 : index
    %c0_41 = arith.constant 0 : index
    %46 = vector.load %arg8[%c0_40, %c0_41] : memref<8x128xf32, #tpu.memory_space<vmem>>, vector<8x128xf32>
    tpu.vector_store %arg8[%c0_40, %c0_41], %45 {strides = array<i32>} : memref<8x128xf32, #tpu.memory_space<vmem>>, vector<8x128xf32>,
    return
  }
  func.func @transform_0(%arg0: i32) -> (i32, i32) {
    %c0_i32 = arith.constant 0 : i32
    %c0_i32_0 = arith.constant 0 : i32
    return %arg0, %c0_i32 : i32, i32
  }
  func.func @transform_1(%arg0: i32) -> (i32, i32, i32) {
    %c0_i32 = arith.constant 0 : i32
    %c0_i32_0 = arith.constant 0 : i32
    %c0_i32_1 = arith.constant 0 : i32
    %c0_i32_2 = arith.constant 0 : i32
    return %c0_i32, %c0_i32_0, %c0_i32_1 : i32, i32, i32
  }
  func.func @transform_2(%arg0: i32) -> (i32, i32, i32) {
    %c0_i32 = arith.constant 0 : i32
    %c0_i32_0 = arith.constant 0 : i32
    %c0_i32_1 = arith.constant 0 : i32
    %c0_i32_2 = arith.constant 0 : i32
    return %c0_i32, %c0_i32_0, %c0_i32_1 : i32, i32, i32
  }
  func.func @transform_3(%arg0: i32) -> (i32, i32) {
    %c0_i32 = arith.constant 0 : i32
    %c0_i32_0 = arith.constant 0 : i32
    %c0_i32_1 = arith.constant 0 : i32
    return %c0_i32, %c0_i32_0 : i32, i32
  }
  func.func @transform_4(%arg0: i32) -> (i32, i32) {
    %c0_i32 = arith.constant 0 : i32
    %c0_i32_0 = arith.constant 0 : i32
    %c0_i32_1 = arith.constant 0 : i32
    return %c0_i32, %c0_i32_0 : i32, i32
  }
  func.func @transform_5(%arg0: i32) -> (i32, i32) {
    %c0_i32 = arith.constant 0 : i32
    %c0_i32_0 = arith.constant 0 : i32
    %c0_i32_1 = arith.constant 0 : i32
    return %c0_i32, %c0_i32_0 : i32, i32
  }
  func.func @transform_6(%arg0: i32) -> (i32, i32) {
    %c0_i32 = arith.constant 0 : i32
    %c0_i32_0 = arith.constant 0 : i32
    %c0_i32_1 = arith.constant 0 : i32
    return %c0_i32, %c0_i32_0 : i32, i32
  }
  func.func @transform_7(%arg0: i32) -> (i32, i32) {
    %c0_i32 = arith.constant 0 : i32
    %c0_i32_0 = arith.constant 0 : i32
    return %arg0, %c0_i32 : i32, i32
  }
}

</mosaic_0001>

<bundles_post_ra>
// kernel: mnist_forward.1
= control target key start
LH: loop header
LB: loop body
LE: loop exit
PB: predicated region body
PF: predicated region fallthrough
CT: control target
= control target key end

     0   :  { %vm1643_vm0 = vcmask 1043456   ;;  %vm1639_vm1 = vcmask 195584   ;;  %vm15100_vm2 = vmmov 0   ;;  %s19024_s1 = inlined_call_operand.vmem [shape: bf16[4,792,640], index: 1, kind: input, shape index: {}]   ;;  %s19025_s0 = inlined_call_operand.vmem [shape: bf16[8,792], index: 0, kind: input, shape index: {}]   ;;  %s19026_s2 = inlined_call_operand.vmem [shape: bf16[4,640,128], index: 2, kind: input, shape index: {}]   ;;  %s19027_s3 = inlined_call_operand.vmem [shape: bf16[128,128], index: 3, kind: input, shape index: {}]   ;;  %s19028_s5 = inlined_call_operand.vmem [shape: bf16[128,128], index: 5, kind: input, shape index: {}]   ;;  %s19029_s4 = inlined_call_operand.vmem [shape: f32[1,128], index: 4, kind: input, shape index: {}]   ;;  %s19030_s6 = inlined_call_operand.vmem [shape: f32[1,128], index: 6, kind: input, shape index: {}]   ;;  %s19031_s7 = inlined_call_operand.vmem [shape: f32[8,128], index: 7, kind: output, shape index: {}]  }
   0x1   :  { %v13520_v0 = vld [vmem:[%s19024_s1 + $0x4] ss:$20 sps:$4 sm:$0xff]   ;;  %v13522_v1 = vld [vmem:[%s19024_s1 + $0xc] ss:$20 sps:$4 sm:$0xff]   ;;  %v13525_v3 = vld [vmem:[%s19024_s1 + $0x8] ss:$20 sps:$4 sm:$0xff]  }
   0x2   :  { %1659 = vmatprep.subr.bf16.mxu0 %v13520_v0  ;;  %v13524_v2 = vld [vmem:[%s19024_s1] ss:$20 sps:$4 sm:$0xff]   ;;  %1823 = vmatprep.subr.bf16.mxu1 %v13522_v1  ;;  %v13530_v6 = vld [vmem:[%s19024_s1 + $0x28] ss:$20 sps:$4 sm:$0xff]   ;;  %v13531_v7 = vld [vmem:[%s19024_s1 + $0x30] ss:$20 sps:$4 sm:$0xff]  }
   0x3   :  { %v13526_v4 = vld [vmem:[%s19024_s1 + $0x2c] ss:$20 sps:$4 sm:$0xff]   ;;  %1660 = vmatpush1.bf16.msra.mxu0 %v13524_v2  ;;  %1824 = vmatpush1.bf16.msra.mxu1 %v13525_v3  ;;  %v13528_v5 = vld [vmem:[%s19024_s1 + $0x34] ss:$20 sps:$4 sm:$0xff]   ;;  %v13534_v9 = vld [vmem:[%s19024_s1 + $0x5c] ss:$20 sps:$4 sm:$0xff]  }
   0x4   :  { %1661 = vmatprep.subr.bf16.mxu0 %v13526_v4  ;;  %1825 = vmatprep.subr.bf16.mxu1 %v13528_v5  ;;  %v13532_v8 = vld [vmem:[%s19024_s1 + $0x54] ss:$20 sps:$4 sm:$0xff]   ;;  %v13536_v10 = vld [vmem:[%s19024_s1 + $0x50] ss:$20 sps:$4 sm:$0xff]   ;;  %v13537_v11 = vld [vmem:[%s19024_s1 + $0x58] ss:$20 sps:$4 sm:$0xff]  }
   0x5   :  { %v13538_v12 = vld [vmem:[%s19024_s1 + $0x7c] ss:$20 sps:$4 sm:$0xff]   ;;  %v13540_v13 = vld [vmem:[%s19024_s1 + $0x84] ss:$20 sps:$4 sm:$0xff]   ;;  %v13543_v15 = vld [vmem:[%s19024_s1 + $0x80] ss:$20 sps:$4 sm:$0xff]  }
   0x6   :  { %v13542_v14 = vld [vmem:[%s19024_s1 + $0x78] ss:$20 sps:$4 sm:$0xff]   ;;  %v13548_v18 = vld [vmem:[%s19024_s1 + $0xa0] ss:$20 sps:$4 sm:$0xff]   ;;  %v13549_v19 = vld [vmem:[%s19024_s1 + $0xa8] ss:$20 sps:$4 sm:$0xff]  }
   0x7   :  { %1662 = vmatpush1.bf16.msra.mxu0 %v13530_v6  ;;  %1826 = vmatpush1.bf16.msra.mxu1 %v13531_v7  ;;  %v13544_v16 = vld [vmem:[%s19024_s1 + $0xa4] ss:$20 sps:$4 sm:$0xff]   ;;  %v13546_v17 = vld [vmem:[%s19024_s1 + $0xac] ss:$20 sps:$4 sm:$0xff]   ;;  %v13552_v21 = vld [vmem:[%s19024_s1 + $0xd4] ss:$20 sps:$4 sm:$0xff]  }
   0x8   :  { %1663 = vmatprep.subr.bf16.mxu0 %v13532_v8  ;;  %1827 = vmatprep.subr.bf16.mxu1 %v13534_v9  ;;  %v13550_v20 = vld [vmem:[%s19024_s1 + $0xcc] ss:$20 sps:$4 sm:$0xff]   ;;  %v13554_v22 = vld [vmem:[%s19024_s1 + $0xc8] ss:$20 sps:$4 sm:$0xff]   ;;  %v13555_v23 = vld [vmem:[%s19024_s1 + $0xd0] ss:$20 sps:$4 sm:$0xff]  }
   0x9   :  { %v13556_v24 = vld [vmem:[%s19024_s1 + $0xf4] ss:$20 sps:$4 sm:$0xff]   ;;  %v13558_v25 = vld [vmem:[%s19024_s1 + $0xfc] ss:$20 sps:$4 sm:$0xff]   ;;  %v13561_v27 = vld [vmem:[%s19024_s1 + $0xf8] ss:$20 sps:$4 sm:$0xff]  }
   0xa   :  { %v13560_v26 = vld [vmem:[%s19024_s1 + $0xf0] ss:$20 sps:$4 sm:$0xff]   ;;  %v13566_v30 = vld [vmem:[%s19024_s1 + $0x118] ss:$20 sps:$4 sm:$0xff]   ;;  %v13567_v31 = vld [vmem:[%s19024_s1 + $0x120] ss:$20 sps:$4 sm:$0xff]  }
   0xb   :  { %1664 = vmatpush1.bf16.msra.mxu0 %v13536_v10  ;;  %1828 = vmatpush1.bf16.msra.mxu1 %v13537_v11  ;;  %v13562_v28 = vld [vmem:[%s19024_s1 + $0x11c] ss:$20 sps:$4 sm:$0xff]   ;;  %v13564_v29 = vld [vmem:[%s19024_s1 + $0x124] ss:$20 sps:$4 sm:$0xff]   ;;  %v13570_v33 = vld [vmem:[%s19024_s1 + $0x14c] ss:$20 sps:$4 sm:$0xff]  }
   0xc   :  { %1665 = vmatprep.subr.bf16.mxu0 %v13538_v12  ;;  %1829 = vmatprep.subr.bf16.mxu1 %v13540_v13  ;;  %v13568_v32 = vld [vmem:[%s19024_s1 + $0x144] ss:$20 sps:$4 sm:$0xff]   ;;  %v13572_v34 = vld [vmem:[%s19024_s1 + $0x140] ss:$20 sps:$4 sm:$0xff]   ;;  %v13573_v35 = vld [vmem:[%s19024_s1 + $0x148] ss:$20 sps:$4 sm:$0xff]  }
   0xd   :  { %v13574_v36 = vld [vmem:[%s19024_s1 + $0x16c] ss:$20 sps:$4 sm:$0xff]   ;;  %v13576_v37 = vld [vmem:[%s19024_s1 + $0x174] ss:$20 sps:$4 sm:$0xff]   ;;  %v13579_v39 = vld [vmem:[%s19024_s1 + $0x170] ss:$20 sps:$4 sm:$0xff]  }
   0xe   :  { %v13578_v38 = vld [vmem:[%s19024_s1 + $0x168] ss:$20 sps:$4 sm:$0xff]   ;;  %v13584_v42 = vld [vmem:[%s19024_s1 + $0x190] ss:$20 sps:$4 sm:$0xff]   ;;  %v13585_v43 = vld [vmem:[%s19024_s1 + $0x198] ss:$20 sps:$4 sm:$0xff]  }
   0xf   :  { %1666 = vmatpush1.bf16.msra.mxu0 %v13542_v14  ;;  %1830 = vmatpush1.bf16.msra.mxu1 %v13543_v15  ;;  %v13580_v40 = vld [vmem:[%s19024_s1 + $0x194] ss:$20 sps:$4 sm:$0xff]   ;;  %v13582_v41 = vld [vmem:[%s19024_s1 + $0x19c] ss:$20 sps:$4 sm:$0xff]   ;;  %v13588_v45 = vld [vmem:[%s19024_s1 + $0x1c4] ss:$20 sps:$4 sm:$0xff]  }
  0x10   :  { %1667 = vmatprep.subr.bf16.mxu0 %v13544_v16  ;;  %1831 = vmatprep.subr.bf16.mxu1 %v13546_v17  ;;  %v13586_v44 = vld [vmem:[%s19024_s1 + $0x1bc] ss:$20 sps:$4 sm:$0xff]   ;;  %v27_v46 = vld [vmem:[%s19025_s0] sm:$0xff]  ;;  %v13590_v47 = vld [vmem:[%s19024_s1 + $0x1b8] ss:$20 sps:$4 sm:$0xff]  }
  0x11   :  { %v15285_v48 = vcombine.high %v27_v46, %v27_v46  ;;  %v13591_v49 = vld [vmem:[%s19024_s1 + $0x1c0] ss:$20 sps:$4 sm:$0xff]   ;;  %v13592_v50 = vld [vmem:[%s19024_s1 + $0x1e4] ss:$20 sps:$4 sm:$0xff]   ;;  %v13597_v53 = vld [vmem:[%s19024_s1 + $0x1e8] ss:$20 sps:$4 sm:$0xff]   ;;  %v15349_v5 = vcombine.low %v27_v46, %v27_v46 }
  0x12   :  { %v13594_v51 = vld [vmem:[%s19024_s1 + $0x1ec] ss:$20 sps:$4 sm:$0xff]   ;;  %v13600_v55 = vld [vmem:[%s19024_s1 + $0x214] ss:$20 sps:$4 sm:$0xff]   ;;  %v13603_v57 = vld [vmem:[%s19024_s1 + $0x210] ss:$20 sps:$4 sm:$0xff]  }
  0x13   :  { %1668 = vmatpush1.bf16.msra.mxu0 %v13548_v18  ;;  %1832 = vmatpush1.bf16.msra.mxu1 %v13549_v19  ;;  %v13596_v52 = vld [vmem:[%s19024_s1 + $0x1e0] ss:$20 sps:$4 sm:$0xff]   ;;  %v13602_v56 = vld [vmem:[%s19024_s1 + $0x208] ss:$20 sps:$4 sm:$0xff]   ;;  %v13608_v60 = vld [vmem:[%s19024_s1 + $0x230] ss:$20 sps:$4 sm:$0xff]  }
  0x14   :  { %1669 = vmatprep.subr.bf16.mxu0 %v13550_v20  ;;  %1833 = vmatprep.subr.bf16.mxu1 %v13552_v21  ;;  %v13598_v54 = vld [vmem:[%s19024_s1 + $0x20c] ss:$20 sps:$4 sm:$0xff]   ;;  %v13604_v58 = vld [vmem:[%s19024_s1 + $0x234] ss:$20 sps:$4 sm:$0xff]   ;;  %v13606_v59 = vld [vmem:[%s19024_s1 + $0x23c] ss:$20 sps:$4 sm:$0xff]  }
  0x15   :  { %1691 = vmatprep.mubr.bf16.mxu0 %v15285_v48  ;;  %1855 = vmatprep.mubr.bf16.mxu1 %v15285_v48  ;;  %v13609_v61 = vld [vmem:[%s19024_s1 + $0x238] ss:$20 sps:$4 sm:$0xff]   ;;  %v13610_v62 = vld [vmem:[%s19024_s1 + $0x25c] ss:$20 sps:$4 sm:$0xff]   ;;  %v13615_v1 = vld [vmem:[%s19024_s1 + $0x260] ss:$20 sps:$4 sm:$0xff]  }
  0x16   :  { %v13612_v63 = vld [vmem:[%s19024_s1 + $0x264] ss:$20 sps:$4 sm:$0xff]   ;;  %v13622_v3 = vld [vmem:[%s19024_s1 + $0x28c] ss:$20 sps:$4 sm:$0xff]   ;;  %v13620_v6 = vld [vmem:[%s19024_s1 + $0x288] ss:$20 sps:$4 sm:$0xff]  }
  0x17   :  { %1670 = vmatpush1.bf16.msra.mxu0 %v13554_v22  ;;  %1834 = vmatpush1.bf16.msra.mxu1 %v13555_v23  ;;  %v13614_v0 = vld [vmem:[%s19024_s1 + $0x258] ss:$20 sps:$4 sm:$0xff]   ;;  %v13617_v4 = vld [vmem:[%s19024_s1 + $0x280] ss:$20 sps:$4 sm:$0xff]   ;;  %v13624_v9 = vld [vmem:[%s19024_s1 + $0x2a8] ss:$20 sps:$4 sm:$0xff]  }
  0x18   :  { %1671 = vmatprep.subr.bf16.mxu0 %v13556_v24  ;;  %1835 = vmatprep.subr.bf16.mxu1 %v13558_v25  ;;  %v13619_v2 = vld [vmem:[%s19024_s1 + $0x284] ss:$20 sps:$4 sm:$0xff]   ;;  %v13626_v7 = vld [vmem:[%s19024_s1 + $0x2ac] ss:$20 sps:$4 sm:$0xff]   ;;  %v13629_v8 = vld [vmem:[%s19024_s1 + $0x2b4] ss:$20 sps:$4 sm:$0xff]  }
  0x19   :  { %v13627_v10 = vld [vmem:[%s19024_s1 + $0x2b0] ss:$20 sps:$4 sm:$0xff]   ;;  %v13632_v11 = vld [vmem:[%s19024_s1 + $0x2d4] ss:$20 sps:$4 sm:$0xff]   ;;  %v13633_v14 = vld [vmem:[%s19024_s1 + $0x2d8] ss:$20 sps:$4 sm:$0xff]  }
  0x1a   :  { %v13635_v12 = vld [vmem:[%s19024_s1 + $0x2dc] ss:$20 sps:$4 sm:$0xff]   ;;  %v13641_v16 = vld [vmem:[%s19024_s1 + $0x304] ss:$20 sps:$4 sm:$0xff]   ;;  %v13639_v18 = vld [vmem:[%s19024_s1 + $0x300] ss:$20 sps:$4 sm:$0xff]  }
  0x1b   :  { %1672 = vmatpush1.bf16.msra.mxu0 %v13560_v26  ;;  %1836 = vmatpush1.bf16.msra.mxu1 %v13561_v27  ;;  %v13630_v13 = vld [vmem:[%s19024_s1 + $0x2d0] ss:$20 sps:$4 sm:$0xff]   ;;  %v13636_v17 = vld [vmem:[%s19024_s1 + $0x2f8] ss:$20 sps:$4 sm:$0xff]   ;;  %v13642_v21 = vld [vmem:[%s19024_s1 + $0x320] ss:$20 sps:$4 sm:$0xff]  }
  0x1c   :  { %1673 = vmatprep.subr.bf16.mxu0 %v13562_v28  ;;  %1837 = vmatprep.subr.bf16.mxu1 %v13564_v29  ;;  %v13638_v15 = vld [vmem:[%s19024_s1 + $0x2fc] ss:$20 sps:$4 sm:$0xff]   ;;  %v13644_v19 = vld [vmem:[%s19024_s1 + $0x324] ss:$20 sps:$4 sm:$0xff]   ;;  %v13647_v20 = vld [vmem:[%s19024_s1 + $0x32c] ss:$20 sps:$4 sm:$0xff]  }
  0x1d   :  { %v13645_v22 = vld [vmem:[%s19024_s1 + $0x328] ss:$20 sps:$4 sm:$0xff]   ;;  %v13650_v23 = vld [vmem:[%s19024_s1 + $0x34c] ss:$20 sps:$4 sm:$0xff]   ;;  %v13651_v26 = vld [vmem:[%s19024_s1 + $0x350] ss:$20 sps:$4 sm:$0xff]  }
  0x1e   :  { %v13653_v24 = vld [vmem:[%s19024_s1 + $0x354] ss:$20 sps:$4 sm:$0xff]   ;;  %v13659_v28 = vld [vmem:[%s19024_s1 + $0x37c] ss:$20 sps:$4 sm:$0xff]  }
  0x1f   :  { %1674 = vmatpush1.bf16.msra.mxu0 %v13566_v30  ;;  %1838 = vmatpush1.bf16.msra.mxu1 %v13567_v31  ;;  %v13648_v25 = vld [vmem:[%s19024_s1 + $0x348] ss:$20 sps:$4 sm:$0xff]   ;;  %v13654_v31 = vld [vmem:[%s19024_s1 + $0x370] ss:$20 sps:$4 sm:$0xff]  }
  0x20   :  { %1675 = vmatprep.subr.bf16.mxu0 %v13568_v32  ;;  %1839 = vmatprep.subr.bf16.mxu1 %v13570_v33  ;;  %v13656_v27 = vld [vmem:[%s19024_s1 + $0x374] ss:$20 sps:$4 sm:$0xff]   ;;  %v13657_v32 = vld [vmem:[%s19024_s1 + $0x378] ss:$20 sps:$4 sm:$0xff]   ;;  %v13662_v33 = vld [vmem:[%s19024_s1 + $0x39c] ss:$20 sps:$4 sm:$0xff]  }
  0x21   :  { %v15425_v29 = vld [vmem:[%s19025_s0 + $0x8] sm:$0xff]  ;;  %v13683_v46 = vld [vmem:[%s19024_s1 + $0x41c] ss:$20 sps:$4 sm:$0xff]  }
  0x22   :  { %v15429_v30 = vcombine.high %v15425_v29, %v15425_v29 }
  0x23   :  { %1676 = vmatpush1.bf16.msra.mxu0 %v13572_v34  ;;  %1840 = vmatpush1.bf16.msra.mxu1 %v13573_v35  ;;  %v13665_v34 = vld [vmem:[%s19024_s1 + $0x3a4] ss:$20 sps:$4 sm:$0xff]  }
  0x24   :  { %1677 = vmatprep.subr.bf16.mxu0 %v13574_v36  ;;  %1841 = vmatprep.subr.bf16.mxu1 %v13576_v37  ;;  %v13660_v35 = vld [vmem:[%s19024_s1 + $0x398] ss:$20 sps:$4 sm:$0xff]   ;;  %v13663_v36 = vld [vmem:[%s19024_s1 + $0x3a0] ss:$20 sps:$4 sm:$0xff]  }
  0x25   :  { %v13668_v37 = vld [vmem:[%s19024_s1 + $0x3c4] ss:$20 sps:$4 sm:$0xff]  }
  0x27   :  { %1678 = vmatpush1.bf16.msra.mxu0 %v13578_v38  ;;  %1842 = vmatpush1.bf16.msra.mxu1 %v13579_v39  ;;  %v13671_v38 = vld [vmem:[%s19024_s1 + $0x3cc] ss:$20 sps:$4 sm:$0xff]  }
  0x28   :  { %1679 = vmatprep.subr.bf16.mxu0 %v13580_v40  ;;  %1843 = vmatprep.subr.bf16.mxu1 %v13582_v41  ;;  %v13666_v39 = vld [vmem:[%s19024_s1 + $0x3c0] ss:$20 sps:$4 sm:$0xff]   ;;  %v13669_v40 = vld [vmem:[%s19024_s1 + $0x3c8] ss:$20 sps:$4 sm:$0xff]  }
  0x29   :  { %v13674_v41 = vld [vmem:[%s19024_s1 + $0x3ec] ss:$20 sps:$4 sm:$0xff]  }
  0x2b   :  { %1680 = vmatpush1.bf16.msra.mxu0 %v13584_v42  ;;  %1844 = vmatpush1.bf16.msra.mxu1 %v13585_v43  ;;  %v13677_v42 = vld [vmem:[%s19024_s1 + $0x3f4] ss:$20 sps:$4 sm:$0xff]  }
  0x2c   :  { %1681 = vmatprep.subr.bf16.mxu0 %v13586_v44  ;;  %1845 = vmatprep.subr.bf16.mxu1 %v13588_v45  ;;  %v13672_v43 = vld [vmem:[%s19024_s1 + $0x3e8] ss:$20 sps:$4 sm:$0xff]   ;;  %v13675_v44 = vld [vmem:[%s19024_s1 + $0x3f0] ss:$20 sps:$4 sm:$0xff]  }
  0x2d   :  { %v13680_v45 = vld [vmem:[%s19024_s1 + $0x414] ss:$20 sps:$4 sm:$0xff]  }
  0x2f   :  { %1682 = vmatpush1.bf16.msra.mxu0 %v13590_v47  ;;  %1846 = vmatpush1.bf16.msra.mxu1 %v13591_v49  ;;  %v13678_v47 = vld [vmem:[%s19024_s1 + $0x410] ss:$20 sps:$4 sm:$0xff]   ;;  %v13681_v49 = vld [vmem:[%s19024_s1 + $0x418] ss:$20 sps:$4 sm:$0xff]  }
  0x30   :  { %1683 = vmatprep.subr.bf16.mxu0 %v13592_v50  ;;  %1847 = vmatprep.subr.bf16.mxu1 %v13594_v51  ;;  %v13686_v50 = vld [vmem:[%s19024_s1 + $0x43c] ss:$20 sps:$4 sm:$0xff]   ;;  %v13689_v51 = vld [vmem:[%s19024_s1 + $0x444] ss:$20 sps:$4 sm:$0xff]  }
  0x33   :  { %1684 = vmatpush1.bf16.msra.mxu0 %v13596_v52  ;;  %1848 = vmatpush1.bf16.msra.mxu1 %v13597_v53  ;;  %v13684_v52 = vld [vmem:[%s19024_s1 + $0x438] ss:$20 sps:$4 sm:$0xff]   ;;  %v13687_v53 = vld [vmem:[%s19024_s1 + $0x440] ss:$20 sps:$4 sm:$0xff]  }
  0x34   :  { %1685 = vmatprep.subr.bf16.mxu0 %v13598_v54  ;;  %1849 = vmatprep.subr.bf16.mxu1 %v13600_v55  ;;  %v13692_v54 = vld [vmem:[%s19024_s1 + $0x464] ss:$20 sps:$4 sm:$0xff]   ;;  %v13695_v55 = vld [vmem:[%s19024_s1 + $0x46c] ss:$20 sps:$4 sm:$0xff]  }
  0x37   :  { %1686 = vmatpush1.bf16.msra.mxu0 %v13602_v56  ;;  %1850 = vmatpush1.bf16.msra.mxu1 %v13603_v57  ;;  %v13690_v56 = vld [vmem:[%s19024_s1 + $0x460] ss:$20 sps:$4 sm:$0xff]   ;;  %v13693_v57 = vld [vmem:[%s19024_s1 + $0x468] ss:$20 sps:$4 sm:$0xff]  }
  0x38   :  { %1687 = vmatprep.subr.bf16.mxu0 %v13604_v58  ;;  %1851 = vmatprep.subr.bf16.mxu1 %v13606_v59  ;;  %v13698_v58 = vld [vmem:[%s19024_s1 + $0x48c] ss:$20 sps:$4 sm:$0xff]   ;;  %v13701_v59 = vld [vmem:[%s19024_s1 + $0x494] ss:$20 sps:$4 sm:$0xff]  }
  0x3b   :  { %1688 = vmatpush1.bf16.msra.mxu0 %v13608_v60  ;;  %1852 = vmatpush1.bf16.msra.mxu1 %v13609_v61  ;;  %v13696_v60 = vld [vmem:[%s19024_s1 + $0x488] ss:$20 sps:$4 sm:$0xff]   ;;  %v13699_v61 = vld [vmem:[%s19024_s1 + $0x490] ss:$20 sps:$4 sm:$0xff]  }
  0x3c   :  { %1689 = vmatprep.subr.bf16.mxu0 %v13610_v62  ;;  %1853 = vmatprep.subr.bf16.mxu1 %v13612_v63  ;;  %v13704_v62 = vld [vmem:[%s19024_s1 + $0x4b4] ss:$20 sps:$4 sm:$0xff]   ;;  %v13707_v63 = vld [vmem:[%s19024_s1 + $0x4bc] ss:$20 sps:$4 sm:$0xff]  }
  0x3f   :  { %1690 = vmatpush1.bf16.msra.mxu0 %v13614_v0  ;;  %1854 = vmatpush1.bf16.msra.mxu1 %v13615_v1  ;;  %v13702_v0 = vld [vmem:[%s19024_s1 + $0x4b0] ss:$20 sps:$4 sm:$0xff]   ;;  %v13705_v1 = vld [vmem:[%s19024_s1 + $0x4b8] ss:$20 sps:$4 sm:$0xff]  }
  0x40   :  { %1700 = vmatprep.subr.bf16.mxu0 %v13619_v2  ;;  %1864 = vmatprep.subr.bf16.mxu1 %v13622_v3  ;;  %v13710_v2 = vld [vmem:[%s19024_s1 + $0x4dc] ss:$20 sps:$4 sm:$0xff]   ;;  %v13713_v3 = vld [vmem:[%s19024_s1 + $0x4e4] ss:$20 sps:$4 sm:$0xff]  }
  0x42   :  { %1692 = vmatmul.mubr.bf16.vlgmr.msra.gmra.mrb[0].mxu0 %v15349_v5  ;;  %1856 = vmatmul.mubr.bf16.vlgmr.msra.gmra.mrb[0].mxu1 %v15349_v5 }
  0x43   :  { %1701 = vmatpush1.bf16.msra.mxu0 %v13617_v4  ;;  %1865 = vmatpush1.bf16.msra.mxu1 %v13620_v6  ;;  %v13708_v4 = vld [vmem:[%s19024_s1 + $0x4d8] ss:$20 sps:$4 sm:$0xff]   ;;  %v13711_v6 = vld [vmem:[%s19024_s1 + $0x4e0] ss:$20 sps:$4 sm:$0xff]  }
  0x44   :  { %1702 = vmatprep.subr.bf16.mxu0 %v13626_v7  ;;  %1866 = vmatprep.subr.bf16.mxu1 %v13629_v8  ;;  %v13717_v7 = vld [vmem:[%s19024_s1 + $0x504] ss:$20 sps:$4 sm:$0xff]   ;;  %v13720_v8 = vld [vmem:[%s19024_s1 + $0x50c] ss:$20 sps:$4 sm:$0xff]  }
  0x45   :  { %1732 = vmatprep.mubr.bf16.mxu0 %v15429_v30  ;;  %1896 = vmatprep.mubr.bf16.mxu1 %v15429_v30 }
  0x47   :  { %1703 = vmatpush1.bf16.msra.mxu0 %v13624_v9  ;;  %1867 = vmatpush1.bf16.msra.mxu1 %v13627_v10  ;;  %v13715_v9 = vld [vmem:[%s19024_s1 + $0x500] ss:$20 sps:$4 sm:$0xff]   ;;  %v15558_v10 = vcombine.low %v15425_v29, %v15425_v29  ;;  %v13743_v29 = vld [vmem:[%s19024_s1 + $0x5a8] ss:$20 sps:$4 sm:$0xff]  }
  0x48   :  { %1704 = vmatprep.subr.bf16.mxu0 %v13632_v11  ;;  %1868 = vmatprep.subr.bf16.mxu1 %v13635_v12  ;;  %v13718_v11 = vld [vmem:[%s19024_s1 + $0x508] ss:$20 sps:$4 sm:$0xff]   ;;  %v13724_v12 = vld [vmem:[%s19024_s1 + $0x52c] ss:$20 sps:$4 sm:$0xff]  }
  0x4b   :  { %1705 = vmatpush1.bf16.msra.mxu0 %v13630_v13  ;;  %1869 = vmatpush1.bf16.msra.mxu1 %v13633_v14  ;;  %v15569_v13 = vld [vmem:[%s19025_s0 + $0x10] sm:$0xff] }
  0x4c   :  { %1706 = vmatprep.subr.bf16.mxu0 %v13638_v15  ;;  %1870 = vmatprep.subr.bf16.mxu1 %v13641_v16  ;;  %v13727_v14 = vld [vmem:[%s19024_s1 + $0x534] ss:$20 sps:$4 sm:$0xff]   ;;  %v15576_v15 = vcombine.high %v15569_v13, %v15569_v13 }
  0x4d   :  { %v13722_v16 = vld [vmem:[%s19024_s1 + $0x528] ss:$20 sps:$4 sm:$0xff]  }
  0x4f   :  { %1707 = vmatpush1.bf16.msra.mxu0 %v13636_v17  ;;  %1871 = vmatpush1.bf16.msra.mxu1 %v13639_v18  ;;  %v13725_v17 = vld [vmem:[%s19024_s1 + $0x530] ss:$20 sps:$4 sm:$0xff]   ;;  %v13730_v18 = vld [vmem:[%s19024_s1 + $0x554] ss:$20 sps:$4 sm:$0xff]  }
  0x50   :  { %1708 = vmatprep.subr.bf16.mxu0 %v13644_v19  ;;  %1872 = vmatprep.subr.bf16.mxu1 %v13647_v20  ;;  %v13733_v19 = vld [vmem:[%s19024_s1 + $0x55c] ss:$20 sps:$4 sm:$0xff]  }
  0x51   :  { %v13728_v20 = vld [vmem:[%s19024_s1 + $0x550] ss:$20 sps:$4 sm:$0xff]  }
  0x53   :  { %1709 = vmatpush1.bf16.msra.mxu0 %v13642_v21  ;;  %1873 = vmatpush1.bf16.msra.mxu1 %v13645_v22  ;;  %v13731_v21 = vld [vmem:[%s19024_s1 + $0x558] ss:$20 sps:$4 sm:$0xff]   ;;  %v13736_v22 = vld [vmem:[%s19024_s1 + $0x57c] ss:$20 sps:$4 sm:$0xff]  }
  0x54   :  { %1710 = vmatprep.subr.bf16.mxu0 %v13650_v23  ;;  %1874 = vmatprep.subr.bf16.mxu1 %v13653_v24  ;;  %v13739_v23 = vld [vmem:[%s19024_s1 + $0x584] ss:$20 sps:$4 sm:$0xff]  }
  0x55   :  { %v13734_v24 = vld [vmem:[%s19024_s1 + $0x578] ss:$20 sps:$4 sm:$0xff]  }
  0x57   :  { %1711 = vmatpush1.bf16.msra.mxu0 %v13648_v25  ;;  %1875 = vmatpush1.bf16.msra.mxu1 %v13651_v26  ;;  %v13737_v25 = vld [vmem:[%s19024_s1 + $0x580] ss:$20 sps:$4 sm:$0xff]   ;;  %v13742_v26 = vld [vmem:[%s19024_s1 + $0x5a4] ss:$20 sps:$4 sm:$0xff]  }
  0x58   :  { %1712 = vmatprep.subr.bf16.mxu0 %v13656_v27  ;;  %1876 = vmatprep.subr.bf16.mxu1 %v13659_v28  ;;  %v13745_v27 = vld [vmem:[%s19024_s1 + $0x5ac] ss:$20 sps:$4 sm:$0xff]  }
  0x59   :  { %v13740_v28 = vld [vmem:[%s19024_s1 + $0x5a0] ss:$20 sps:$4 sm:$0xff]  }
  0x5b   :  { %1713 = vmatpush1.bf16.msra.mxu0 %v13654_v31  ;;  %1877 = vmatpush1.bf16.msra.mxu1 %v13657_v32  ;;  %v13748_v31 = vld [vmem:[%s19024_s1 + $0x5cc] ss:$20 sps:$4 sm:$0xff]   ;;  %v13751_v32 = vld [vmem:[%s19024_s1 + $0x5d4] ss:$20 sps:$4 sm:$0xff]  }
  0x5c   :  { %1714 = vmatprep.subr.bf16.mxu0 %v13662_v33  ;;  %1878 = vmatprep.subr.bf16.mxu1 %v13665_v34  ;;  %v13746_v33 = vld [vmem:[%s19024_s1 + $0x5c8] ss:$20 sps:$4 sm:$0xff]   ;;  %v13749_v34 = vld [vmem:[%s19024_s1 + $0x5d0] ss:$20 sps:$4 sm:$0xff]  }
  0x5f   :  { %1715 = vmatpush1.bf16.msra.mxu0 %v13660_v35  ;;  %1879 = vmatpush1.bf16.msra.mxu1 %v13663_v36  ;;  %v13754_v35 = vld [vmem:[%s19024_s1 + $0x5f4] ss:$20 sps:$4 sm:$0xff]   ;;  %v13757_v36 = vld [vmem:[%s19024_s1 + $0x5fc] ss:$20 sps:$4 sm:$0xff]  }
  0x60   :  { %1716 = vmatprep.subr.bf16.mxu0 %v13668_v37  ;;  %1880 = vmatprep.subr.bf16.mxu1 %v13671_v38  ;;  %v13752_v37 = vld [vmem:[%s19024_s1 + $0x5f0] ss:$20 sps:$4 sm:$0xff]   ;;  %v13755_v38 = vld [vmem:[%s19024_s1 + $0x5f8] ss:$20 sps:$4 sm:$0xff]  }
  0x63   :  { %1717 = vmatpush1.bf16.msra.mxu0 %v13666_v39  ;;  %1881 = vmatpush1.bf16.msra.mxu1 %v13669_v40  ;;  %v13760_v39 = vld [vmem:[%s19024_s1 + $0x61c] ss:$20 sps:$4 sm:$0xff]   ;;  %v13763_v40 = vld [vmem:[%s19024_s1 + $0x624] ss:$20 sps:$4 sm:$0xff]  }
  0x64   :  { %1718 = vmatprep.subr.bf16.mxu0 %v13674_v41  ;;  %1882 = vmatprep.subr.bf16.mxu1 %v13677_v42  ;;  %v13758_v41 = vld [vmem:[%s19024_s1 + $0x618] ss:$20 sps:$4 sm:$0xff]   ;;  %v13761_v42 = vld [vmem:[%s19024_s1 + $0x620] ss:$20 sps:$4 sm:$0xff]  }
  0x67   :  { %1719 = vmatpush1.bf16.msra.mxu0 %v13672_v43  ;;  %1883 = vmatpush1.bf16.msra.mxu1 %v13675_v44  ;;  %v13766_v43 = vld [vmem:[%s19024_s1 + $0x644] ss:$20 sps:$4 sm:$0xff]   ;;  %v13769_v44 = vld [vmem:[%s19024_s1 + $0x64c] ss:$20 sps:$4 sm:$0xff]  }
  0x68   :  { %1720 = vmatprep.subr.bf16.mxu0 %v13680_v45  ;;  %1884 = vmatprep.subr.bf16.mxu1 %v13683_v46  ;;  %v13764_v45 = vld [vmem:[%s19024_s1 + $0x640] ss:$20 sps:$4 sm:$0xff]   ;;  %v13767_v46 = vld [vmem:[%s19024_s1 + $0x648] ss:$20 sps:$4 sm:$0xff]  }
  0x6b   :  { %1721 = vmatpush1.bf16.msra.mxu0 %v13678_v47  ;;  %1885 = vmatpush1.bf16.msra.mxu1 %v13681_v49  ;;  %v13772_v47 = vld [vmem:[%s19024_s1 + $0x66c] ss:$20 sps:$4 sm:$0xff]   ;;  %v13775_v49 = vld [vmem:[%s19024_s1 + $0x674] ss:$20 sps:$4 sm:$0xff]  }
  0x6c   :  { %1722 = vmatprep.subr.bf16.mxu0 %v13686_v50  ;;  %1886 = vmatprep.subr.bf16.mxu1 %v13689_v51  ;;  %v13770_v50 = vld [vmem:[%s19024_s1 + $0x668] ss:$20 sps:$4 sm:$0xff]   ;;  %v13773_v51 = vld [vmem:[%s19024_s1 + $0x670] ss:$20 sps:$4 sm:$0xff]  }
  0x6f   :  { %1723 = vmatpush1.bf16.msra.mxu0 %v13684_v52  ;;  %1887 = vmatpush1.bf16.msra.mxu1 %v13687_v53  ;;  %v13778_v52 = vld [vmem:[%s19024_s1 + $0x694] ss:$20 sps:$4 sm:$0xff]   ;;  %v13781_v53 = vld [vmem:[%s19024_s1 + $0x69c] ss:$20 sps:$4 sm:$0xff]  }
  0x70   :  { %1724 = vmatprep.subr.bf16.mxu0 %v13692_v54  ;;  %1888 = vmatprep.subr.bf16.mxu1 %v13695_v55  ;;  %v13776_v54 = vld [vmem:[%s19024_s1 + $0x690] ss:$20 sps:$4 sm:$0xff]   ;;  %v13779_v55 = vld [vmem:[%s19024_s1 + $0x698] ss:$20 sps:$4 sm:$0xff]  }
  0x73   :  { %1725 = vmatpush1.bf16.msra.mxu0 %v13690_v56  ;;  %1889 = vmatpush1.bf16.msra.mxu1 %v13693_v57  ;;  %v13784_v56 = vld [vmem:[%s19024_s1 + $0x6bc] ss:$20 sps:$4 sm:$0xff]   ;;  %v13787_v57 = vld [vmem:[%s19024_s1 + $0x6c4] ss:$20 sps:$4 sm:$0xff]  }
  0x74   :  { %1726 = vmatprep.subr.bf16.mxu0 %v13698_v58  ;;  %1890 = vmatprep.subr.bf16.mxu1 %v13701_v59  ;;  %v13782_v58 = vld [vmem:[%s19024_s1 + $0x6b8] ss:$20 sps:$4 sm:$0xff]   ;;  %v13785_v59 = vld [vmem:[%s19024_s1 + $0x6c0] ss:$20 sps:$4 sm:$0xff]  }
  0x77   :  { %1727 = vmatpush1.bf16.msra.mxu0 %v13696_v60  ;;  %1891 = vmatpush1.bf16.msra.mxu1 %v13699_v61  ;;  %v13790_v60 = vld [vmem:[%s19024_s1 + $0x6e4] ss:$20 sps:$4 sm:$0xff]   ;;  %v13793_v61 = vld [vmem:[%s19024_s1 + $0x6ec] ss:$20 sps:$4 sm:$0xff]  }
  0x78   :  { %1728 = vmatprep.subr.bf16.mxu0 %v13704_v62  ;;  %1892 = vmatprep.subr.bf16.mxu1 %v13707_v63  ;;  %v13788_v62 = vld [vmem:[%s19024_s1 + $0x6e0] ss:$20 sps:$4 sm:$0xff]   ;;  %v13791_v63 = vld [vmem:[%s19024_s1 + $0x6e8] ss:$20 sps:$4 sm:$0xff]  }
  0x7b   :  { %1729 = vmatpush1.bf16.msra.mxu0 %v13702_v0  ;;  %1893 = vmatpush1.bf16.msra.mxu1 %v13705_v1  ;;  %v13796_v0 = vld [vmem:[%s19024_s1 + $0x70c] ss:$20 sps:$4 sm:$0xff]   ;;  %v13799_v1 = vld [vmem:[%s19024_s1 + $0x714] ss:$20 sps:$4 sm:$0xff]  }
  0x7c   :  { %1730 = vmatprep.subr.bf16.mxu0 %v13710_v2  ;;  %1894 = vmatprep.subr.bf16.mxu1 %v13713_v3  ;;  %v13794_v2 = vld [vmem:[%s19024_s1 + $0x708] ss:$20 sps:$4 sm:$0xff]   ;;  %v13797_v3 = vld [vmem:[%s19024_s1 + $0x710] ss:$20 sps:$4 sm:$0xff]  }
  0x7f   :  { %1731 = vmatpush1.bf16.msra.mxu0 %v13708_v4  ;;  %1895 = vmatpush1.bf16.msra.mxu1 %v13711_v6  ;;  %v13802_v4 = vld [vmem:[%s19024_s1 + $0x734] ss:$20 sps:$4 sm:$0xff]   ;;  %v13805_v6 = vld [vmem:[%s19024_s1 + $0x73c] ss:$20 sps:$4 sm:$0xff]  }
  0x80   :  { %1741 = vmatprep.subr.bf16.mxu0 %v13717_v7  ;;  %1905 = vmatprep.subr.bf16.mxu1 %v13720_v8  ;;  %v13800_v7 = vld [vmem:[%s19024_s1 + $0x730] ss:$20 sps:$4 sm:$0xff]   ;;  %v13803_v8 = vld [vmem:[%s19024_s1 + $0x738] ss:$20 sps:$4 sm:$0xff]  }
  0x82   :  { %1733 = vmatmul.mubr.bf16.vlgmr.msra.gmra.mrb[0].mxu0 %v15558_v10  ;;  %1897 = vmatmul.mubr.bf16.vlgmr.msra.gmra.mrb[0].mxu1 %v15558_v10 }
  0x83   :  { %1742 = vmatpush1.bf16.msra.mxu0 %v13715_v9  ;;  %1906 = vmatpush1.bf16.msra.mxu1 %v13718_v11  ;;  %v13808_v9 = vld [vmem:[%s19024_s1 + $0x75c] ss:$20 sps:$4 sm:$0xff]   ;;  %v13811_v11 = vld [vmem:[%s19024_s1 + $0x764] ss:$20 sps:$4 sm:$0xff]  }
  0x84   :  { %1743 = vmatprep.subr.bf16.mxu0 %v13724_v12  ;;  %1907 = vmatprep.subr.bf16.mxu1 %v13727_v14  ;;  %v13806_v12 = vld [vmem:[%s19024_s1 + $0x758] ss:$20 sps:$4 sm:$0xff]   ;;  %v13809_v14 = vld [vmem:[%s19024_s1 + $0x760] ss:$20 sps:$4 sm:$0xff]  }
  0x85   :  { %1773 = vmatprep.mubr.bf16.mxu0 %v15576_v15  ;;  %1937 = vmatprep.mubr.bf16.mxu1 %v15576_v15 }
  0x87   :  { %1744 = vmatpush1.bf16.msra.mxu0 %v13722_v16  ;;  %1908 = vmatpush1.bf16.msra.mxu1 %v13725_v17  ;;  %v13816_v16 = vld [vmem:[%s19024_s1 + $0x78c] ss:$20 sps:$4 sm:$0xff]   ;;  %v13819_v17 = vld [vmem:[%s19024_s1 + $0x784] ss:$20 sps:$4 sm:$0xff]  }
  0x88   :  { %1745 = vmatprep.subr.bf16.mxu0 %v13730_v18  ;;  %1909 = vmatprep.subr.bf16.mxu1 %v13733_v19  ;;  %v326_v18 = vld [vmem:[%s19024_s1 + $0x7b0] sm:$0xff]  ;;  %v325_v19 = vld [vmem:[%s19024_s1 + $0x7a8] sm:$0xff] }
  0x8b   :  { %1746 = vmatpush1.bf16.msra.mxu0 %v13728_v20  ;;  %1910 = vmatpush1.bf16.msra.mxu1 %v13731_v21  ;;  %v15770_v20 = vcombine.low %v15569_v13, %v15569_v13  ;;  %v13814_v21 = vld [vmem:[%s19024_s1 + $0x788] ss:$20 sps:$4 sm:$0xff]   ;;  %v13824_v13 = vld [vmem:[%s19024_s1 + $0x150] ss:$20 sps:$4 sm:$0xff]  }
  0x8c   :  { %1747 = vmatprep.subr.bf16.mxu0 %v13736_v22  ;;  %1911 = vmatprep.subr.bf16.mxu1 %v13739_v23  ;;  %v13817_v22 = vld [vmem:[%s19024_s1 + $0x780] ss:$20 sps:$4 sm:$0xff]   ;;  %v10682_v23 = vcombine.high %v326_v18, %v326_v18 }
  0x8f   :  { %1748 = vmatpush1.bf16.msra.mxu0 %v13734_v24  ;;  %1912 = vmatpush1.bf16.msra.mxu1 %v13737_v25  ;;  %v10680_v24 = vcombine.high %v325_v19, %v325_v19  ;;  %v10681_v25 = vcombine.low %v326_v18, %v326_v18  ;;  %v13869_v18 = vld [vmem:[%s19024_s1 + $0x7e4] ss:$20 sps:$4 sm:$0xff]  }
  0x90   :  { %1749 = vmatprep.subr.bf16.mxu0 %v13742_v26  ;;  %1913 = vmatprep.subr.bf16.mxu1 %v13745_v27  ;;  %v10679_v26 = vcombine.low %v325_v19, %v325_v19  ;;  %v13872_v19 = vld [vmem:[%s19024_s1 + $0x588] ss:$20 sps:$4 sm:$0xff]  }
  0x91   :  { %v1651_v27 = vsel %vm1643_vm0, %v10681_v25, 0  ;;  %v13878_v25 = vld [vmem:[%s19024_s1 + $0x718] ss:$20 sps:$4 sm:$0xff]  }
  0x93   :  { %1750 = vmatpush1.bf16.msra.mxu0 %v13740_v28  ;;  %1914 = vmatpush1.bf16.msra.mxu1 %v13743_v29  ;;  %v1645_v28 = vsel %vm1643_vm0, %v10679_v26, 0  ;;  %v13825_v29 = vld [vmem:[%s19024_s1 + $0x3d0] ss:$20 sps:$4 sm:$0xff]   ;;  %v13881_v26 = vld [vmem:[%s19024_s1 + $0x838] ss:$20 sps:$4 sm:$0xff]  }
  0x94   :  { %1751 = vmatprep.subr.bf16.mxu0 %v13748_v31  ;;  %1915 = vmatprep.subr.bf16.mxu1 %v13751_v32  ;;  %v15098_v31 = vmov 0   ;;  %v15795_v32 = vld [vmem:[%s19025_s0 + $0x18] ss:$0 sps:$4 sm:$0xff]  }
  0x97   :  { %1752 = vmatpush1.bf16.msra.mxu0 %v13746_v33  ;;  %1916 = vmatpush1.bf16.msra.mxu1 %v13749_v34  ;;  %v13827_v33 = vld [vmem:[%s19024_s1 + $0x10] ss:$20 sps:$4 sm:$0xff]  }
  0x98   :  { %1753 = vmatprep.subr.bf16.mxu0 %v13754_v35  ;;  %1917 = vmatprep.subr.bf16.mxu1 %v13757_v36  ;;  %v13828_v34 = vld [vmem:[%s19024_s1 + $0x290] ss:$20 sps:$4 sm:$0xff]   ;;  %v13829_v35 = vld [vmem:[%s19024_s1 + $0x178] ss:$20 sps:$4 sm:$0xff]  }
  0x99   :  { %v13830_v36 = vld [vmem:[%s19024_s1 + $0x3f8] ss:$20 sps:$4 sm:$0xff]  }
  0x9b   :  { %1754 = vmatpush1.bf16.msra.mxu0 %v13752_v37  ;;  %1918 = vmatpush1.bf16.msra.mxu1 %v13755_v38  ;;  %v13831_v37 = vld [vmem:[%s19024_s1 + $0x38] ss:$20 sps:$4 sm:$0xff]  }
  0x9c   :  { %1755 = vmatprep.subr.bf16.mxu0 %v13760_v39  ;;  %1919 = vmatprep.subr.bf16.mxu1 %v13763_v40  ;;  %v13832_v38 = vld [vmem:[%s19024_s1 + $0x2b8] ss:$20 sps:$4 sm:$0xff]   ;;  %v13833_v39 = vld [vmem:[%s19024_s1 + $0x1a0] ss:$20 sps:$4 sm:$0xff]  }
  0x9d   :  { %v13834_v40 = vld [vmem:[%s19024_s1 + $0x420] ss:$20 sps:$4 sm:$0xff]  }
  0x9f   :  { %1756 = vmatpush1.bf16.msra.mxu0 %v13758_v41  ;;  %1920 = vmatpush1.bf16.msra.mxu1 %v13761_v42  ;;  %v13835_v41 = vld [vmem:[%s19024_s1 + $0x60] ss:$20 sps:$4 sm:$0xff]  }
  0xa0   :  { %1757 = vmatprep.subr.bf16.mxu0 %v13766_v43  ;;  %1921 = vmatprep.subr.bf16.mxu1 %v13769_v44  ;;  %v13836_v42 = vld [vmem:[%s19024_s1 + $0x2e0] ss:$20 sps:$4 sm:$0xff]   ;;  %v13837_v43 = vld [vmem:[%s19024_s1 + $0x1c8] ss:$20 sps:$4 sm:$0xff]  }
  0xa1   :  { %v13838_v44 = vld [vmem:[%s19024_s1 + $0x448] ss:$20 sps:$4 sm:$0xff]  }
  0xa3   :  { %1758 = vmatpush1.bf16.msra.mxu0 %v13764_v45  ;;  %1922 = vmatpush1.bf16.msra.mxu1 %v13767_v46  ;;  %v13839_v45 = vld [vmem:[%s19024_s1 + $0x88] ss:$20 sps:$4 sm:$0xff]  }
  0xa4   :  { %1759 = vmatprep.subr.bf16.mxu0 %v13772_v47  ;;  %1923 = vmatprep.subr.bf16.mxu1 %v13775_v49  ;;  %v13840_v46 = vld [vmem:[%s19024_s1 + $0x308] ss:$20 sps:$4 sm:$0xff]   ;;  %v13841_v47 = vld [vmem:[%s19024_s1 + $0x1f0] ss:$20 sps:$4 sm:$0xff]  }
  0xa5   :  { %v13842_v49 = vld [vmem:[%s19024_s1 + $0x470] ss:$20 sps:$4 sm:$0xff]  }
  0xa7   :  { %1760 = vmatpush1.bf16.msra.mxu0 %v13770_v50  ;;  %1924 = vmatpush1.bf16.msra.mxu1 %v13773_v51  ;;  %v13843_v50 = vld [vmem:[%s19024_s1 + $0xb0] ss:$20 sps:$4 sm:$0xff]  }
  0xa8   :  { %1761 = vmatprep.subr.bf16.mxu0 %v13778_v52  ;;  %1925 = vmatprep.subr.bf16.mxu1 %v13781_v53  ;;  %v13844_v51 = vld [vmem:[%s19024_s1 + $0x330] ss:$20 sps:$4 sm:$0xff]   ;;  %v13845_v52 = vld [vmem:[%s19024_s1 + $0x218] ss:$20 sps:$4 sm:$0xff]  }
  0xa9   :  { %v13846_v53 = vld [vmem:[%s19024_s1 + $0x498] ss:$20 sps:$4 sm:$0xff]  }
  0xab   :  { %1762 = vmatpush1.bf16.msra.mxu0 %v13776_v54  ;;  %1926 = vmatpush1.bf16.msra.mxu1 %v13779_v55  ;;  %v13847_v54 = vld [vmem:[%s19024_s1 + $0xd8] ss:$20 sps:$4 sm:$0xff]  }
  0xac   :  { %1763 = vmatprep.subr.bf16.mxu0 %v13784_v56  ;;  %1927 = vmatprep.subr.bf16.mxu1 %v13787_v57  ;;  %v13848_v55 = vld [vmem:[%s19024_s1 + $0x358] ss:$20 sps:$4 sm:$0xff]   ;;  %v13849_v56 = vld [vmem:[%s19024_s1 + $0x240] ss:$20 sps:$4 sm:$0xff]  }
  0xad   :  { %v13850_v57 = vld [vmem:[%s19024_s1 + $0x4c0] ss:$20 sps:$4 sm:$0xff]  }
  0xaf   :  { %1764 = vmatpush1.bf16.msra.mxu0 %v13782_v58  ;;  %1928 = vmatpush1.bf16.msra.mxu1 %v13785_v59  ;;  %v13851_v58 = vld [vmem:[%s19024_s1 + $0x100] ss:$20 sps:$4 sm:$0xff]  }
  0xb0   :  { %1765 = vmatprep.subr.bf16.mxu0 %v13790_v60  ;;  %1929 = vmatprep.subr.bf16.mxu1 %v13793_v61  ;;  %v13852_v59 = vld [vmem:[%s19024_s1 + $0x380] ss:$20 sps:$4 sm:$0xff]   ;;  %v13853_v60 = vld [vmem:[%s19024_s1 + $0x268] ss:$20 sps:$4 sm:$0xff]  }
  0xb1   :  { %v13854_v61 = vld [vmem:[%s19024_s1 + $0x4e8] ss:$20 sps:$4 sm:$0xff]  }
  0xb3   :  { %1766 = vmatpush1.bf16.msra.mxu0 %v13788_v62  ;;  %1930 = vmatpush1.bf16.msra.mxu1 %v13791_v63  ;;  %v13855_v62 = vld [vmem:[%s19024_s1 + $0x128] ss:$20 sps:$4 sm:$0xff]  }
  0xb4   :  { %1767 = vmatprep.subr.bf16.mxu0 %v13796_v0  ;;  %1931 = vmatprep.subr.bf16.mxu1 %v13799_v1  ;;  %v13856_v63 = vld [vmem:[%s19024_s1 + $0x3a8] ss:$20 sps:$4 sm:$0xff]   ;;  %v13857_v0 = vld [vmem:[%s19024_s1 + $0x650] ss:$20 sps:$4 sm:$0xff]  }
  0xb5   :  { %v13858_v1 = vld [vmem:[%s19024_s1 + $0x510] ss:$20 sps:$4 sm:$0xff]  }
  0xb7   :  { %1768 = vmatpush1.bf16.msra.mxu0 %v13794_v2  ;;  %1932 = vmatpush1.bf16.msra.mxu1 %v13797_v3  ;;  %v13859_v2 = vld [vmem:[%s19024_s1 + $0x790] ss:$20 sps:$4 sm:$0xff]   ;;  %v13860_v3 = vld [vmem:[%s19024_s1 + $0x678] ss:$20 sps:$4 sm:$0xff]  }
  0xb8   :  { %1769 = vmatprep.subr.bf16.mxu0 %v13802_v4  ;;  %1933 = vmatprep.subr.bf16.mxu1 %v13805_v6  ;;  %v15099_v4 = vmov 0.0   ;;  %v13862_v6 = vld [vmem:[%s19024_s1 + $0x7b8] ss:$0 sps:$4 sm:$0xff]  }
  0xbb   :  { %1770 = vmatpush1.bf16.msra.mxu0 %v13800_v7  ;;  %1934 = vmatpush1.bf16.msra.mxu1 %v13803_v8  ;;  %v13861_v7 = vld [vmem:[%s19024_s1 + $0x538] ss:$20 sps:$4 sm:$0xff]   ;;  %v13863_v8 = vld [vmem:[%s19024_s1 + $0x6a0] ss:$20 sps:$4 sm:$0xff]  }
  0xbc   :  { %1771 = vmatprep.subr.bf16.mxu0 %v13808_v9  ;;  %1935 = vmatprep.subr.bf16.mxu1 %v13811_v11  ;;  %v1657_v9 = vsel %vm1643_vm0, %v13862_v6, 0  ;;  %v13866_v11 = vld [vmem:[%s19024_s1 + $0x7c0] ss:$20 sps:$4 sm:$0xff]  }
  0xbd   :  { %v13940_v6 = vld [vmem:[%s19024_s1 + $0x8e0] ss:$20 sps:$4 sm:$0xff]  }
  0xbf   :  { %1772 = vmatpush1.bf16.msra.mxu0 %v13806_v12  ;;  %1936 = vmatpush1.bf16.msra.mxu1 %v13809_v14  ;;  %v13864_v12 = vld [vmem:[%s19024_s1 + $0x7bc] ss:$20 sps:$4 sm:$0xff]   ;;  %v13867_v14 = vld [vmem:[%s19024_s1 + $0x560] ss:$20 sps:$4 sm:$0xff]  }
  0xc0   :  { %1946 = vmatprep.subr.bf16.mxu1 %v13816_v16  ;;  %1782 = vmatprep.subr.bf16.mxu0 %v13819_v17  ;;  %v13868_v16 = vld [vmem:[%s19024_s1 + $0x6c8] ss:$20 sps:$4 sm:$0xff]  }
  0xc1   :  { %v13871_v17 = vld [vmem:[%s19024_s1 + $0x7e8] ss:$20 sps:$4 sm:$0xff]  }
  0xc2   :  { %1774 = vmatmul.mubr.bf16.vlgmr.msra.gmra.mrb[0].mxu0 %v15770_v20  ;;  %1938 = vmatmul.mubr.bf16.vlgmr.msra.gmra.mrb[0].mxu1 %v15770_v20 }
  0xc3   :  { %1947 = vmatpush1.bf16.msra.mxu1 %v13814_v21  ;;  %1783 = vmatpush1.bf16.msra.mxu0 %v13817_v22  ;;  %v13873_v21 = vld [vmem:[%s19024_s1 + $0x6f0] ss:$20 sps:$4 sm:$0xff]  }
  0xc4   :  { %10686 = vmatprep.subr.msk.bf16.mxu1 %vm1643_vm0, %v10682_v23  ;;  %10684 = vmatprep.subr.msk.bf16.mxu0 %vm1643_vm0, %v10680_v24  ;;  %v13876_v22 = vld [vmem:[%s19024_s1 + $0x810] ss:$20 sps:$4 sm:$0xff]   ;;  %v13874_v23 = vld [vmem:[%s19024_s1 + $0x80c] ss:$20 sps:$4 sm:$0xff]  }
  0xc5   :  { %1814 = vmatprep.mubr.bf16.mxu0 %v15098_v31  ;;  %1978 = vmatprep.mubr.bf16.mxu1 %v15098_v31  ;;  %v13877_v24 = vld [vmem:[%s19024_s1 + $0x5b0] ss:$20 sps:$4 sm:$0xff]  }
  0xc7   :  { %1949 = vmatpush1.bf16.msra.mxu1 %v1651_v27  ;;  %1785 = vmatpush1.bf16.msra.mxu0 %v1645_v28  ;;  %v13882_v27 = vld [vmem:[%s19024_s1 + $0x5d8] ss:$20 sps:$4 sm:$0xff]   ;;  %v13883_v28 = vld [vmem:[%s19024_s1 + $0x740] ss:$20 sps:$4 sm:$0xff]  }
  0xc8   :  { %12763 = vmatprep.subr.bf16.mxu0 %v13824_v13  ;;  %12785 = vmatprep.subr.bf16.mxu1 %v13825_v29  ;;  %v13879_v13 = vld [vmem:[%s19024_s1 + $0x834] ss:$20 sps:$4 sm:$0xff]  }
  0xc9   :  { %v13886_v29 = vld [vmem:[%s19024_s1 + $0x860] ss:$20 sps:$4 sm:$0xff]  }
  0xce   :  { %10685 = vmatmul.mubr.msk.bf16.vlgmr.msra.gmra.mrb[0].mxu0 %vm1639_vm1, %v15795_v32  ;;  %10687 = vmatmul.mubr.msk.bf16.vlgmr.msra.gmra.mrb[0].mxu1 %vm1639_vm1, %v15795_v32 }
  0xcf   :  { %12764 = vmatpush3.bf16.msra.mxu0 %v13827_v33  ;;  %12786 = vmatpush3.bf16.msra.mxu1 %v13828_v34  ;;  %v13887_v33 = vld [vmem:[%s19024_s1 + $0x600] ss:$20 sps:$4 sm:$0xff]   ;;  %v13888_v34 = vld [vmem:[%s19024_s1 + $0x768] ss:$20 sps:$4 sm:$0xff]  }
  0xd0   :  { %12765 = vmatprep.subr.bf16.mxu0 %v13829_v35  ;;  %12787 = vmatprep.subr.bf16.mxu1 %v13830_v36  ;;  %v13891_v35 = vld [vmem:[%s19024_s1 + $0x888] ss:$20 sps:$4 sm:$0xff]   ;;  %v13889_v36 = vld [vmem:[%s19024_s1 + $0x884] ss:$20 sps:$4 sm:$0xff]  }
  0xd1   :  { %2019 = vmatprep.mubr.bf16.mxu0 %v15285_v48  ;;  %2059 = vmatprep.mubr.bf16.mxu1 %v15429_v30 }
  0xd3   :  { %12766 = vmatpush3.bf16.msra.mxu0 %v13831_v37  ;;  %12788 = vmatpush3.bf16.msra.mxu1 %v13832_v38  ;;  %v13892_v37 = vld [vmem:[%s19024_s1 + $0x628] ss:$20 sps:$4 sm:$0xff]   ;;  %v13895_v38 = vld [vmem:[%s19024_s1 + $0x8b0] ss:$20 sps:$4 sm:$0xff]  }
  0xd4   :  { %12767 = vmatprep.subr.bf16.mxu0 %v13833_v39  ;;  %12789 = vmatprep.subr.bf16.mxu1 %v13834_v40  ;;  %v13898_v39 = vld [vmem:[%s19024_s1 + $0x7c8] ss:$20 sps:$4 sm:$0xff]   ;;  %v13893_v40 = vld [vmem:[%s19024_s1 + $0x8ac] ss:$20 sps:$4 sm:$0xff]  }
  0xd7   :  { %12768 = vmatpush3.bf16.msra.mxu0 %v13835_v41  ;;  %12790 = vmatpush3.bf16.msra.mxu1 %v13836_v42  ;;  %v13896_v41 = vld [vmem:[%s19024_s1 + $0x7c4] ss:$20 sps:$4 sm:$0xff]  }
  0xd8   :  { %12769 = vmatprep.subr.bf16.mxu0 %v13837_v43  ;;  %12791 = vmatprep.subr.bf16.mxu1 %v13838_v44  ;;  %v13901_v42 = vld [vmem:[%s19024_s1 + $0x8d8] ss:$20 sps:$4 sm:$0xff]   ;;  %v13904_v43 = vld [vmem:[%s19024_s1 + $0x7f0] ss:$20 sps:$4 sm:$0xff]   ;;  %v13899_v44 = vld [vmem:[%s19024_s1 + $0x8d4] ss:$20 sps:$4 sm:$0xff]  }
  0xdb   :  { %12770 = vmatpush3.bf16.msra.mxu0 %v13839_v45  ;;  %12792 = vmatpush3.bf16.msra.mxu1 %v13840_v46  ;;  %v13902_v45 = vld [vmem:[%s19024_s1 + $0x7ec] ss:$20 sps:$4 sm:$0xff]  }
  0xdc   :  { %12771 = vmatprep.subr.bf16.mxu0 %v13841_v47  ;;  %12793 = vmatprep.subr.bf16.mxu1 %v13842_v49  ;;  %v13907_v46 = vld [vmem:[%s19024_s1 + $0x900] ss:$20 sps:$4 sm:$0xff]   ;;  %v13910_v47 = vld [vmem:[%s19024_s1 + $0x818] ss:$20 sps:$4 sm:$0xff]   ;;  %v13905_v49 = vld [vmem:[%s19024_s1 + $0x8fc] ss:$20 sps:$4 sm:$0xff]  }
  0xdf   :  { %12772 = vmatpush3.bf16.msra.mxu0 %v13843_v50  ;;  %12794 = vmatpush3.bf16.msra.mxu1 %v13844_v51  ;;  %v13908_v50 = vld [vmem:[%s19024_s1 + $0x814] ss:$20 sps:$4 sm:$0xff]  }
  0xe0   :  { %12773 = vmatprep.subr.bf16.mxu0 %v13845_v52  ;;  %12795 = vmatprep.subr.bf16.mxu1 %v13846_v53  ;;  %v13913_v51 = vld [vmem:[%s19024_s1 + $0x928] ss:$20 sps:$4 sm:$0xff]   ;;  %v13916_v52 = vld [vmem:[%s19024_s1 + $0x840] ss:$20 sps:$4 sm:$0xff]   ;;  %v13911_v53 = vld [vmem:[%s19024_s1 + $0x924] ss:$20 sps:$4 sm:$0xff]  }
  0xe3   :  { %12774 = vmatpush3.bf16.msra.mxu0 %v13847_v54  ;;  %12796 = vmatpush3.bf16.msra.mxu1 %v13848_v55  ;;  %v13914_v54 = vld [vmem:[%s19024_s1 + $0x83c] ss:$20 sps:$4 sm:$0xff]  }
  0xe4   :  { %12775 = vmatprep.subr.bf16.mxu0 %v13849_v56  ;;  %12797 = vmatprep.subr.bf16.mxu1 %v13850_v57  ;;  %v13919_v55 = vld [vmem:[%s19024_s1 + $0x950] ss:$20 sps:$4 sm:$0xff]   ;;  %v13922_v56 = vld [vmem:[%s19024_s1 + $0x868] ss:$20 sps:$4 sm:$0xff]   ;;  %v13917_v57 = vld [vmem:[%s19024_s1 + $0x94c] ss:$20 sps:$4 sm:$0xff]  }
  0xe7   :  { %12776 = vmatpush3.bf16.msra.mxu0 %v13851_v58  ;;  %12798 = vmatpush3.bf16.msra.mxu1 %v13852_v59  ;;  %v13920_v58 = vld [vmem:[%s19024_s1 + $0x864] ss:$20 sps:$4 sm:$0xff]  }
  0xe8   :  { %12777 = vmatprep.subr.bf16.mxu0 %v13853_v60  ;;  %12799 = vmatprep.subr.bf16.mxu1 %v13854_v61  ;;  %v13925_v59 = vld [vmem:[%s19024_s1 + $0x978] ss:$20 sps:$4 sm:$0xff]   ;;  %v13928_v60 = vld [vmem:[%s19024_s1 + $0x890] ss:$20 sps:$4 sm:$0xff]   ;;  %v13923_v61 = vld [vmem:[%s19024_s1 + $0x974] ss:$20 sps:$4 sm:$0xff]  }
  0xeb   :  { %12778 = vmatpush3.bf16.msra.mxu0 %v13855_v62  ;;  %12800 = vmatpush3.bf16.msra.mxu1 %v13856_v63  ;;  %v13926_v62 = vld [vmem:[%s19024_s1 + $0x88c] ss:$20 sps:$4 sm:$0xff]  }
  0xec   :  { %12807 = vmatprep.subr.bf16.mxu0 %v13857_v0  ;;  %13269 = vmatprep.subr.bf16.mxu1 %v15099_v4  ;;  %v13931_v63 = vld [vmem:[%s19024_s1 + $0x9a0] ss:$20 sps:$4 sm:$0xff]   ;;  %v13934_v0 = vld [vmem:[%s19024_s1 + $0x8b8] ss:$20 sps:$4 sm:$0xff]  }
  0xee   :  { %2020 = vmatmul.mubr.bf16.vlgmr.msra.gmra.mrb[4].mxu0 %v15349_v5  ;;  %2060 = vmatmul.mubr.bf16.vlgmr.msra.gmra.mrb[4].mxu1 %v15558_v10 }
  0xef   :  { %12808 = vmatpush3.bf16.msra.mxu0 %v13858_v1  ;;  %13270 = vmatpush3.bf16.msra.mxu1 %v13859_v2  ;;  %v13929_v1 = vld [vmem:[%s19024_s1 + $0x99c] ss:$20 sps:$4 sm:$0xff]   ;;  %v13932_v2 = vld [vmem:[%s19024_s1 + $0x8b4] ss:$20 sps:$4 sm:$0xff]  }
  0xf0   :  { %12809 = vmatprep.subr.bf16.mxu0 %v13860_v3  ;;  %13271 = vmatprep.subr.bf16.mxu1 %v15099_v4  ;;  %v13937_v3 = vld [vmem:[%s19024_s1 + $0x9c8] ss:$20 sps:$4 sm:$0xff]  }
  0xf1   :  { %13273 = vmatprep.mubr.msk.bf16.mxu1 %vm15100_vm2, %v15099_v4  ;;  %2099 = vmatprep.mubr.bf16.mxu0 %v15576_v15 }
  0xf3   :  { %12810 = vmatpush3.bf16.msra.mxu0 %v13861_v7  ;;  %13272 = vmatpush3.bf16.msra.mxu1 %v1657_v9  ;;  %v13935_v7 = vld [vmem:[%s19024_s1 + $0x9c4] ss:$20 sps:$4 sm:$0xff]  }
  0xf4   :  { %12811 = vmatprep.subr.bf16.mxu0 %v13863_v8  ;;  %3747 = vmatprep.subr.bf16.mxu1 %v13866_v11  ;;  %v13938_v8 = vld [vmem:[%s19024_s1 + $0x8dc] ss:$20 sps:$4 sm:$0xff]  }
  0xf5   :  { %v13943_v9 = vld [vmem:[%s19024_s1 + $0x9f0] ss:$20 sps:$4 sm:$0xff]   ;;  %v13946_v11 = vld [vmem:[%s19024_s1 + $0x908] ss:$20 sps:$4 sm:$0xff]  }
  0xf6   :  { %13274 = vmatmul.mubr.msk.bf16.vlgmr.msra.gmra.mrb[8].mxu1 %vm1639_vm1, %v15795_v32  ;;  %v13884_v32 = vld [vmem:[%s19024_s1 + $0x85c] ss:$20 sps:$4 sm:$0xff]  }
  0xf7   :  { %12812 = vmatpush3.bf16.msra.mxu0 %v13867_v14  ;;  %3748 = vmatpush1.bf16.msra.mxu1 %v13864_v12  ;;  %v13941_v12 = vld [vmem:[%s19024_s1 + $0x9ec] ss:$20 sps:$4 sm:$0xff]   ;;  %v13944_v14 = vld [vmem:[%s19024_s1 + $0x904] ss:$20 sps:$4 sm:$0xff]  }
  0xf8   :  { %12813 = vmatprep.subr.bf16.mxu0 %v13868_v16  ;;  %3749 = vmatprep.subr.bf16.mxu1 %v13871_v17  ;;  %v13949_v16 = vld [vmem:[%s19024_s1 + $0xa18] ss:$20 sps:$4 sm:$0xff]   ;;  %v13952_v17 = vld [vmem:[%s19024_s1 + $0x930] ss:$20 sps:$4 sm:$0xff]  }
  0xf9   :  { %3779 = vmatprep.mubr.bf16.mxu1 %v15285_v48 }
  0xfb   :  { %12814 = vmatpush3.bf16.msra.mxu0 %v13872_v19  ;;  %3750 = vmatpush1.bf16.msra.mxu1 %v13869_v18  ;;  %v13947_v18 = vld [vmem:[%s19024_s1 + $0xa14] ss:$20 sps:$4 sm:$0xff]   ;;  %v13950_v19 = vld [vmem:[%s19024_s1 + $0x92c] ss:$20 sps:$4 sm:$0xff]  }
  0xfc   :  { %12815 = vmatprep.subr.bf16.mxu0 %v13873_v21  ;;  %3751 = vmatprep.subr.bf16.mxu1 %v13876_v22  ;;  %v13955_v21 = vld [vmem:[%s19024_s1 + $0xa40] ss:$20 sps:$4 sm:$0xff]   ;;  %v13958_v22 = vld [vmem:[%s19024_s1 + $0x958] ss:$20 sps:$4 sm:$0xff]  }
  0xff   :  { %12816 = vmatpush3.bf16.msra.mxu0 %v13877_v24  ;;  %3752 = vmatpush1.bf16.msra.mxu1 %v13874_v23  ;;  %v13953_v23 = vld [vmem:[%s19024_s1 + $0xa3c] ss:$20 sps:$4 sm:$0xff]   ;;  %v13956_v24 = vld [vmem:[%s19024_s1 + $0x954] ss:$20 sps:$4 sm:$0xff]  }
 0x100   :  { %12817 = vmatprep.subr.bf16.mxu0 %v13878_v25  ;;  %3753 = vmatprep.subr.bf16.mxu1 %v13881_v26  ;;  %v13961_v25 = vld [vmem:[%s19024_s1 + $0xa68] ss:$20 sps:$4 sm:$0xff]   ;;  %v13964_v26 = vld [vmem:[%s19024_s1 + $0x980] ss:$20 sps:$4 sm:$0xff]  }
 0x103   :  { %12818 = vmatpush3.bf16.msra.mxu0 %v13882_v27  ;;  %3754 = vmatpush1.bf16.msra.mxu1 %v13879_v13  ;;  %v13959_v13 = vld [vmem:[%s19024_s1 + $0xa64] ss:$20 sps:$4 sm:$0xff]   ;;  %v13962_v27 = vld [vmem:[%s19024_s1 + $0x97c] ss:$20 sps:$4 sm:$0xff]  }
 0x104   :  { %12819 = vmatprep.subr.bf16.mxu0 %v13883_v28  ;;  %3755 = vmatprep.subr.bf16.mxu1 %v13886_v29  ;;  %v13967_v28 = vld [vmem:[%s19024_s1 + $0xa90] ss:$20 sps:$4 sm:$0xff]   ;;  %v13970_v29 = vld [vmem:[%s19024_s1 + $0x9a8] ss:$20 sps:$4 sm:$0xff]  }
 0x107   :  { %12820 = vmatpush3.bf16.msra.mxu0 %v13887_v33  ;;  %3756 = vmatpush1.bf16.msra.mxu1 %v13884_v32  ;;  %v13965_v32 = vld [vmem:[%s19024_s1 + $0xa8c] ss:$20 sps:$4 sm:$0xff]   ;;  %v13968_v33 = vld [vmem:[%s19024_s1 + $0x9a4] ss:$20 sps:$4 sm:$0xff]  }
 0x108   :  { %12821 = vmatprep.subr.bf16.mxu0 %v13888_v34  ;;  %3757 = vmatprep.subr.bf16.mxu1 %v13891_v35  ;;  %v13973_v34 = vld [vmem:[%s19024_s1 + $0xab8] ss:$20 sps:$4 sm:$0xff]   ;;  %v13976_v35 = vld [vmem:[%s19024_s1 + $0x9d0] ss:$20 sps:$4 sm:$0xff]  }
 0x10b   :  { %12822 = vmatpush3.bf16.msra.mxu0 %v13892_v37  ;;  %3758 = vmatpush1.bf16.msra.mxu1 %v13889_v36  ;;  %v13971_v36 = vld [vmem:[%s19024_s1 + $0xab4] ss:$20 sps:$4 sm:$0xff]   ;;  %v13974_v37 = vld [vmem:[%s19024_s1 + $0x9cc] ss:$20 sps:$4 sm:$0xff]  }
 0x10c   :  { %3759 = vmatprep.subr.bf16.mxu1 %v13895_v38  ;;  %3911 = vmatprep.subr.bf16.mxu0 %v13898_v39  ;;  %v13979_v38 = vld [vmem:[%s19024_s1 + $0xae0] ss:$20 sps:$4 sm:$0xff]   ;;  %v13982_v39 = vld [vmem:[%s19024_s1 + $0x9f8] ss:$20 sps:$4 sm:$0xff]  }
 0x10e   :  { %2100 = vmatmul.mubr.bf16.vlgmr.msra.gmra.mrb[8].mxu0 %v15770_v20 }
 0x10f   :  { %3760 = vmatpush1.bf16.msra.mxu1 %v13893_v40  ;;  %3912 = vmatpush1.bf16.msra.mxu0 %v13896_v41  ;;  %v13977_v40 = vld [vmem:[%s19024_s1 + $0xadc] ss:$20 sps:$4 sm:$0xff]   ;;  %v13980_v41 = vld [vmem:[%s19024_s1 + $0x9f4] ss:$20 sps:$4 sm:$0xff]  }
 0x110   :  { %3761 = vmatprep.subr.bf16.mxu1 %v13901_v42  ;;  %3913 = vmatprep.subr.bf16.mxu0 %v13904_v43  ;;  %v13985_v42 = vld [vmem:[%s19024_s1 + $0xb08] ss:$20 sps:$4 sm:$0xff]   ;;  %v13988_v43 = vld [vmem:[%s19024_s1 + $0xa20] ss:$20 sps:$4 sm:$0xff]  }
 0x111   :  { %3943 = vmatprep.mubr.bf16.mxu0 %v15285_v48 }
 0x113   :  { %3762 = vmatpush1.bf16.msra.mxu1 %v13899_v44  ;;  %3914 = vmatpush1.bf16.msra.mxu0 %v13902_v45  ;;  %v13983_v44 = vld [vmem:[%s19024_s1 + $0xb04] ss:$20 sps:$4 sm:$0xff]   ;;  %v13986_v45 = vld [vmem:[%s19024_s1 + $0xa1c] ss:$20 sps:$4 sm:$0xff]  }
 0x114   :  { %3763 = vmatprep.subr.bf16.mxu1 %v13907_v46  ;;  %3915 = vmatprep.subr.bf16.mxu0 %v13910_v47  ;;  %v13991_v46 = vld [vmem:[%s19024_s1 + $0xb30] ss:$20 sps:$4 sm:$0xff]   ;;  %v13994_v47 = vld [vmem:[%s19024_s1 + $0xa48] ss:$20 sps:$4 sm:$0xff]  }
 0x117   :  { %3764 = vmatpush1.bf16.msra.mxu1 %v13905_v49  ;;  %3916 = vmatpush1.bf16.msra.mxu0 %v13908_v50  ;;  %v13989_v49 = vld [vmem:[%s19024_s1 + $0xb2c] ss:$20 sps:$4 sm:$0xff]   ;;  %v13992_v50 = vld [vmem:[%s19024_s1 + $0xa44] ss:$20 sps:$4 sm:$0xff]  }
 0x118   :  { %3765 = vmatprep.subr.bf16.mxu1 %v13913_v51  ;;  %3917 = vmatprep.subr.bf16.mxu0 %v13916_v52  ;;  %v13997_v51 = vld [vmem:[%s19024_s1 + $0xb58] ss:$20 sps:$4 sm:$0xff]   ;;  %v14000_v52 = vld [vmem:[%s19024_s1 + $0xa70] ss:$20 sps:$4 sm:$0xff]  }
 0x11b   :  { %3766 = vmatpush1.bf16.msra.mxu1 %v13911_v53  ;;  %3918 = vmatpush1.bf16.msra.mxu0 %v13914_v54  ;;  %v13995_v53 = vld [vmem:[%s19024_s1 + $0xb54] ss:$20 sps:$4 sm:$0xff]   ;;  %v13998_v54 = vld [vmem:[%s19024_s1 + $0xa6c] ss:$20 sps:$4 sm:$0xff]  }
 0x11c   :  { %3767 = vmatprep.subr.bf16.mxu1 %v13919_v55  ;;  %3919 = vmatprep.subr.bf16.mxu0 %v13922_v56  ;;  %v14003_v55 = vld [vmem:[%s19024_s1 + $0xb80] ss:$20 sps:$4 sm:$0xff]   ;;  %v14006_v56 = vld [vmem:[%s19024_s1 + $0xa98] ss:$20 sps:$4 sm:$0xff]  }
 0x11f   :  { %3768 = vmatpush1.bf16.msra.mxu1 %v13917_v57  ;;  %3920 = vmatpush1.bf16.msra.mxu0 %v13920_v58  ;;  %v14001_v57 = vld [vmem:[%s19024_s1 + $0xb7c] ss:$20 sps:$4 sm:$0xff]   ;;  %v14004_v58 = vld [vmem:[%s19024_s1 + $0xa94] ss:$20 sps:$4 sm:$0xff]  }
 0x120   :  { %3769 = vmatprep.subr.bf16.mxu1 %v13925_v59  ;;  %3921 = vmatprep.subr.bf16.mxu0 %v13928_v60  ;;  %v14009_v59 = vld [vmem:[%s19024_s1 + $0xba8] ss:$20 sps:$4 sm:$0xff]   ;;  %v14012_v60 = vld [vmem:[%s19024_s1 + $0xac0] ss:$20 sps:$4 sm:$0xff]  }
 0x123   :  { %3770 = vmatpush1.bf16.msra.mxu1 %v13923_v61  ;;  %3922 = vmatpush1.bf16.msra.mxu0 %v13926_v62  ;;  %v14007_v61 = vld [vmem:[%s19024_s1 + $0xba4] ss:$20 sps:$4 sm:$0xff]   ;;  %v14010_v62 = vld [vmem:[%s19024_s1 + $0xabc] ss:$20 sps:$4 sm:$0xff]  }
 0x124   :  { %3771 = vmatprep.subr.bf16.mxu1 %v13931_v63  ;;  %3923 = vmatprep.subr.bf16.mxu0 %v13934_v0  ;;  %v14015_v63 = vld [vmem:[%s19024_s1 + $0xbd0] ss:$20 sps:$4 sm:$0xff]   ;;  %v14018_v0 = vld [vmem:[%s19024_s1 + $0xae8] ss:$20 sps:$4 sm:$0xff]  }
 0x127   :  { %3772 = vmatpush1.bf16.msra.mxu1 %v13929_v1  ;;  %3924 = vmatpush1.bf16.msra.mxu0 %v13932_v2  ;;  %v14013_v1 = vld [vmem:[%s19024_s1 + $0xbcc] ss:$20 sps:$4 sm:$0xff]   ;;  %v14016_v2 = vld [vmem:[%s19024_s1 + $0xae4] ss:$20 sps:$4 sm:$0xff]  }
 0x128   :  { %3773 = vmatprep.subr.bf16.mxu1 %v13937_v3  ;;  %3925 = vmatprep.subr.bf16.mxu0 %v13940_v6  ;;  %v14021_v3 = vld [vmem:[%s19024_s1 + $0xbf8] ss:$20 sps:$4 sm:$0xff]   ;;  %v14024_v6 = vld [vmem:[%s19024_s1 + $0xb10] ss:$20 sps:$4 sm:$0xff]  }
 0x12b   :  { %3774 = vmatpush1.bf16.msra.mxu1 %v13935_v7  ;;  %3926 = vmatpush1.bf16.msra.mxu0 %v13938_v8  ;;  %v14019_v7 = vld [vmem:[%s19024_s1 + $0xbf4] ss:$20 sps:$4 sm:$0xff]   ;;  %v14022_v8 = vld [vmem:[%s19024_s1 + $0xb0c] ss:$20 sps:$4 sm:$0xff]  }
 0x12c   :  { %3775 = vmatprep.subr.bf16.mxu1 %v13943_v9  ;;  %3927 = vmatprep.subr.bf16.mxu0 %v13946_v11  ;;  %v14027_v9 = vld [vmem:[%s19024_s1 + $0xc20] ss:$20 sps:$4 sm:$0xff]   ;;  %v14030_v11 = vld [vmem:[%s19024_s1 + $0xb38] ss:$20 sps:$4 sm:$0xff]  }
 0x12f   :  { %3776 = vmatpush1.bf16.msra.mxu1 %v13941_v12  ;;  %3928 = vmatpush1.bf16.msra.mxu0 %v13944_v14  ;;  %v14025_v12 = vld [vmem:[%s19024_s1 + $0xc1c] ss:$20 sps:$4 sm:$0xff]   ;;  %v14028_v14 = vld [vmem:[%s19024_s1 + $0xb34] ss:$20 sps:$4 sm:$0xff]  }
 0x130   :  { %3777 = vmatprep.subr.bf16.mxu1 %v13949_v16  ;;  %3929 = vmatprep.subr.bf16.mxu0 %v13952_v17  ;;  %v14033_v16 = vld [vmem:[%s19024_s1 + $0xc48] ss:$20 sps:$4 sm:$0xff]   ;;  %v14036_v17 = vld [vmem:[%s19024_s1 + $0xb60] ss:$20 sps:$4 sm:$0xff]  }
 0x133   :  { %3778 = vmatpush1.bf16.msra.mxu1 %v13947_v18  ;;  %3930 = vmatpush1.bf16.msra.mxu0 %v13950_v19  ;;  %v14031_v18 = vld [vmem:[%s19024_s1 + $0xc44] ss:$20 sps:$4 sm:$0xff]   ;;  %v14034_v19 = vld [vmem:[%s19024_s1 + $0xb5c] ss:$20 sps:$4 sm:$0xff]  }
 0x134   :  { %3788 = vmatprep.subr.bf16.mxu1 %v13955_v21  ;;  %3931 = vmatprep.subr.bf16.mxu0 %v13958_v22  ;;  %v14039_v21 = vld [vmem:[%s19024_s1 + $0xc70] ss:$20 sps:$4 sm:$0xff]   ;;  %v14042_v22 = vld [vmem:[%s19024_s1 + $0xb88] ss:$20 sps:$4 sm:$0xff]  }
 0x136   :  { %3780 = vmatmul.mubr.bf16.vlgmr.msra.gmra.mrb[12].mxu1 %v15349_v5 }
 0x137   :  { %3789 = vmatpush1.bf16.msra.mxu1 %v13953_v23  ;;  %3932 = vmatpush1.bf16.msra.mxu0 %v13956_v24  ;;  %v14037_v23 = vld [vmem:[%s19024_s1 + $0xc6c] ss:$20 sps:$4 sm:$0xff]   ;;  %v14040_v24 = vld [vmem:[%s19024_s1 + $0xb84] ss:$20 sps:$4 sm:$0xff]  }
 0x138   :  { %3790 = vmatprep.subr.bf16.mxu1 %v13961_v25  ;;  %3933 = vmatprep.subr.bf16.mxu0 %v13964_v26  ;;  %v14045_v25 = vld [vmem:[%s19024_s1 + $0xc98] ss:$20 sps:$4 sm:$0xff]   ;;  %v14048_v26 = vld [vmem:[%s19024_s1 + $0xbb0] ss:$20 sps:$4 sm:$0xff]  }
 0x139   :  { %3820 = vmatprep.mubr.bf16.mxu1 %v15429_v30 }
 0x13b   :  { %3791 = vmatpush1.bf16.msra.mxu1 %v13959_v13  ;;  %3934 = vmatpush1.bf16.msra.mxu0 %v13962_v27  ;;  %v14043_v13 = vld [vmem:[%s19024_s1 + $0xc94] ss:$20 sps:$4 sm:$0xff]   ;;  %v14046_v27 = vld [vmem:[%s19024_s1 + $0xbac] ss:$20 sps:$4 sm:$0xff]  }
 0x13c   :  { %3792 = vmatprep.subr.bf16.mxu1 %v13967_v28  ;;  %3935 = vmatprep.subr.bf16.mxu0 %v13970_v29  ;;  %v14051_v28 = vld [vmem:[%s19024_s1 + $0xcc0] ss:$20 sps:$4 sm:$0xff]   ;;  %v14054_v29 = vld [vmem:[%s19024_s1 + $0xbd8] ss:$20 sps:$4 sm:$0xff]  }
 0x13f   :  { %3793 = vmatpush1.bf16.msra.mxu1 %v13965_v32  ;;  %3936 = vmatpush1.bf16.msra.mxu0 %v13968_v33  ;;  %v14049_v32 = vld [vmem:[%s19024_s1 + $0xcbc] ss:$20 sps:$4 sm:$0xff]   ;;  %v14052_v33 = vld [vmem:[%s19024_s1 + $0xbd4] ss:$20 sps:$4 sm:$0xff]  }
 0x140   :  { %3794 = vmatprep.subr.bf16.mxu1 %v13973_v34  ;;  %3937 = vmatprep.subr.bf16.mxu0 %v13976_v35  ;;  %v14057_v34 = vld [vmem:[%s19024_s1 + $0xce8] ss:$20 sps:$4 sm:$0xff]   ;;  %v14060_v35 = vld [vmem:[%s19024_s1 + $0xc00] ss:$20 sps:$4 sm:$0xff]  }
 0x143   :  { %3795 = vmatpush1.bf16.msra.mxu1 %v13971_v36  ;;  %3938 = vmatpush1.bf16.msra.mxu0 %v13974_v37  ;;  %v14055_v36 = vld [vmem:[%s19024_s1 + $0xce4] ss:$20 sps:$4 sm:$0xff]   ;;  %v14058_v37 = vld [vmem:[%s19024_s1 + $0xbfc] ss:$20 sps:$4 sm:$0xff]  }
 0x144   :  { %3796 = vmatprep.subr.bf16.mxu1 %v13979_v38  ;;  %3939 = vmatprep.subr.bf16.mxu0 %v13982_v39  ;;  %v14063_v38 = vld [vmem:[%s19024_s1 + $0xd10] ss:$20 sps:$4 sm:$0xff]   ;;  %v14066_v39 = vld [vmem:[%s19024_s1 + $0xc28] ss:$20 sps:$4 sm:$0xff]  }
 0x147   :  { %3797 = vmatpush1.bf16.msra.mxu1 %v13977_v40  ;;  %3940 = vmatpush1.bf16.msra.mxu0 %v13980_v41  ;;  %v14061_v40 = vld [vmem:[%s19024_s1 + $0xd0c] ss:$20 sps:$4 sm:$0xff]   ;;  %v14064_v41 = vld [vmem:[%s19024_s1 + $0xc24] ss:$20 sps:$4 sm:$0xff]  }
 0x148   :  { %3798 = vmatprep.subr.bf16.mxu1 %v13985_v42  ;;  %3941 = vmatprep.subr.bf16.mxu0 %v13988_v43  ;;  %v14069_v42 = vld [vmem:[%s19024_s1 + $0xd38] ss:$20 sps:$4 sm:$0xff]   ;;  %v14072_v43 = vld [vmem:[%s19024_s1 + $0xc50] ss:$20 sps:$4 sm:$0xff]  }
 0x14b   :  { %3799 = vmatpush1.bf16.msra.mxu1 %v13983_v44  ;;  %3942 = vmatpush1.bf16.msra.mxu0 %v13986_v45  ;;  %v14067_v44 = vld [vmem:[%s19024_s1 + $0xd34] ss:$20 sps:$4 sm:$0xff]   ;;  %v14070_v45 = vld [vmem:[%s19024_s1 + $0xc4c] ss:$20 sps:$4 sm:$0xff]  }
 0x14c   :  { %3800 = vmatprep.subr.bf16.mxu1 %v13991_v46  ;;  %3952 = vmatprep.subr.bf16.mxu0 %v13994_v47  ;;  %v14075_v46 = vld [vmem:[%s19024_s1 + $0xd60] ss:$20 sps:$4 sm:$0xff]   ;;  %v14078_v47 = vld [vmem:[%s19024_s1 + $0xc78] ss:$20 sps:$4 sm:$0xff]  }
 0x14e   :  { %3944 = vmatmul.mubr.bf16.vlgmr.msra.gmra.mrb[12].mxu0 %v15349_v5 }
 0x14f   :  { %3801 = vmatpush1.bf16.msra.mxu1 %v13989_v49  ;;  %3953 = vmatpush1.bf16.msra.mxu0 %v13992_v50  ;;  %v14073_v49 = vld [vmem:[%s19024_s1 + $0xd5c] ss:$20 sps:$4 sm:$0xff]   ;;  %v14076_v50 = vld [vmem:[%s19024_s1 + $0xc74] ss:$20 sps:$4 sm:$0xff]  }
 0x150   :  { %3802 = vmatprep.subr.bf16.mxu1 %v13997_v51  ;;  %3954 = vmatprep.subr.bf16.mxu0 %v14000_v52  ;;  %v14081_v51 = vld [vmem:[%s19024_s1 + $0xd88] ss:$20 sps:$4 sm:$0xff]   ;;  %v14084_v52 = vld [vmem:[%s19024_s1 + $0xca0] ss:$20 sps:$4 sm:$0xff]  }
 0x151   :  { %3984 = vmatprep.mubr.bf16.mxu0 %v15429_v30 }
 0x153   :  { %3803 = vmatpush1.bf16.msra.mxu1 %v13995_v53  ;;  %3955 = vmatpush1.bf16.msra.mxu0 %v13998_v54  ;;  %v14079_v53 = vld [vmem:[%s19024_s1 + $0xd84] ss:$20 sps:$4 sm:$0xff]   ;;  %v14082_v54 = vld [vmem:[%s19024_s1 + $0xc9c] ss:$20 sps:$4 sm:$0xff]  }
 0x154   :  { %3804 = vmatprep.subr.bf16.mxu1 %v14003_v55  ;;  %3956 = vmatprep.subr.bf16.mxu0 %v14006_v56  ;;  %v14087_v55 = vld [vmem:[%s19024_s1 + $0xdb0] ss:$20 sps:$4 sm:$0xff]   ;;  %v14090_v56 = vld [vmem:[%s19024_s1 + $0xcc8] ss:$20 sps:$4 sm:$0xff]  }
 0x157   :  { %3805 = vmatpush1.bf16.msra.mxu1 %v14001_v57  ;;  %3957 = vmatpush1.bf16.msra.mxu0 %v14004_v58  ;;  %v14085_v57 = vld [vmem:[%s19024_s1 + $0xdac] ss:$20 sps:$4 sm:$0xff]   ;;  %v14088_v58 = vld [vmem:[%s19024_s1 + $0xcc4] ss:$20 sps:$4 sm:$0xff]  }
 0x158   :  { %3806 = vmatprep.subr.bf16.mxu1 %v14009_v59  ;;  %3958 = vmatprep.subr.bf16.mxu0 %v14012_v60  ;;  %v14093_v59 = vld [vmem:[%s19024_s1 + $0xdd8] ss:$20 sps:$4 sm:$0xff]   ;;  %v14096_v60 = vld [vmem:[%s19024_s1 + $0xcf0] ss:$20 sps:$4 sm:$0xff]  }
 0x15b   :  { %3807 = vmatpush1.bf16.msra.mxu1 %v14007_v61  ;;  %3959 = vmatpush1.bf16.msra.mxu0 %v14010_v62  ;;  %v14091_v61 = vld [vmem:[%s19024_s1 + $0xdd4] ss:$20 sps:$4 sm:$0xff]   ;;  %v14094_v62 = vld [vmem:[%s19024_s1 + $0xcec] ss:$20 sps:$4 sm:$0xff]  }
 0x15c   :  { %3808 = vmatprep.subr.bf16.mxu1 %v14015_v63  ;;  %3960 = vmatprep.subr.bf16.mxu0 %v14018_v0  ;;  %v14099_v63 = vld [vmem:[%s19024_s1 + $0xe00] ss:$20 sps:$4 sm:$0xff]   ;;  %v14102_v0 = vld [vmem:[%s19024_s1 + $0xd18] ss:$20 sps:$4 sm:$0xff]  }
 0x15f   :  { %3809 = vmatpush1.bf16.msra.mxu1 %v14013_v1  ;;  %3961 = vmatpush1.bf16.msra.mxu0 %v14016_v2  ;;  %v14097_v1 = vld [vmem:[%s19024_s1 + $0xdfc] ss:$20 sps:$4 sm:$0xff]   ;;  %v14100_v2 = vld [vmem:[%s19024_s1 + $0xd14] ss:$20 sps:$4 sm:$0xff]  }
 0x160   :  { %3810 = vmatprep.subr.bf16.mxu1 %v14021_v3  ;;  %3962 = vmatprep.subr.bf16.mxu0 %v14024_v6  ;;  %v14105_v3 = vld [vmem:[%s19024_s1 + $0xe28] ss:$20 sps:$4 sm:$0xff]   ;;  %v14108_v6 = vld [vmem:[%s19024_s1 + $0xd40] ss:$20 sps:$4 sm:$0xff]  }
 0x163   :  { %3811 = vmatpush1.bf16.msra.mxu1 %v14019_v7  ;;  %3963 = vmatpush1.bf16.msra.mxu0 %v14022_v8  ;;  %v14103_v7 = vld [vmem:[%s19024_s1 + $0xe24] ss:$20 sps:$4 sm:$0xff]   ;;  %v14106_v8 = vld [vmem:[%s19024_s1 + $0xd3c] ss:$20 sps:$4 sm:$0xff]  }
 0x164   :  { %3812 = vmatprep.subr.bf16.mxu1 %v14027_v9  ;;  %3964 = vmatprep.subr.bf16.mxu0 %v14030_v11  ;;  %v14111_v9 = vld [vmem:[%s19024_s1 + $0xe50] ss:$20 sps:$4 sm:$0xff]   ;;  %v14114_v11 = vld [vmem:[%s19024_s1 + $0xd68] ss:$20 sps:$4 sm:$0xff]  }
 0x167   :  { %3813 = vmatpush1.bf16.msra.mxu1 %v14025_v12  ;;  %3965 = vmatpush1.bf16.msra.mxu0 %v14028_v14  ;;  %v14109_v12 = vld [vmem:[%s19024_s1 + $0xe4c] ss:$20 sps:$4 sm:$0xff]   ;;  %v14112_v14 = vld [vmem:[%s19024_s1 + $0xd64] ss:$20 sps:$4 sm:$0xff]  }
 0x168   :  { %3814 = vmatprep.subr.bf16.mxu1 %v14033_v16  ;;  %3966 = vmatprep.subr.bf16.mxu0 %v14036_v17  ;;  %v14117_v16 = vld [vmem:[%s19024_s1 + $0xe78] ss:$20 sps:$4 sm:$0xff]   ;;  %v14120_v17 = vld [vmem:[%s19024_s1 + $0xd90] ss:$20 sps:$4 sm:$0xff]  }
 0x16b   :  { %3815 = vmatpush1.bf16.msra.mxu1 %v14031_v18  ;;  %3967 = vmatpush1.bf16.msra.mxu0 %v14034_v19  ;;  %v14115_v18 = vld [vmem:[%s19024_s1 + $0xe74] ss:$20 sps:$4 sm:$0xff]   ;;  %v14118_v19 = vld [vmem:[%s19024_s1 + $0xd8c] ss:$20 sps:$4 sm:$0xff]  }
 0x16c   :  { %3816 = vmatprep.subr.bf16.mxu1 %v14039_v21  ;;  %3968 = vmatprep.subr.bf16.mxu0 %v14042_v22  ;;  %v14123_v21 = vld [vmem:[%s19024_s1 + $0xea0] ss:$20 sps:$4 sm:$0xff]   ;;  %v14126_v22 = vld [vmem:[%s19024_s1 + $0xdb8] ss:$20 sps:$4 sm:$0xff]  }
 0x16f   :  { %3817 = vmatpush1.bf16.msra.mxu1 %v14037_v23  ;;  %3969 = vmatpush1.bf16.msra.mxu0 %v14040_v24 }
 0x170   :  { %3818 = vmatprep.subr.bf16.mxu1 %v14045_v25  ;;  %3970 = vmatprep.subr.bf16.mxu0 %v14048_v26 }
 0x173   :  { %3819 = vmatpush1.bf16.msra.mxu1 %v14043_v13  ;;  %3971 = vmatpush1.bf16.msra.mxu0 %v14046_v27 }
 0x174   :  { %3829 = vmatprep.subr.bf16.mxu1 %v14051_v28  ;;  %3972 = vmatprep.subr.bf16.mxu0 %v14054_v29  ;;  %v14121_v28 = vld [vmem:[%s19024_s1 + $0xe9c] ss:$20 sps:$4 sm:$0xff]   ;;  %v14124_v29 = vld [vmem:[%s19024_s1 + $0xdb4] ss:$20 sps:$4 sm:$0xff]  }
 0x176   :  { %3821 = vmatmul.mubr.bf16.vlgmr.msra.gmra.mrb[12].mxu1 %v15558_v10 }
 0x177   :  { %3830 = vmatpush1.bf16.msra.mxu1 %v14049_v32  ;;  %3973 = vmatpush1.bf16.msra.mxu0 %v14052_v33 }
 0x178   :  { %3831 = vmatprep.subr.bf16.mxu1 %v14057_v34  ;;  %3974 = vmatprep.subr.bf16.mxu0 %v14060_v35  ;;  %v14129_v34 = vld [vmem:[%s19024_s1 + $0xec8] ss:$20 sps:$4 sm:$0xff]   ;;  %v14132_v35 = vld [vmem:[%s19024_s1 + $0xde0] ss:$20 sps:$4 sm:$0xff]  }
 0x179   :  { %3861 = vmatprep.mubr.bf16.mxu1 %v15576_v15 }
 0x17b   :  { %3832 = vmatpush1.bf16.msra.mxu1 %v14055_v36  ;;  %3975 = vmatpush1.bf16.msra.mxu0 %v14058_v37  ;;  %v14127_v36 = vld [vmem:[%s19024_s1 + $0xec4] ss:$20 sps:$4 sm:$0xff]   ;;  %v14130_v37 = vld [vmem:[%s19024_s1 + $0xddc] ss:$20 sps:$4 sm:$0xff]  }
 0x17c   :  { %3833 = vmatprep.subr.bf16.mxu1 %v14063_v38  ;;  %3976 = vmatprep.subr.bf16.mxu0 %v14066_v39  ;;  %v14135_v38 = vld [vmem:[%s19024_s1 + $0xef0] ss:$20 sps:$4 sm:$0xff]   ;;  %v14138_v39 = vld [vmem:[%s19024_s1 + $0xe08] ss:$20 sps:$4 sm:$0xff]  }
 0x17f   :  { %3834 = vmatpush1.bf16.msra.mxu1 %v14061_v40  ;;  %3977 = vmatpush1.bf16.msra.mxu0 %v14064_v41  ;;  %v14133_v40 = vld [vmem:[%s19024_s1 + $0xeec] ss:$20 sps:$4 sm:$0xff]   ;;  %v14136_v41 = vld [vmem:[%s19024_s1 + $0xe04] ss:$20 sps:$4 sm:$0xff]  }
 0x180   :  { %3835 = vmatprep.subr.bf16.mxu1 %v14069_v42  ;;  %3978 = vmatprep.subr.bf16.mxu0 %v14072_v43  ;;  %v14141_v42 = vld [vmem:[%s19024_s1 + $0xf18] ss:$20 sps:$4 sm:$0xff]   ;;  %v14144_v43 = vld [vmem:[%s19024_s1 + $0xe30] ss:$20 sps:$4 sm:$0xff]  }
 0x183   :  { %3836 = vmatpush1.bf16.msra.mxu1 %v14067_v44  ;;  %3979 = vmatpush1.bf16.msra.mxu0 %v14070_v45  ;;  %v14139_v44 = vld [vmem:[%s19024_s1 + $0xf14] ss:$20 sps:$4 sm:$0xff]   ;;  %v14142_v45 = vld [vmem:[%s19024_s1 + $0xe2c] ss:$20 sps:$4 sm:$0xff]  }
 0x184   :  { %3837 = vmatprep.subr.bf16.mxu1 %v14075_v46  ;;  %3980 = vmatprep.subr.bf16.mxu0 %v14078_v47  ;;  %v14150_v46 = vld [vmem:[%s19024_s1 + $0xe58] ss:$20 sps:$4 sm:$0xff]   ;;  %v14147_v47 = vld [vmem:[%s19024_s1 + $0xf40] ss:$20 sps:$4 sm:$0xff]  }
 0x187   :  { %3838 = vmatpush1.bf16.msra.mxu1 %v14073_v49  ;;  %3981 = vmatpush1.bf16.msra.mxu0 %v14076_v50  ;;  %v10983_v49 = vld [vmem:[%s19024_s1 + $0xf64] sm:$0xff]  ;;  %v14145_v50 = vld [vmem:[%s19024_s1 + $0xf3c] ss:$20 sps:$4 sm:$0xff]  }
 0x188   :  { %3839 = vmatprep.subr.bf16.mxu1 %v14081_v51  ;;  %3982 = vmatprep.subr.bf16.mxu0 %v14084_v52  ;;  %v14148_v51 = vld [vmem:[%s19024_s1 + $0xe54] ss:$20 sps:$4 sm:$0xff]  }
 0x189   :  { %v14153_v52 = vld [vmem:[%s19024_s1 + $0xe80] ss:$20 sps:$4 sm:$0xff]  }
 0x18b   :  { %3840 = vmatpush1.bf16.msra.mxu1 %v14079_v53  ;;  %3983 = vmatpush1.bf16.msra.mxu0 %v14082_v54  ;;  %v11232_v53 = vcombine.high %v10983_v49, %v10983_v49  ;;  %v11231_v54 = vcombine.low %v10983_v49, %v10983_v49  ;;  %v14187_v49 = vld [vmem:[%s19024_s1 + $0x8bc] ss:$20 sps:$4 sm:$0xff]  }
 0x18c   :  { %3841 = vmatprep.subr.bf16.mxu1 %v14087_v55  ;;  %3993 = vmatprep.subr.bf16.mxu0 %v14090_v56  ;;  %v14151_v55 = vld [vmem:[%s19024_s1 + $0xe7c] ss:$20 sps:$4 sm:$0xff]  }
 0x18d   :  { %v3733_v56 = vsel %vm1643_vm0, %v11231_v54, 0  ;;  %v14192_v54 = vld [vmem:[%s19024_s1 + $0xa74] ss:$20 sps:$4 sm:$0xff]  }
 0x18e   :  { %3985 = vmatmul.mubr.bf16.vlgmr.msra.gmra.mrb[12].mxu0 %v15558_v10 }
 0x18f   :  { %3842 = vmatpush1.bf16.msra.mxu1 %v14085_v57  ;;  %3994 = vmatpush1.bf16.msra.mxu0 %v14088_v58  ;;  %v14158_v57 = vld [vmem:[%s19024_s1 + $0xea8] ss:$20 sps:$4 sm:$0xff]   ;;  %v14159_v58 = vld [vmem:[%s19024_s1 + $0x90c] ss:$20 sps:$4 sm:$0xff]  }
 0x190   :  { %3843 = vmatprep.subr.bf16.mxu1 %v14093_v59  ;;  %3995 = vmatprep.subr.bf16.mxu0 %v14096_v60  ;;  %v14156_v59 = vld [vmem:[%s19024_s1 + $0xea4] ss:$20 sps:$4 sm:$0xff]  }
 0x191   :  { %4025 = vmatprep.mubr.bf16.mxu0 %v15576_v15  ;;  %v14162_v60 = vld [vmem:[%s19024_s1 + $0xed0] ss:$20 sps:$4 sm:$0xff]  }
 0x193   :  { %3844 = vmatpush1.bf16.msra.mxu1 %v14091_v61  ;;  %3996 = vmatpush1.bf16.msra.mxu0 %v14094_v62  ;;  %v14160_v61 = vld [vmem:[%s19024_s1 + $0xecc] ss:$20 sps:$4 sm:$0xff]  }
 0x194   :  { %3845 = vmatprep.subr.bf16.mxu1 %v14099_v63  ;;  %3997 = vmatprep.subr.bf16.mxu0 %v14102_v0  ;;  %v14163_v62 = vld [vmem:[%s19024_s1 + $0x7cc] ss:$20 sps:$4 sm:$0xff]   ;;  %v14164_v63 = vld [vmem:[%s19024_s1 + $0x934] ss:$20 sps:$4 sm:$0xff]  }
 0x195   :  { %v14167_v0 = vld [vmem:[%s19024_s1 + $0xef8] ss:$20 sps:$4 sm:$0xff]  }
 0x197   :  { %3846 = vmatpush1.bf16.msra.mxu1 %v14097_v1  ;;  %3998 = vmatpush1.bf16.msra.mxu0 %v14100_v2 }
 0x198   :  { %3847 = vmatprep.subr.bf16.mxu1 %v14105_v3  ;;  %3999 = vmatprep.subr.bf16.mxu0 %v14108_v6 }
 0x19b   :  { %3848 = vmatpush1.bf16.msra.mxu1 %v14103_v7  ;;  %4000 = vmatpush1.bf16.msra.mxu0 %v14106_v8  ;;  %v16568_v7 = vld [vmem:[%s19025_s0 + $0x18] ss:$0 sps:$4 sm:$0xff]  }
 0x19c   :  { %3849 = vmatprep.subr.bf16.mxu1 %v14111_v9  ;;  %4001 = vmatprep.subr.bf16.mxu0 %v14114_v11 }
 0x19f   :  { %3850 = vmatpush1.bf16.msra.mxu1 %v14109_v12  ;;  %4002 = vmatpush1.bf16.msra.mxu0 %v14112_v14  ;;  %v14165_v14 = vld [vmem:[%s19024_s1 + $0xef4] ss:$20 sps:$4 sm:$0xff]  }
 0x1a0   :  { %3851 = vmatprep.subr.bf16.mxu1 %v14117_v16  ;;  %4003 = vmatprep.subr.bf16.mxu0 %v14120_v17  ;;  %v14168_v16 = vld [vmem:[%s19024_s1 + $0x7f4] ss:$20 sps:$4 sm:$0xff]  }
 0x1a1   :  { %v16466_v23 = vpop.f32.mrb[0].mxu0  ;;  %v16468_v24 = vpop.f32.mrb[0].mxu1 }
 0x1a2   :  { %v16470_v25 = vpop.f32.mrb[1].mxu0  ;;  %v16472_v26 = vpop.f32.mrb[1].mxu1 }
 0x1a3   :  { %3852 = vmatpush1.bf16.msra.mxu1 %v14115_v18  ;;  %4004 = vmatpush1.bf16.msra.mxu0 %v14118_v19  ;;  %v1820_v13 = vpop.f32.mrb[2].mxu0  ;;  %v1984_v27 = vpop.f32.mrb[2].mxu1  ;;  %v14169_v19 = vld [vmem:[%s19024_s1 + $0x95c] ss:$20 sps:$4 sm:$0xff]  }
 0x1a4   :  { %v1821_v32 = vpop.f32.mrb[3].mxu0  ;;  %v1985_v33 = vpop.f32.mrb[3].mxu1  ;;  %3853 = vmatprep.subr.bf16.mxu1 %v14123_v21  ;;  %4005 = vmatprep.subr.bf16.mxu0 %v14126_v22  ;;  %v14172_v21 = vld [vmem:[%s19024_s1 + $0xf20] ss:$20 sps:$4 sm:$0xff]   ;;  %v14173_v13 = vld [vmem:[%s19024_s1 + $0x81c] ss:$20 sps:$4 sm:$0xff]  }
 0x1a5   :  { %v14170_v27 = vld [vmem:[%s19024_s1 + $0xf1c] ss:$20 sps:$4 sm:$0xff]  }
 0x1a6   :  { %v10984_v32 = vld [vmem:[%s19024_s1 + $0xf6c] sm:$0xff] }
 0x1a7   :  { %3854 = vmatpush1.bf16.msra.mxu1 %v14121_v28  ;;  %4006 = vmatpush1.bf16.msra.mxu0 %v14124_v29  ;;  %v14174_v28 = vld [vmem:[%s19024_s1 + $0x984] ss:$20 sps:$4 sm:$0xff]   ;;  %v14178_v29 = vld [vmem:[%s19024_s1 + $0xf48] ss:$20 sps:$4 sm:$0xff]  }
 0x1a8   :  { %3855 = vmatprep.subr.bf16.mxu1 %v14129_v34  ;;  %4007 = vmatprep.subr.bf16.mxu0 %v14132_v35 }
 0x1ab   :  { %3856 = vmatpush1.bf16.msra.mxu1 %v14127_v36  ;;  %4008 = vmatpush1.bf16.msra.mxu0 %v14130_v37  ;;  %v14175_v36 = vld [vmem:[%s19024_s1 + $0x844] ss:$20 sps:$4 sm:$0xff]  }
 0x1ac   :  { %3857 = vmatprep.subr.bf16.mxu1 %v14135_v38  ;;  %4009 = vmatprep.subr.bf16.mxu0 %v14138_v39  ;;  %v14176_v37 = vld [vmem:[%s19024_s1 + $0xf44] ss:$20 sps:$4 sm:$0xff]   ;;  %v14179_v39 = vld [vmem:[%s19024_s1 + $0x9ac] ss:$20 sps:$4 sm:$0xff]  }
 0x1af   :  { %3858 = vmatpush1.bf16.msra.mxu1 %v14133_v40  ;;  %4010 = vmatpush1.bf16.msra.mxu0 %v14136_v41  ;;  %v11234_v40 = vcombine.high %v10984_v32, %v10984_v32  ;;  %v11233_v41 = vcombine.low %v10984_v32, %v10984_v32  ;;  %v14215_v32 = vld [vmem:[%s19024_s1 + $0xb64] ss:$20 sps:$4 sm:$0xff]  }
 0x1b0   :  { %3859 = vmatprep.subr.bf16.mxu1 %v14141_v42  ;;  %4011 = vmatprep.subr.bf16.mxu0 %v14144_v43  ;;  %v14180_v42 = vld [vmem:[%s19024_s1 + $0x86c] ss:$20 sps:$4 sm:$0xff]   ;;  %v14182_v43 = vld [vmem:[%s19024_s1 + $0x9d4] ss:$20 sps:$4 sm:$0xff]  }
 0x1b3   :  { %3860 = vmatpush1.bf16.msra.mxu1 %v14139_v44  ;;  %4012 = vmatpush1.bf16.msra.mxu0 %v14142_v45  ;;  %v3739_v44 = vsel %vm1643_vm0, %v11233_v41, 0  ;;  %v14186_v45 = vld [vmem:[%s19024_s1 + $0xb8c] ss:$20 sps:$4 sm:$0xff]   ;;  %v14225_v41 = vld [vmem:[%s19024_s1 + $0xf7c] ss:$20 sps:$4 sm:$0xff]  }
 0x1b4   :  { %3870 = vmatprep.subr.bf16.mxu1 %v14147_v47  ;;  %4013 = vmatprep.subr.bf16.mxu0 %v14150_v46  ;;  %v14184_v46 = vld [vmem:[%s19024_s1 + $0x894] ss:$20 sps:$4 sm:$0xff]   ;;  %v14185_v47 = vld [vmem:[%s19024_s1 + $0x9fc] ss:$20 sps:$4 sm:$0xff]  }
 0x1b6   :  { %3862 = vmatmul.mubr.bf16.vlgmr.msra.gmra.mrb[12].mxu1 %v15770_v20 }
 0x1b7   :  { %3871 = vmatpush1.bf16.msra.mxu1 %v14145_v50  ;;  %4014 = vmatpush1.bf16.msra.mxu0 %v14148_v51  ;;  %v14188_v50 = vld [vmem:[%s19024_s1 + $0xa4c] ss:$20 sps:$4 sm:$0xff]   ;;  %v14189_v51 = vld [vmem:[%s19024_s1 + $0xa24] ss:$20 sps:$4 sm:$0xff]  }
 0x1b8   :  { %4015 = vmatprep.subr.bf16.mxu0 %v14153_v52  ;;  %11236 = vmatprep.subr.msk.bf16.mxu1 %vm1643_vm0, %v11232_v53  ;;  %v14190_v52 = vld [vmem:[%s19024_s1 + $0xbb4] ss:$20 sps:$4 sm:$0xff]   ;;  %v14191_v53 = vld [vmem:[%s19024_s1 + $0x8e4] ss:$20 sps:$4 sm:$0xff]  }
 0x1b9   :  { %3902 = vmatprep.mubr.bf16.mxu1 %v15098_v31 }
 0x1bb   :  { %4016 = vmatpush1.bf16.msra.mxu0 %v14151_v55  ;;  %3873 = vmatpush1.bf16.msra.mxu1 %v3733_v56  ;;  %v14193_v55 = vld [vmem:[%s19024_s1 + $0xbdc] ss:$20 sps:$4 sm:$0xff]   ;;  %v14194_v56 = vld [vmem:[%s19024_s1 + $0xe0c] ss:$20 sps:$4 sm:$0xff]  }
 0x1bc   :  { %4017 = vmatprep.subr.bf16.mxu0 %v14158_v57  ;;  %12832 = vmatprep.subr.bf16.mxu1 %v14159_v58  ;;  %v14195_v57 = vld [vmem:[%s19024_s1 + $0xa9c] ss:$20 sps:$4 sm:$0xff]   ;;  %v14196_v58 = vld [vmem:[%s19024_s1 + $0xccc] ss:$20 sps:$4 sm:$0xff]  }
 0x1bf   :  { %4018 = vmatpush1.bf16.msra.mxu0 %v14156_v59  ;;  %v14197_v59 = vld [vmem:[%s19024_s1 + $0xc04] ss:$20 sps:$4 sm:$0xff]  }
 0x1c0   :  { %4019 = vmatprep.subr.bf16.mxu0 %v14162_v60  ;;  %v14198_v60 = vld [vmem:[%s19024_s1 + $0xe34] ss:$20 sps:$4 sm:$0xff]  }
 0x1c1   :  { %v12779_v1 = vpop.f32.mrb[4].mxu0  ;;  %v12801_v2 = vpop.f32.mrb[4].mxu1 }
 0x1c2   :  { %v12780_v3 = vpop.f32.mrb[5].mxu0  ;;  %v12802_v6 = vpop.f32.mrb[5].mxu1  ;;  %11237 = vmatmul.mubr.msk.bf16.vlgmr.msra.gmra.mrb[12].mxu1 %vm1639_vm1, %v16568_v7 }
 0x1c3   :  { %v12781_v8 = vadd.f32 %v12780_v3, %v12779_v1  ;;  %v12803_v9 = vadd.f32 %v12802_v6, %v12801_v2  ;;  %12833 = vmatpush3.bf16.msra.mxu1 %v14163_v62  ;;  %v12804_v11 = vpop.f32.mrb[6].mxu1  ;;  %4020 = vmatpush1.bf16.msra.mxu0 %v14160_v61  ;;  %v12782_v12 = vpop.f32.mrb[6].mxu0  ;;  %v14199_v1 = vld [vmem:[%s19024_s1 + $0xac4] ss:$20 sps:$4 sm:$0xff]   ;;  %v14200_v2 = vld [vmem:[%s19024_s1 + $0xcf4] ss:$20 sps:$4 sm:$0xff]  }
 0x1c4   :  { %v12805_v17 = vpop.f32.mrb[7].mxu1  ;;  %12834 = vmatprep.subr.bf16.mxu1 %v14164_v63  ;;  %4021 = vmatprep.subr.bf16.mxu0 %v14167_v0  ;;  %v12783_v18 = vpop.f32.mrb[7].mxu0  ;;  %v14201_v6 = vld [vmem:[%s19024_s1 + $0xc2c] ss:$20 sps:$4 sm:$0xff]   ;;  %v14204_v12 = vld [vmem:[%s19024_s1 + $0xd1c] ss:$20 sps:$4 sm:$0xff]  }
 0x1c5   :  { %v16584_v22 = vadd.f32 %v12803_v9, %v12781_v8  ;;  %4107 = vmatprep.mubr.bf16.mxu1 %v15285_v48  ;;  %v14202_v8 = vld [vmem:[%s19024_s1 + $0xe5c] ss:$20 sps:$4 sm:$0xff]   ;;  %v14203_v11 = vld [vmem:[%s19024_s1 + $0xaec] ss:$20 sps:$4 sm:$0xff]   ;;  %v14206_v17 = vld [vmem:[%s19024_s1 + $0xe84] ss:$20 sps:$4 sm:$0xff]  }
 0x1c6   :  { %v14207_v18 = vld [vmem:[%s19024_s1 + $0xb14] ss:$20 sps:$4 sm:$0xff]  }
 0x1c7   :  { %12835 = vmatpush3.bf16.msra.mxu1 %v14168_v16  ;;  %4022 = vmatpush1.bf16.msra.mxu0 %v14165_v14  ;;  %v14205_v16 = vld [vmem:[%s19024_s1 + $0xc54] ss:$20 sps:$4 sm:$0xff]  }
 0x1c8   :  { %12836 = vmatprep.subr.bf16.mxu1 %v14169_v19  ;;  %4023 = vmatprep.subr.bf16.mxu0 %v14172_v21  ;;  %v14208_v19 = vld [vmem:[%s19024_s1 + $0xd44] ss:$20 sps:$4 sm:$0xff]   ;;  %v14209_v21 = vld [vmem:[%s19024_s1 + $0xc7c] ss:$20 sps:$4 sm:$0xff]  }
 0x1c9   :  { %v16602_v33 = vpop.f32.mrb[8].mxu1 }
 0x1ca   :  { %v13275_v34 = vpop.f32.mrb[9].mxu1 }
 0x1cb   :  { %12837 = vmatpush3.bf16.msra.mxu1 %v14173_v13  ;;  %v2144_v35 = vpop.f32.mrb[10].mxu1  ;;  %4024 = vmatpush1.bf16.msra.mxu0 %v14170_v27  ;;  %v14211_v13 = vld [vmem:[%s19024_s1 + $0xb3c] ss:$20 sps:$4 sm:$0xff]   ;;  %v14212_v27 = vld [vmem:[%s19024_s1 + $0xd6c] ss:$20 sps:$4 sm:$0xff]  }
 0x1cc   :  { %v13276_v38 = vpop.f32.mrb[11].mxu1  ;;  %12838 = vmatprep.subr.bf16.mxu1 %v14174_v28  ;;  %4034 = vmatprep.subr.bf16.mxu0 %v14178_v29  ;;  %v14213_v28 = vld [vmem:[%s19024_s1 + $0xca4] ss:$20 sps:$4 sm:$0xff]   ;;  %v14214_v29 = vld [vmem:[%s19024_s1 + $0xed4] ss:$20 sps:$4 sm:$0xff]  }
 0x1cd   :  { %v14217_v34 = vld [vmem:[%s19024_s1 + $0xefc] ss:$20 sps:$4 sm:$0xff]   ;;  %v14220_v38 = vld [vmem:[%s19024_s1 + $0xf24] ss:$20 sps:$4 sm:$0xff]  }
 0x1ce   :  { %4026 = vmatmul.mubr.bf16.vlgmr.msra.gmra.mrb[12].mxu0 %v15770_v20  ;;  %v14218_v35 = vld [vmem:[%s19024_s1 + $0xdbc] ss:$20 sps:$4 sm:$0xff]  }
 0x1cf   :  { %12839 = vmatpush3.bf16.msra.mxu1 %v14175_v36  ;;  %4035 = vmatpush1.bf16.msra.mxu0 %v14176_v37  ;;  %v14219_v36 = vld [vmem:[%s19024_s1 + $0xf4c] ss:$20 sps:$4 sm:$0xff]   ;;  %v14222_v37 = vld [vmem:[%s19024_s1 + $0xf74] ss:$0 sps:$4 sm:$0xff]  }
 0x1d0   :  { %12840 = vmatprep.subr.bf16.mxu1 %v14179_v39  ;;  %11238 = vmatprep.subr.msk.bf16.mxu0 %vm1643_vm0, %v11234_v40  ;;  %v14221_v39 = vld [vmem:[%s19024_s1 + $0xde4] ss:$20 sps:$4 sm:$0xff]   ;;  %v3745_v40 = vsel %vm1643_vm0, %v14222_v37, 0 }
 0x1d1   :  { %4066 = vmatprep.mubr.bf16.mxu0 %v15098_v31  ;;  %v14292_v37 = vld [vmem:[%s19024_s1 + $0x1138] ss:$20 sps:$4 sm:$0xff]  }
 0x1d3   :  { %12841 = vmatpush3.bf16.msra.mxu1 %v14180_v42  ;;  %4037 = vmatpush1.bf16.msra.mxu0 %v3739_v44  ;;  %v14228_v42 = vld [vmem:[%s19024_s1 + $0xf84] ss:$20 sps:$4 sm:$0xff]   ;;  %v14226_v44 = vld [vmem:[%s19024_s1 + $0xf80] ss:$20 sps:$4 sm:$0xff]  }
 0x1d4   :  { %12842 = vmatprep.subr.bf16.mxu1 %v14182_v43  ;;  %12854 = vmatprep.subr.bf16.mxu0 %v14186_v45  ;;  %v14223_v43 = vld [vmem:[%s19024_s1 + $0xf78] ss:$20 sps:$4 sm:$0xff]  }
 0x1d5   :  { %v14231_v45 = vld [vmem:[%s19024_s1 + $0xfa4] ss:$20 sps:$4 sm:$0xff]  }
 0x1d7   :  { %12843 = vmatpush3.bf16.msra.mxu1 %v14184_v46  ;;  %v14234_v46 = vld [vmem:[%s19024_s1 + $0xfac] ss:$20 sps:$4 sm:$0xff]  }
 0x1d8   :  { %12844 = vmatprep.subr.bf16.mxu1 %v14185_v47  ;;  %v14229_v47 = vld [vmem:[%s19024_s1 + $0xfa0] ss:$20 sps:$4 sm:$0xff]  }
 0x1da   :  { %11239 = vmatmul.mubr.msk.bf16.vlgmr.msra.gmra.mrb[12].mxu0 %vm1639_vm1, %v16568_v7 }
 0x1db   :  { %12845 = vmatpush3.bf16.msra.mxu1 %v14187_v49  ;;  %12855 = vmatpush3.bf16.msra.mxu0 %v14188_v50  ;;  %v14232_v49 = vld [vmem:[%s19024_s1 + $0xfa8] ss:$20 sps:$4 sm:$0xff]   ;;  %v14237_v50 = vld [vmem:[%s19024_s1 + $0xfcc] ss:$20 sps:$4 sm:$0xff]  }
 0x1dc   :  { %12846 = vmatprep.subr.bf16.mxu1 %v14189_v51  ;;  %12856 = vmatprep.subr.bf16.mxu0 %v14190_v52  ;;  %v14235_v51 = vld [vmem:[%s19024_s1 + $0xfc8] ss:$20 sps:$4 sm:$0xff]   ;;  %v14238_v52 = vld [vmem:[%s19024_s1 + $0xfd0] ss:$20 sps:$4 sm:$0xff]  }
 0x1dd   :  { %4147 = vmatprep.mubr.bf16.mxu0 %v15429_v30 }
 0x1df   :  { %12847 = vmatpush3.bf16.msra.mxu1 %v14191_v53  ;;  %12857 = vmatpush3.bf16.msra.mxu0 %v14192_v54  ;;  %v14243_v53 = vld [vmem:[%s19024_s1 + $0xff4] ss:$20 sps:$4 sm:$0xff]   ;;  %v14246_v54 = vld [vmem:[%s19024_s1 + $0xffc] ss:$20 sps:$4 sm:$0xff]  }
 0x1e0   :  { %12858 = vmatprep.subr.bf16.mxu0 %v14193_v55  ;;  %12876 = vmatprep.subr.bf16.mxu1 %v14194_v56  ;;  %v14241_v55 = vld [vmem:[%s19024_s1 + $0xff0] ss:$20 sps:$4 sm:$0xff]   ;;  %v14244_v56 = vld [vmem:[%s19024_s1 + $0xff8] ss:$20 sps:$4 sm:$0xff]  }
 0x1e1   :  { %v12823_v61 = vpop.f32.mrb[8].mxu0 }
 0x1e2   :  { %4108 = vmatmul.mubr.bf16.vlgmr.msra.gmra.mrb[16].mxu1 %v15349_v5  ;;  %v12824_v62 = vpop.f32.mrb[9].mxu0 }
 0x1e3   :  { %v12825_v63 = vadd.f32 %v12824_v62, %v12823_v61  ;;  %12859 = vmatpush3.bf16.msra.mxu0 %v14195_v57  ;;  %12877 = vmatpush3.bf16.msra.mxu1 %v14196_v58  ;;  %v12826_v0 = vpop.f32.mrb[10].mxu0  ;;  %v14249_v57 = vld [vmem:[%s19024_s1 + $0x101c] ss:$20 sps:$4 sm:$0xff]   ;;  %v14252_v58 = vld [vmem:[%s19024_s1 + $0x1024] ss:$20 sps:$4 sm:$0xff]  }
 0x1e4   :  { %12860 = vmatprep.subr.bf16.mxu0 %v14197_v59  ;;  %12878 = vmatprep.subr.bf16.mxu1 %v14198_v60  ;;  %v12827_v3 = vpop.f32.mrb[11].mxu0  ;;  %v14247_v59 = vld [vmem:[%s19024_s1 + $0x1018] ss:$20 sps:$4 sm:$0xff]   ;;  %v14250_v60 = vld [vmem:[%s19024_s1 + $0x1020] ss:$20 sps:$4 sm:$0xff]  }
 0x1e5   :  { %v2102_v9 = vadd.f32 %v12825_v63, %v16584_v22  ;;  %4187 = vmatprep.mubr.bf16.mxu1 %v15576_v15  ;;  %v14210_v22 = vld [vmem:[%s19024_s1 + $0xeac] ss:$20 sps:$4 sm:$0xff]   ;;  %v14255_v61 = vld [vmem:[%s19024_s1 + $0x1044] ss:$20 sps:$4 sm:$0xff]   ;;  %v14256_v0 = vld [vmem:[%s19024_s1 + $0x1048] ss:$20 sps:$4 sm:$0xff]  }
 0x1e6   :  { %v14258_v62 = vld [vmem:[%s19024_s1 + $0x104c] ss:$20 sps:$4 sm:$0xff]   ;;  %v14259_v3 = vld [vmem:[%s19024_s1 + $0x1068] ss:$20 sps:$4 sm:$0xff]  }
 0x1e7   :  { %12861 = vmatpush3.bf16.msra.mxu0 %v14199_v1  ;;  %12879 = vmatpush3.bf16.msra.mxu1 %v14200_v2  ;;  %v16693_v14 = vadd.f32 %v16602_v33, %v2102_v9  ;;  %v14216_v33 = vld [vmem:[%s19024_s1 + $0xd94] ss:$20 sps:$4 sm:$0xff]   ;;  %v14261_v1 = vld [vmem:[%s19024_s1 + $0x106c] ss:$20 sps:$4 sm:$0xff]   ;;  %v14270_v9 = vld [vmem:[%s19024_s1 + $0x109c] ss:$20 sps:$4 sm:$0xff]  }
 0x1e8   :  { %12862 = vmatprep.subr.bf16.mxu0 %v14201_v6  ;;  %12880 = vmatprep.subr.bf16.mxu1 %v14202_v8  ;;  %v14253_v63 = vld [vmem:[%s19024_s1 + $0x1040] ss:$20 sps:$4 sm:$0xff]   ;;  %v14262_v6 = vld [vmem:[%s19024_s1 + $0x1070] ss:$20 sps:$4 sm:$0xff]  }
 0x1e9   :  { %v14264_v2 = vld [vmem:[%s19024_s1 + $0x1074] ss:$20 sps:$4 sm:$0xff]  }
 0x1ea   :  { %v14267_v8 = vld [vmem:[%s19024_s1 + $0x1094] ss:$20 sps:$4 sm:$0xff]  }
 0x1eb   :  { %12863 = vmatpush3.bf16.msra.mxu0 %v14203_v11  ;;  %12881 = vmatpush3.bf16.msra.mxu1 %v14204_v12  ;;  %v14265_v11 = vld [vmem:[%s19024_s1 + $0x1090] ss:$20 sps:$4 sm:$0xff]   ;;  %v14268_v12 = vld [vmem:[%s19024_s1 + $0x1098] ss:$20 sps:$4 sm:$0xff]  }
 0x1ec   :  { %12864 = vmatprep.subr.bf16.mxu0 %v14205_v16  ;;  %12882 = vmatprep.subr.bf16.mxu1 %v14206_v17  ;;  %v14273_v16 = vld [vmem:[%s19024_s1 + $0x10bc] ss:$20 sps:$4 sm:$0xff]   ;;  %v14276_v17 = vld [vmem:[%s19024_s1 + $0x10c4] ss:$20 sps:$4 sm:$0xff]  }
 0x1ef   :  { %12865 = vmatpush3.bf16.msra.mxu0 %v14207_v18  ;;  %12883 = vmatpush3.bf16.msra.mxu1 %v14208_v19  ;;  %v14271_v18 = vld [vmem:[%s19024_s1 + $0x10b8] ss:$20 sps:$4 sm:$0xff]   ;;  %v14274_v19 = vld [vmem:[%s19024_s1 + $0x10c0] ss:$20 sps:$4 sm:$0xff]  }
 0x1f0   :  { %12866 = vmatprep.subr.bf16.mxu0 %v14209_v21  ;;  %12884 = vmatprep.subr.bf16.mxu1 %v14210_v22  ;;  %v14279_v21 = vld [vmem:[%s19024_s1 + $0x10e4] ss:$20 sps:$4 sm:$0xff]   ;;  %v14282_v22 = vld [vmem:[%s19024_s1 + $0x10ec] ss:$20 sps:$4 sm:$0xff]  }
 0x1f3   :  { %12867 = vmatpush3.bf16.msra.mxu0 %v14211_v13  ;;  %12885 = vmatpush3.bf16.msra.mxu1 %v14212_v27  ;;  %v14277_v13 = vld [vmem:[%s19024_s1 + $0x10e0] ss:$20 sps:$4 sm:$0xff]   ;;  %v14280_v27 = vld [vmem:[%s19024_s1 + $0x10e8] ss:$20 sps:$4 sm:$0xff]  }
 0x1f4   :  { %12868 = vmatprep.subr.bf16.mxu0 %v14213_v28  ;;  %12886 = vmatprep.subr.bf16.mxu1 %v14214_v29  ;;  %v14285_v28 = vld [vmem:[%s19024_s1 + $0x110c] ss:$20 sps:$4 sm:$0xff]   ;;  %v14288_v29 = vld [vmem:[%s19024_s1 + $0x1114] ss:$20 sps:$4 sm:$0xff]  }
 0x1f7   :  { %12869 = vmatpush3.bf16.msra.mxu0 %v14215_v32  ;;  %12887 = vmatpush3.bf16.msra.mxu1 %v14216_v33  ;;  %v14283_v32 = vld [vmem:[%s19024_s1 + $0x1108] ss:$20 sps:$4 sm:$0xff]   ;;  %v14286_v33 = vld [vmem:[%s19024_s1 + $0x1110] ss:$20 sps:$4 sm:$0xff]  }
 0x1f8   :  { %12888 = vmatprep.subr.bf16.mxu1 %v14217_v34  ;;  %13277 = vmatprep.subr.bf16.mxu0 %v15099_v4  ;;  %v14291_v34 = vld [vmem:[%s19024_s1 + $0x1134] ss:$20 sps:$4 sm:$0xff]  }
 0x1fa   :  { %4148 = vmatmul.mubr.bf16.vlgmr.msra.gmra.mrb[16].mxu0 %v15558_v10 }
 0x1fb   :  { %12889 = vmatpush3.bf16.msra.mxu1 %v14218_v35  ;;  %13278 = vmatpush3.bf16.msra.mxu0 %v14219_v36  ;;  %v14294_v35 = vld [vmem:[%s19024_s1 + $0x113c] ss:$20 sps:$4 sm:$0xff]  }
 0x1fc   :  { %12890 = vmatprep.subr.bf16.mxu1 %v14220_v38  ;;  %13279 = vmatprep.subr.bf16.mxu0 %v15099_v4  ;;  %v14289_v36 = vld [vmem:[%s19024_s1 + $0x1130] ss:$20 sps:$4 sm:$0xff]  }
 0x1fd   :  { %13281 = vmatprep.mubr.msk.bf16.mxu0 %vm15100_vm2, %v15099_v4  ;;  %v14297_v38 = vld [vmem:[%s19024_s1 + $0x115c] ss:$20 sps:$4 sm:$0xff]  }
 0x1ff   :  { %12891 = vmatpush3.bf16.msra.mxu1 %v14221_v39  ;;  %13280 = vmatpush3.bf16.msra.mxu0 %v3745_v40  ;;  %v14300_v39 = vld [vmem:[%s19024_s1 + $0x1164] ss:$20 sps:$4 sm:$0xff]  }
 0x200   :  { %5840 = vmatprep.subr.bf16.mxu0 %v14225_v41  ;;  %6004 = vmatprep.subr.bf16.mxu1 %v14228_v42  ;;  %v14295_v40 = vld [vmem:[%s19024_s1 + $0x1158] ss:$20 sps:$4 sm:$0xff]   ;;  %v14298_v41 = vld [vmem:[%s19024_s1 + $0x1160] ss:$20 sps:$4 sm:$0xff]  }
 0x201   :  { %v14303_v42 = vld [vmem:[%s19024_s1 + $0x1184] ss:$20 sps:$4 sm:$0xff]  }
 0x202   :  { %4188 = vmatmul.mubr.bf16.vlgmr.msra.gmra.mrb[20].mxu1 %v15770_v20  ;;  %13282 = vmatmul.mubr.msk.bf16.vlgmr.msra.gmra.mrb[20].mxu0 %vm1639_vm1, %v16568_v7  ;;  %v14240_v7 = vld [vmem:[%s19024_s1 + $0xfd4] ss:$20 sps:$4 sm:$0xff]  }
 0x203   :  { %5841 = vmatpush1.bf16.msra.mxu0 %v14223_v43  ;;  %6005 = vmatpush1.bf16.msra.mxu1 %v14226_v44  ;;  %v14306_v43 = vld [vmem:[%s19024_s1 + $0x118c] ss:$20 sps:$4 sm:$0xff]  }
 0x204   :  { %5842 = vmatprep.subr.bf16.mxu0 %v14231_v45  ;;  %6006 = vmatprep.subr.bf16.mxu1 %v14234_v46  ;;  %v14301_v44 = vld [vmem:[%s19024_s1 + $0x1180] ss:$20 sps:$4 sm:$0xff]   ;;  %v14304_v45 = vld [vmem:[%s19024_s1 + $0x1188] ss:$20 sps:$4 sm:$0xff]  }
 0x205   :  { %5872 = vmatprep.mubr.bf16.mxu0 %v15285_v48  ;;  %6036 = vmatprep.mubr.bf16.mxu1 %v15285_v48  ;;  %v14309_v46 = vld [vmem:[%s19024_s1 + $0x11ac] ss:$20 sps:$4 sm:$0xff]  }
 0x207   :  { %5843 = vmatpush1.bf16.msra.mxu0 %v14229_v47  ;;  %6007 = vmatpush1.bf16.msra.mxu1 %v14232_v49  ;;  %v14312_v47 = vld [vmem:[%s19024_s1 + $0x11b4] ss:$20 sps:$4 sm:$0xff]  }
 0x208   :  { %5844 = vmatprep.subr.bf16.mxu0 %v14237_v50  ;;  %6008 = vmatprep.subr.bf16.mxu1 %v14240_v7  ;;  %v14307_v49 = vld [vmem:[%s19024_s1 + $0x11a8] ss:$20 sps:$4 sm:$0xff]   ;;  %v14310_v50 = vld [vmem:[%s19024_s1 + $0x11b0] ss:$20 sps:$4 sm:$0xff]  }
 0x209   :  { %v14315_v7 = vld [vmem:[%s19024_s1 + $0x11d4] ss:$20 sps:$4 sm:$0xff]  }
 0x20b   :  { %5845 = vmatpush1.bf16.msra.mxu0 %v14235_v51  ;;  %6009 = vmatpush1.bf16.msra.mxu1 %v14238_v52  ;;  %v14318_v51 = vld [vmem:[%s19024_s1 + $0x11dc] ss:$20 sps:$4 sm:$0xff]  }
 0x20c   :  { %5846 = vmatprep.subr.bf16.mxu0 %v14243_v53  ;;  %6010 = vmatprep.subr.bf16.mxu1 %v14246_v54  ;;  %v14313_v52 = vld [vmem:[%s19024_s1 + $0x11d0] ss:$20 sps:$4 sm:$0xff]   ;;  %v14316_v53 = vld [vmem:[%s19024_s1 + $0x11d8] ss:$20 sps:$4 sm:$0xff]  }
 0x20d   :  { %v14321_v54 = vld [vmem:[%s19024_s1 + $0x11fc] ss:$20 sps:$4 sm:$0xff]  }
 0x20f   :  { %5847 = vmatpush1.bf16.msra.mxu0 %v14241_v55  ;;  %6011 = vmatpush1.bf16.msra.mxu1 %v14244_v56  ;;  %v14324_v55 = vld [vmem:[%s19024_s1 + $0x1204] ss:$20 sps:$4 sm:$0xff]  }
 0x210   :  { %5848 = vmatprep.subr.bf16.mxu0 %v14249_v57  ;;  %6012 = vmatprep.subr.bf16.mxu1 %v14252_v58  ;;  %v14319_v56 = vld [vmem:[%s19024_s1 + $0x11f8] ss:$20 sps:$4 sm:$0xff]   ;;  %v14322_v57 = vld [vmem:[%s19024_s1 + $0x1200] ss:$20 sps:$4 sm:$0xff]  }
 0x211   :  { %v14327_v58 = vld [vmem:[%s19024_s1 + $0x1224] ss:$20 sps:$4 sm:$0xff]  }
 0x213   :  { %5849 = vmatpush1.bf16.msra.mxu0 %v14247_v59  ;;  %6013 = vmatpush1.bf16.msra.mxu1 %v14250_v60  ;;  %v14330_v59 = vld [vmem:[%s19024_s1 + $0x122c] ss:$20 sps:$4 sm:$0xff]  }
 0x214   :  { %5850 = vmatprep.subr.bf16.mxu0 %v14255_v61  ;;  %6014 = vmatprep.subr.bf16.mxu1 %v14258_v62  ;;  %v14325_v60 = vld [vmem:[%s19024_s1 + $0x1220] ss:$20 sps:$4 sm:$0xff]   ;;  %v14328_v61 = vld [vmem:[%s19024_s1 + $0x1228] ss:$20 sps:$4 sm:$0xff]  }
 0x215   :  { %v14333_v62 = vld [vmem:[%s19024_s1 + $0x124c] ss:$20 sps:$4 sm:$0xff]  }
 0x217   :  { %5851 = vmatpush1.bf16.msra.mxu0 %v14253_v63  ;;  %6015 = vmatpush1.bf16.msra.mxu1 %v14256_v0  ;;  %v14336_v63 = vld [vmem:[%s19024_s1 + $0x1254] ss:$20 sps:$4 sm:$0xff]  }
 0x218   :  { %5852 = vmatprep.subr.bf16.mxu0 %v14261_v1  ;;  %6016 = vmatprep.subr.bf16.mxu1 %v14264_v2  ;;  %v14331_v0 = vld [vmem:[%s19024_s1 + $0x1248] ss:$20 sps:$4 sm:$0xff]   ;;  %v14334_v1 = vld [vmem:[%s19024_s1 + $0x1250] ss:$20 sps:$4 sm:$0xff]  }
 0x219   :  { %v14339_v2 = vld [vmem:[%s19024_s1 + $0x1274] ss:$20 sps:$4 sm:$0xff]  }
 0x21b   :  { %5853 = vmatpush1.bf16.msra.mxu0 %v14259_v3  ;;  %6017 = vmatpush1.bf16.msra.mxu1 %v14262_v6  ;;  %v14342_v3 = vld [vmem:[%s19024_s1 + $0x127c] ss:$20 sps:$4 sm:$0xff]  }
 0x21c   :  { %5854 = vmatprep.subr.bf16.mxu0 %v14267_v8  ;;  %6018 = vmatprep.subr.bf16.mxu1 %v14270_v9  ;;  %v14337_v6 = vld [vmem:[%s19024_s1 + $0x1270] ss:$20 sps:$4 sm:$0xff]   ;;  %v14340_v8 = vld [vmem:[%s19024_s1 + $0x1278] ss:$20 sps:$4 sm:$0xff]  }
 0x21d   :  { %v14345_v9 = vld [vmem:[%s19024_s1 + $0x129c] ss:$20 sps:$4 sm:$0xff]  }
 0x21f   :  { %5855 = vmatpush1.bf16.msra.mxu0 %v14265_v11  ;;  %6019 = vmatpush1.bf16.msra.mxu1 %v14268_v12  ;;  %v14348_v11 = vld [vmem:[%s19024_s1 + $0x12a4] ss:$20 sps:$4 sm:$0xff]  }
 0x220   :  { %5856 = vmatprep.subr.bf16.mxu0 %v14273_v16  ;;  %6020 = vmatprep.subr.bf16.mxu1 %v14276_v17  ;;  %v14343_v12 = vld [vmem:[%s19024_s1 + $0x1298] ss:$20 sps:$4 sm:$0xff]   ;;  %v14346_v16 = vld [vmem:[%s19024_s1 + $0x12a0] ss:$20 sps:$4 sm:$0xff]  }
 0x221   :  { %v14351_v17 = vld [vmem:[%s19024_s1 + $0x12c4] ss:$20 sps:$4 sm:$0xff]  }
 0x223   :  { %5857 = vmatpush1.bf16.msra.mxu0 %v14271_v18  ;;  %6021 = vmatpush1.bf16.msra.mxu1 %v14274_v19  ;;  %v14354_v18 = vld [vmem:[%s19024_s1 + $0x12cc] ss:$20 sps:$4 sm:$0xff]  }
 0x224   :  { %5858 = vmatprep.subr.bf16.mxu0 %v14279_v21  ;;  %6022 = vmatprep.subr.bf16.mxu1 %v14282_v22  ;;  %v14349_v19 = vld [vmem:[%s19024_s1 + $0x12c0] ss:$20 sps:$4 sm:$0xff]   ;;  %v14352_v21 = vld [vmem:[%s19024_s1 + $0x12c8] ss:$20 sps:$4 sm:$0xff]  }
 0x225   :  { %v14357_v22 = vld [vmem:[%s19024_s1 + $0x12ec] ss:$20 sps:$4 sm:$0xff]  }
 0x227   :  { %5859 = vmatpush1.bf16.msra.mxu0 %v14277_v13  ;;  %6023 = vmatpush1.bf16.msra.mxu1 %v14280_v27  ;;  %v14360_v13 = vld [vmem:[%s19024_s1 + $0x12f4] ss:$20 sps:$4 sm:$0xff]  }
 0x228   :  { %5860 = vmatprep.subr.bf16.mxu0 %v14285_v28  ;;  %6024 = vmatprep.subr.bf16.mxu1 %v14288_v29  ;;  %v14355_v27 = vld [vmem:[%s19024_s1 + $0x12e8] ss:$20 sps:$4 sm:$0xff]   ;;  %v14358_v28 = vld [vmem:[%s19024_s1 + $0x12f0] ss:$20 sps:$4 sm:$0xff]  }
 0x229   :  { %v14363_v29 = vld [vmem:[%s19024_s1 + $0x1314] ss:$20 sps:$4 sm:$0xff]  }
 0x22b   :  { %5861 = vmatpush1.bf16.msra.mxu0 %v14283_v32  ;;  %6025 = vmatpush1.bf16.msra.mxu1 %v14286_v33  ;;  %v14366_v32 = vld [vmem:[%s19024_s1 + $0x131c] ss:$20 sps:$4 sm:$0xff]  }
 0x22c   :  { %5862 = vmatprep.subr.bf16.mxu0 %v14291_v34  ;;  %6026 = vmatprep.subr.bf16.mxu1 %v14294_v35  ;;  %v14361_v33 = vld [vmem:[%s19024_s1 + $0x1310] ss:$20 sps:$4 sm:$0xff]   ;;  %v14364_v34 = vld [vmem:[%s19024_s1 + $0x1318] ss:$20 sps:$4 sm:$0xff]  }
 0x22d   :  { %v14369_v35 = vld [vmem:[%s19024_s1 + $0x133c] ss:$20 sps:$4 sm:$0xff]  }
 0x22f   :  { %5863 = vmatpush1.bf16.msra.mxu0 %v14289_v36  ;;  %6027 = vmatpush1.bf16.msra.mxu1 %v14292_v37  ;;  %v14372_v36 = vld [vmem:[%s19024_s1 + $0x1344] ss:$20 sps:$4 sm:$0xff]  }
 0x230   :  { %5864 = vmatprep.subr.bf16.mxu0 %v14297_v38  ;;  %6028 = vmatprep.subr.bf16.mxu1 %v14300_v39  ;;  %v14367_v37 = vld [vmem:[%s19024_s1 + $0x1338] ss:$20 sps:$4 sm:$0xff]   ;;  %v14370_v38 = vld [vmem:[%s19024_s1 + $0x1340] ss:$20 sps:$4 sm:$0xff]  }
 0x231   :  { %v14375_v39 = vld [vmem:[%s19024_s1 + $0x1364] ss:$20 sps:$4 sm:$0xff]  }
 0x233   :  { %5865 = vmatpush1.bf16.msra.mxu0 %v14295_v40  ;;  %6029 = vmatpush1.bf16.msra.mxu1 %v14298_v41  ;;  %v14378_v40 = vld [vmem:[%s19024_s1 + $0x136c] ss:$20 sps:$4 sm:$0xff]  }
 0x234   :  { %5866 = vmatprep.subr.bf16.mxu0 %v14303_v42  ;;  %6030 = vmatprep.subr.bf16.mxu1 %v14306_v43  ;;  %v14373_v41 = vld [vmem:[%s19024_s1 + $0x1360] ss:$20 sps:$4 sm:$0xff]   ;;  %v14376_v42 = vld [vmem:[%s19024_s1 + $0x1368] ss:$20 sps:$4 sm:$0xff]  }
 0x235   :  { %v14381_v43 = vld [vmem:[%s19024_s1 + $0x138c] ss:$20 sps:$4 sm:$0xff]  }
 0x237   :  { %5867 = vmatpush1.bf16.msra.mxu0 %v14301_v44  ;;  %6031 = vmatpush1.bf16.msra.mxu1 %v14304_v45  ;;  %v14384_v44 = vld [vmem:[%s19024_s1 + $0x1394] ss:$20 sps:$4 sm:$0xff]  }
 0x238   :  { %5868 = vmatprep.subr.bf16.mxu0 %v14309_v46  ;;  %6032 = vmatprep.subr.bf16.mxu1 %v14312_v47  ;;  %v14379_v45 = vld [vmem:[%s19024_s1 + $0x1388] ss:$20 sps:$4 sm:$0xff]   ;;  %v14382_v46 = vld [vmem:[%s19024_s1 + $0x1390] ss:$20 sps:$4 sm:$0xff]  }
 0x239   :  { %v14387_v47 = vld [vmem:[%s19024_s1 + $0x13b4] ss:$20 sps:$4 sm:$0xff]  }
 0x23b   :  { %5869 = vmatpush1.bf16.msra.mxu0 %v14307_v49  ;;  %6033 = vmatpush1.bf16.msra.mxu1 %v14310_v50  ;;  %v14390_v49 = vld [vmem:[%s19024_s1 + $0x13bc] ss:$20 sps:$4 sm:$0xff]  }
 0x23c   :  { %5870 = vmatprep.subr.bf16.mxu0 %v14315_v7  ;;  %6034 = vmatprep.subr.bf16.mxu1 %v14318_v51  ;;  %v14385_v50 = vld [vmem:[%s19024_s1 + $0x13b0] ss:$20 sps:$4 sm:$0xff]   ;;  %v14388_v7 = vld [vmem:[%s19024_s1 + $0x13b8] ss:$20 sps:$4 sm:$0xff]  }
 0x23d   :  { %v14393_v51 = vld [vmem:[%s19024_s1 + $0x13dc] ss:$20 sps:$4 sm:$0xff]  }
 0x23f   :  { %5871 = vmatpush1.bf16.msra.mxu0 %v14313_v52  ;;  %6035 = vmatpush1.bf16.msra.mxu1 %v14316_v53  ;;  %v14396_v52 = vld [vmem:[%s19024_s1 + $0x13e4] ss:$20 sps:$4 sm:$0xff]  }
 0x240   :  { %5881 = vmatprep.subr.bf16.mxu0 %v14321_v54  ;;  %6045 = vmatprep.subr.bf16.mxu1 %v14324_v55  ;;  %v14391_v53 = vld [vmem:[%s19024_s1 + $0x13d8] ss:$20 sps:$4 sm:$0xff]   ;;  %v14394_v54 = vld [vmem:[%s19024_s1 + $0x13e0] ss:$20 sps:$4 sm:$0xff]  }
 0x241   :  { %v14399_v55 = vld [vmem:[%s19024_s1 + $0x1404] ss:$20 sps:$4 sm:$0xff]  }
 0x242   :  { %5873 = vmatmul.mubr.bf16.vlgmr.msra.gmra.mrb[24].mxu0 %v15349_v5  ;;  %6037 = vmatmul.mubr.bf16.vlgmr.msra.gmra.mrb[24].mxu1 %v15349_v5 }
 0x243   :  { %5882 = vmatpush1.bf16.msra.mxu0 %v14319_v56  ;;  %6046 = vmatpush1.bf16.msra.mxu1 %v14322_v57  ;;  %v14402_v56 = vld [vmem:[%s19024_s1 + $0x140c] ss:$20 sps:$4 sm:$0xff]  }
 0x244   :  { %5883 = vmatprep.subr.bf16.mxu0 %v14327_v58  ;;  %6047 = vmatprep.subr.bf16.mxu1 %v14330_v59  ;;  %v14397_v57 = vld [vmem:[%s19024_s1 + $0x1400] ss:$20 sps:$4 sm:$0xff]   ;;  %v14400_v58 = vld [vmem:[%s19024_s1 + $0x1408] ss:$20 sps:$4 sm:$0xff]  }
 0x245   :  { %5913 = vmatprep.mubr.bf16.mxu0 %v15429_v30  ;;  %6077 = vmatprep.mubr.bf16.mxu1 %v15429_v30  ;;  %v14405_v59 = vld [vmem:[%s19024_s1 + $0x142c] ss:$20 sps:$4 sm:$0xff]  }
 0x247   :  { %5884 = vmatpush1.bf16.msra.mxu0 %v14325_v60  ;;  %6048 = vmatpush1.bf16.msra.mxu1 %v14328_v61  ;;  %v14408_v60 = vld [vmem:[%s19024_s1 + $0x1434] ss:$20 sps:$4 sm:$0xff]  }
 0x248   :  { %5885 = vmatprep.subr.bf16.mxu0 %v14333_v62  ;;  %6049 = vmatprep.subr.bf16.mxu1 %v14336_v63  ;;  %v14403_v61 = vld [vmem:[%s19024_s1 + $0x1428] ss:$20 sps:$4 sm:$0xff]   ;;  %v14406_v62 = vld [vmem:[%s19024_s1 + $0x1430] ss:$20 sps:$4 sm:$0xff]  }
 0x249   :  { %v14411_v63 = vld [vmem:[%s19024_s1 + $0x1454] ss:$20 sps:$4 sm:$0xff]  }
 0x24b   :  { %5886 = vmatpush1.bf16.msra.mxu0 %v14331_v0  ;;  %6050 = vmatpush1.bf16.msra.mxu1 %v14334_v1  ;;  %v14414_v0 = vld [vmem:[%s19024_s1 + $0x145c] ss:$20 sps:$4 sm:$0xff]  }
 0x24c   :  { %5887 = vmatprep.subr.bf16.mxu0 %v14339_v2  ;;  %6051 = vmatprep.subr.bf16.mxu1 %v14342_v3  ;;  %v14409_v1 = vld [vmem:[%s19024_s1 + $0x1450] ss:$20 sps:$4 sm:$0xff]   ;;  %v14412_v2 = vld [vmem:[%s19024_s1 + $0x1458] ss:$20 sps:$4 sm:$0xff]  }
 0x24d   :  { %v14417_v3 = vld [vmem:[%s19024_s1 + $0x147c] ss:$20 sps:$4 sm:$0xff]  }
 0x24f   :  { %5888 = vmatpush1.bf16.msra.mxu0 %v14337_v6  ;;  %6052 = vmatpush1.bf16.msra.mxu1 %v14340_v8  ;;  %v14420_v6 = vld [vmem:[%s19024_s1 + $0x1484] ss:$20 sps:$4 sm:$0xff]  }
 0x250   :  { %5889 = vmatprep.subr.bf16.mxu0 %v14345_v9  ;;  %6053 = vmatprep.subr.bf16.mxu1 %v14348_v11  ;;  %v14415_v8 = vld [vmem:[%s19024_s1 + $0x1478] ss:$20 sps:$4 sm:$0xff]   ;;  %v14418_v9 = vld [vmem:[%s19024_s1 + $0x1480] ss:$20 sps:$4 sm:$0xff]  }
 0x251   :  { %v14423_v11 = vld [vmem:[%s19024_s1 + $0x14a4] ss:$20 sps:$4 sm:$0xff]  }
 0x253   :  { %5890 = vmatpush1.bf16.msra.mxu0 %v14343_v12  ;;  %6054 = vmatpush1.bf16.msra.mxu1 %v14346_v16  ;;  %v14426_v12 = vld [vmem:[%s19024_s1 + $0x14ac] ss:$20 sps:$4 sm:$0xff]  }
 0x254   :  { %5891 = vmatprep.subr.bf16.mxu0 %v14351_v17  ;;  %6055 = vmatprep.subr.bf16.mxu1 %v14354_v18  ;;  %v14421_v16 = vld [vmem:[%s19024_s1 + $0x14a0] ss:$20 sps:$4 sm:$0xff]   ;;  %v14424_v17 = vld [vmem:[%s19024_s1 + $0x14a8] ss:$20 sps:$4 sm:$0xff]  }
 0x255   :  { %v14429_v18 = vld [vmem:[%s19024_s1 + $0x14cc] ss:$20 sps:$4 sm:$0xff]  }
 0x257   :  { %5892 = vmatpush1.bf16.msra.mxu0 %v14349_v19  ;;  %6056 = vmatpush1.bf16.msra.mxu1 %v14352_v21  ;;  %v14432_v19 = vld [vmem:[%s19024_s1 + $0x14d4] ss:$20 sps:$4 sm:$0xff]  }
 0x258   :  { %5893 = vmatprep.subr.bf16.mxu0 %v14357_v22  ;;  %6057 = vmatprep.subr.bf16.mxu1 %v14360_v13  ;;  %v14427_v21 = vld [vmem:[%s19024_s1 + $0x14c8] ss:$20 sps:$4 sm:$0xff]   ;;  %v14430_v22 = vld [vmem:[%s19024_s1 + $0x14d0] ss:$20 sps:$4 sm:$0xff]  }
 0x259   :  { %v14435_v13 = vld [vmem:[%s19024_s1 + $0x14f4] ss:$20 sps:$4 sm:$0xff]  }
 0x25b   :  { %5894 = vmatpush1.bf16.msra.mxu0 %v14355_v27  ;;  %6058 = vmatpush1.bf16.msra.mxu1 %v14358_v28  ;;  %v14438_v27 = vld [vmem:[%s19024_s1 + $0x14fc] ss:$20 sps:$4 sm:$0xff]  }
 0x25c   :  { %5895 = vmatprep.subr.bf16.mxu0 %v14363_v29  ;;  %6059 = vmatprep.subr.bf16.mxu1 %v14366_v32  ;;  %v14433_v28 = vld [vmem:[%s19024_s1 + $0x14f0] ss:$20 sps:$4 sm:$0xff]   ;;  %v14436_v29 = vld [vmem:[%s19024_s1 + $0x14f8] ss:$20 sps:$4 sm:$0xff]  }
 0x25d   :  { %v14441_v32 = vld [vmem:[%s19024_s1 + $0x151c] ss:$20 sps:$4 sm:$0xff]  }
 0x25f   :  { %5896 = vmatpush1.bf16.msra.mxu0 %v14361_v33  ;;  %6060 = vmatpush1.bf16.msra.mxu1 %v14364_v34  ;;  %v14444_v33 = vld [vmem:[%s19024_s1 + $0x1524] ss:$20 sps:$4 sm:$0xff]  }
 0x260   :  { %5897 = vmatprep.subr.bf16.mxu0 %v14369_v35  ;;  %6061 = vmatprep.subr.bf16.mxu1 %v14372_v36  ;;  %v14439_v34 = vld [vmem:[%s19024_s1 + $0x1518] ss:$20 sps:$4 sm:$0xff]   ;;  %v14442_v35 = vld [vmem:[%s19024_s1 + $0x1520] ss:$20 sps:$4 sm:$0xff]  }
 0x261   :  { %v14447_v36 = vld [vmem:[%s19024_s1 + $0x1544] ss:$20 sps:$4 sm:$0xff]  }
 0x263   :  { %5898 = vmatpush1.bf16.msra.mxu0 %v14367_v37  ;;  %6062 = vmatpush1.bf16.msra.mxu1 %v14370_v38  ;;  %v14450_v37 = vld [vmem:[%s19024_s1 + $0x154c] ss:$20 sps:$4 sm:$0xff]  }
 0x264   :  { %5899 = vmatprep.subr.bf16.mxu0 %v14375_v39  ;;  %6063 = vmatprep.subr.bf16.mxu1 %v14378_v40  ;;  %v14445_v38 = vld [vmem:[%s19024_s1 + $0x1540] ss:$20 sps:$4 sm:$0xff]   ;;  %v14448_v39 = vld [vmem:[%s19024_s1 + $0x1548] ss:$20 sps:$4 sm:$0xff]  }
 0x265   :  { %v14453_v40 = vld [vmem:[%s19024_s1 + $0x156c] ss:$20 sps:$4 sm:$0xff]  }
 0x267   :  { %5900 = vmatpush1.bf16.msra.mxu0 %v14373_v41  ;;  %6064 = vmatpush1.bf16.msra.mxu1 %v14376_v42  ;;  %v14456_v41 = vld [vmem:[%s19024_s1 + $0x1574] ss:$20 sps:$4 sm:$0xff]  }
 0x268   :  { %5901 = vmatprep.subr.bf16.mxu0 %v14381_v43  ;;  %6065 = vmatprep.subr.bf16.mxu1 %v14384_v44 }
 0x26b   :  { %5902 = vmatpush1.bf16.msra.mxu0 %v14379_v45  ;;  %6066 = vmatpush1.bf16.msra.mxu1 %v14382_v46 }
 0x26c   :  { %5903 = vmatprep.subr.bf16.mxu0 %v14387_v47  ;;  %6067 = vmatprep.subr.bf16.mxu1 %v14390_v49  ;;  %v14451_v47 = vld [vmem:[%s19024_s1 + $0x1568] ss:$20 sps:$4 sm:$0xff]   ;;  %v14454_v49 = vld [vmem:[%s19024_s1 + $0x1570] ss:$20 sps:$4 sm:$0xff]  }
 0x26f   :  { %5904 = vmatpush1.bf16.msra.mxu0 %v14385_v50  ;;  %6068 = vmatpush1.bf16.msra.mxu1 %v14388_v7  ;;  %v14459_v7 = vld [vmem:[%s19024_s1 + $0x1594] ss:$20 sps:$4 sm:$0xff]  }
 0x270   :  { %5905 = vmatprep.subr.bf16.mxu0 %v14393_v51  ;;  %6069 = vmatprep.subr.bf16.mxu1 %v14396_v52  ;;  %v14462_v51 = vld [vmem:[%s19024_s1 + $0x159c] ss:$20 sps:$4 sm:$0xff]  }
 0x271   :  { %v14457_v52 = vld [vmem:[%s19024_s1 + $0x1590] ss:$20 sps:$4 sm:$0xff]  }
 0x273   :  { %5906 = vmatpush1.bf16.msra.mxu0 %v14391_v53  ;;  %6070 = vmatpush1.bf16.msra.mxu1 %v14394_v54  ;;  %v14460_v53 = vld [vmem:[%s19024_s1 + $0x1598] ss:$20 sps:$4 sm:$0xff]   ;;  %v14465_v54 = vld [vmem:[%s19024_s1 + $0x15bc] ss:$20 sps:$4 sm:$0xff]  }
 0x274   :  { %5907 = vmatprep.subr.bf16.mxu0 %v14399_v55  ;;  %6071 = vmatprep.subr.bf16.mxu1 %v14402_v56  ;;  %v14468_v55 = vld [vmem:[%s19024_s1 + $0x15c4] ss:$20 sps:$4 sm:$0xff]  }
 0x275   :  { %v14463_v56 = vld [vmem:[%s19024_s1 + $0x15b8] ss:$20 sps:$4 sm:$0xff]  }
 0x277   :  { %5908 = vmatpush1.bf16.msra.mxu0 %v14397_v57  ;;  %6072 = vmatpush1.bf16.msra.mxu1 %v14400_v58  ;;  %v14466_v57 = vld [vmem:[%s19024_s1 + $0x15c0] ss:$20 sps:$4 sm:$0xff]   ;;  %v14471_v58 = vld [vmem:[%s19024_s1 + $0x15e4] ss:$20 sps:$4 sm:$0xff]  }
 0x278   :  { %5909 = vmatprep.subr.bf16.mxu0 %v14405_v59  ;;  %6073 = vmatprep.subr.bf16.mxu1 %v14408_v60  ;;  %v14474_v59 = vld [vmem:[%s19024_s1 + $0x15ec] ss:$20 sps:$4 sm:$0xff]  }
 0x279   :  { %v14469_v60 = vld [vmem:[%s19024_s1 + $0x15e0] ss:$20 sps:$4 sm:$0xff]  }
 0x27b   :  { %5910 = vmatpush1.bf16.msra.mxu0 %v14403_v61  ;;  %6074 = vmatpush1.bf16.msra.mxu1 %v14406_v62  ;;  %v14472_v61 = vld [vmem:[%s19024_s1 + $0x15e8] ss:$20 sps:$4 sm:$0xff]   ;;  %v14477_v62 = vld [vmem:[%s19024_s1 + $0x160c] ss:$20 sps:$4 sm:$0xff]  }
 0x27c   :  { %5911 = vmatprep.subr.bf16.mxu0 %v14411_v63  ;;  %6075 = vmatprep.subr.bf16.mxu1 %v14414_v0  ;;  %v14480_v63 = vld [vmem:[%s19024_s1 + $0x1614] ss:$20 sps:$4 sm:$0xff]  }
 0x27d   :  { %v14475_v0 = vld [vmem:[%s19024_s1 + $0x1608] ss:$20 sps:$4 sm:$0xff]  }
 0x27f   :  { %5912 = vmatpush1.bf16.msra.mxu0 %v14409_v1  ;;  %6076 = vmatpush1.bf16.msra.mxu1 %v14412_v2  ;;  %v14478_v1 = vld [vmem:[%s19024_s1 + $0x1610] ss:$20 sps:$4 sm:$0xff]   ;;  %v14483_v2 = vld [vmem:[%s19024_s1 + $0x1634] ss:$20 sps:$4 sm:$0xff]  }
 0x280   :  { %5922 = vmatprep.subr.bf16.mxu0 %v14417_v3  ;;  %6086 = vmatprep.subr.bf16.mxu1 %v14420_v6  ;;  %v14486_v3 = vld [vmem:[%s19024_s1 + $0x163c] ss:$20 sps:$4 sm:$0xff]  }
 0x281   :  { %v14481_v6 = vld [vmem:[%s19024_s1 + $0x1630] ss:$20 sps:$4 sm:$0xff]  }
 0x282   :  { %5914 = vmatmul.mubr.bf16.vlgmr.msra.gmra.mrb[24].mxu0 %v15558_v10  ;;  %6078 = vmatmul.mubr.bf16.vlgmr.msra.gmra.mrb[24].mxu1 %v15558_v10 }
 0x283   :  { %5923 = vmatpush1.bf16.msra.mxu0 %v14415_v8  ;;  %6087 = vmatpush1.bf16.msra.mxu1 %v14418_v9  ;;  %v14484_v8 = vld [vmem:[%s19024_s1 + $0x1638] ss:$20 sps:$4 sm:$0xff]   ;;  %v14489_v9 = vld [vmem:[%s19024_s1 + $0x165c] ss:$20 sps:$4 sm:$0xff]  }
 0x284   :  { %5924 = vmatprep.subr.bf16.mxu0 %v14423_v11  ;;  %6088 = vmatprep.subr.bf16.mxu1 %v14426_v12  ;;  %v14492_v11 = vld [vmem:[%s19024_s1 + $0x1664] ss:$20 sps:$4 sm:$0xff]  }
 0x285   :  { %5954 = vmatprep.mubr.bf16.mxu0 %v15576_v15  ;;  %6118 = vmatprep.mubr.bf16.mxu1 %v15576_v15 }
 0x287   :  { %5925 = vmatpush1.bf16.msra.mxu0 %v14421_v16  ;;  %6089 = vmatpush1.bf16.msra.mxu1 %v14424_v17 }
 0x288   :  { %5926 = vmatprep.subr.bf16.mxu0 %v14429_v18  ;;  %6090 = vmatprep.subr.bf16.mxu1 %v14432_v19 }
 0x28b   :  { %5927 = vmatpush1.bf16.msra.mxu0 %v14427_v21  ;;  %6091 = vmatpush1.bf16.msra.mxu1 %v14430_v22  ;;  %v14487_v21 = vld [vmem:[%s19024_s1 + $0x1658] ss:$20 sps:$4 sm:$0xff]   ;;  %v14490_v22 = vld [vmem:[%s19024_s1 + $0x1660] ss:$20 sps:$4 sm:$0xff]  }
 0x28c   :  { %5928 = vmatprep.subr.bf16.mxu0 %v14435_v13  ;;  %6092 = vmatprep.subr.bf16.mxu1 %v14438_v27  ;;  %v14495_v27 = vld [vmem:[%s19024_s1 + $0x1684] ss:$20 sps:$4 sm:$0xff]  }
 0x28f   :  { %5929 = vmatpush1.bf16.msra.mxu0 %v14433_v28  ;;  %6093 = vmatpush1.bf16.msra.mxu1 %v14436_v29  ;;  %v14498_v28 = vld [vmem:[%s19024_s1 + $0x168c] ss:$20 sps:$4 sm:$0xff]  }
 0x290   :  { %5930 = vmatprep.subr.bf16.mxu0 %v14441_v32  ;;  %6094 = vmatprep.subr.bf16.mxu1 %v14444_v33  ;;  %v14493_v29 = vld [vmem:[%s19024_s1 + $0x1680] ss:$20 sps:$4 sm:$0xff]   ;;  %v14496_v32 = vld [vmem:[%s19024_s1 + $0x1688] ss:$20 sps:$4 sm:$0xff]  }
 0x291   :  { %v14501_v33 = vld [vmem:[%s19024_s1 + $0x16ac] ss:$20 sps:$4 sm:$0xff]  }
 0x293   :  { %5931 = vmatpush1.bf16.msra.mxu0 %v14439_v34  ;;  %6095 = vmatpush1.bf16.msra.mxu1 %v14442_v35  ;;  %v14504_v34 = vld [vmem:[%s19024_s1 + $0x16b4] ss:$20 sps:$4 sm:$0xff]  }
 0x294   :  { %5932 = vmatprep.subr.bf16.mxu0 %v14447_v36  ;;  %6096 = vmatprep.subr.bf16.mxu1 %v14450_v37 }
 0x295   :  { %v17230_v42 = vpop.f32.mrb[12].mxu1 }
 0x296   :  { %v4235_v43 = vmax.f32 %v16466_v23, %v17230_v42  ;;  %v17234_v44 = vpop.f32.mrb[13].mxu1 }
 0x297   :  { %v4236_v45 = vmax.f32 %v16470_v25, %v17234_v44  ;;  %5933 = vmatpush1.bf16.msra.mxu0 %v14445_v38  ;;  %6097 = vmatpush1.bf16.msra.mxu1 %v14448_v39  ;;  %v3908_v46 = vpop.f32.mrb[14].mxu1  ;;  %v14499_v39 = vld [vmem:[%s19024_s1 + $0x16a8] ss:$20 sps:$4 sm:$0xff]   ;;  %v14834_v44 = vld [vmem:[%s19024_s1 + $0x1d80] ss:$20 sps:$4 sm:$0xff]  }
 0x298   :  { %v3909_v50 = vpop.f32.mrb[15].mxu1  ;;  %5934 = vmatprep.subr.bf16.mxu0 %v14453_v40  ;;  %6098 = vmatprep.subr.bf16.mxu1 %v14456_v41  ;;  %v14502_v40 = vld [vmem:[%s19024_s1 + $0x16b0] ss:$20 sps:$4 sm:$0xff]   ;;  %v14507_v46 = vld [vmem:[%s19024_s1 + $0x16d4] ss:$20 sps:$4 sm:$0xff]  }
 0x299   :  { %v14508_v50 = vld [vmem:[%s19024_s1 + $0x16d8] ss:$20 sps:$4 sm:$0xff]   ;;  %v14826_v25 = vld [vmem:[%s19024_s1 + $0x1d54] ss:$20 sps:$4 sm:$0xff]  }
 0x29b   :  { %5935 = vmatpush1.bf16.msra.mxu0 %v14451_v47  ;;  %6099 = vmatpush1.bf16.msra.mxu1 %v14454_v49  ;;  %v14510_v47 = vld [vmem:[%s19024_s1 + $0x16dc] ss:$20 sps:$4 sm:$0xff]  }
 0x29c   :  { %5936 = vmatprep.subr.bf16.mxu0 %v14459_v7  ;;  %6100 = vmatprep.subr.bf16.mxu1 %v14462_v51  ;;  %v14505_v49 = vld [vmem:[%s19024_s1 + $0x16d0] ss:$20 sps:$4 sm:$0xff]  }
 0x29d   :  { %v14513_v7 = vld [vmem:[%s19024_s1 + $0x1704] ss:$20 sps:$4 sm:$0xff]   ;;  %v14516_v51 = vld [vmem:[%s19024_s1 + $0x16fc] ss:$20 sps:$4 sm:$0xff]  }
 0x29f   :  { %5937 = vmatpush1.bf16.msra.mxu0 %v14457_v52  ;;  %6101 = vmatpush1.bf16.msra.mxu1 %v14460_v53  ;;  %v11536_v52 = vld [vmem:[%s19024_s1 + $0x1728] sm:$0xff]  ;;  %v11535_v53 = vld [vmem:[%s19024_s1 + $0x1720] sm:$0xff] }
 0x2a0   :  { %5938 = vmatprep.subr.bf16.mxu0 %v14465_v54  ;;  %6102 = vmatprep.subr.bf16.mxu1 %v14468_v55  ;;  %v14511_v54 = vld [vmem:[%s19024_s1 + $0x1700] ss:$20 sps:$4 sm:$0xff]   ;;  %v14514_v55 = vld [vmem:[%s19024_s1 + $0x16f8] ss:$20 sps:$4 sm:$0xff]  }
 0x2a3   :  { %5939 = vmatpush1.bf16.msra.mxu0 %v14463_v56  ;;  %6103 = vmatpush1.bf16.msra.mxu1 %v14466_v57  ;;  %v11786_v56 = vcombine.high %v11536_v52, %v11536_v52  ;;  %v11784_v57 = vcombine.high %v11535_v53, %v11535_v53 }
 0x2a4   :  { %5940 = vmatprep.subr.bf16.mxu0 %v14471_v58  ;;  %6104 = vmatprep.subr.bf16.mxu1 %v14474_v59  ;;  %v11785_v58 = vcombine.low %v11536_v52, %v11536_v52  ;;  %v11783_v59 = vcombine.low %v11535_v53, %v11535_v53  ;;  %v14538_v52 = vld [vmem:[%s19024_s1 + $0x13e8] ss:$20 sps:$4 sm:$0xff]  }
 0x2a7   :  { %5941 = vmatpush1.bf16.msra.mxu0 %v14469_v60  ;;  %6105 = vmatpush1.bf16.msra.mxu1 %v14472_v61  ;;  %v5832_v60 = vsel %vm1643_vm0, %v11785_v58, 0  ;;  %v5826_v61 = vsel %vm1643_vm0, %v11783_v59, 0  ;;  %v14542_v58 = vld [vmem:[%s19024_s1 + $0x1410] ss:$20 sps:$4 sm:$0xff]  }
 0x2a8   :  { %5942 = vmatprep.subr.bf16.mxu0 %v14477_v62  ;;  %6106 = vmatprep.subr.bf16.mxu1 %v14480_v63  ;;  %v14521_v62 = vld [vmem:[%s19024_s1 + $0x10c8] ss:$20 sps:$4 sm:$0xff]  }
 0x2a9   :  { %v14522_v63 = vld [vmem:[%s19024_s1 + $0x1348] ss:$20 sps:$4 sm:$0xff]  }
 0x2ab   :  { %5943 = vmatpush1.bf16.msra.mxu0 %v14475_v0  ;;  %6107 = vmatpush1.bf16.msra.mxu1 %v14478_v1  ;;  %v14523_v0 = vld [vmem:[%s19024_s1 + $0xf88] ss:$20 sps:$4 sm:$0xff]  }
 0x2ac   :  { %5944 = vmatprep.subr.bf16.mxu0 %v14483_v2  ;;  %6108 = vmatprep.subr.bf16.mxu1 %v14486_v3  ;;  %v14524_v1 = vld [vmem:[%s19024_s1 + $0x1208] ss:$20 sps:$4 sm:$0xff]   ;;  %v14525_v2 = vld [vmem:[%s19024_s1 + $0x10f0] ss:$20 sps:$4 sm:$0xff]  }
 0x2ad   :  { %v17310_v12 = vpop.f32.mrb[12].mxu0  ;;  %v14526_v3 = vld [vmem:[%s19024_s1 + $0x1370] ss:$20 sps:$4 sm:$0xff]  }
 0x2ae   :  { %v4237_v16 = vmax.f32 %v16468_v24, %v17310_v12  ;;  %v17314_v17 = vpop.f32.mrb[13].mxu0 }
 0x2af   :  { %v4238_v18 = vmax.f32 %v16472_v26, %v17314_v17  ;;  %5945 = vmatpush1.bf16.msra.mxu0 %v14481_v6  ;;  %6109 = vmatpush1.bf16.msra.mxu1 %v14484_v8  ;;  %v4072_v19 = vpop.f32.mrb[14].mxu0  ;;  %v14831_v26 = vld [vmem:[%s19024_s1 + $0x1e68] ss:$20 sps:$4 sm:$0xff]  }
 0x2b0   :  { %v4073_v13 = vpop.f32.mrb[15].mxu0  ;;  %5946 = vmatprep.subr.bf16.mxu0 %v14489_v9  ;;  %6110 = vmatprep.subr.bf16.mxu1 %v14492_v11  ;;  %v17409_v9 = vld [vmem:[%s19025_s0 + $0x18] ss:$0 sps:$4 sm:$0xff]   ;;  %v14832_v17 = vld [vmem:[%s19024_s1 + $0x1d7c] ss:$20 sps:$4 sm:$0xff]  }
 0x2b3   :  { %5947 = vmatpush1.bf16.msra.mxu0 %v14487_v21  ;;  %6111 = vmatpush1.bf16.msra.mxu1 %v14490_v22  ;;  %v14527_v21 = vld [vmem:[%s19024_s1 + $0xfb0] ss:$20 sps:$4 sm:$0xff]  }
 0x2b4   :  { %5948 = vmatprep.subr.bf16.mxu0 %v14495_v27  ;;  %6112 = vmatprep.subr.bf16.mxu1 %v14498_v28  ;;  %v14528_v22 = vld [vmem:[%s19024_s1 + $0x1230] ss:$20 sps:$4 sm:$0xff]   ;;  %v14529_v27 = vld [vmem:[%s19024_s1 + $0x1118] ss:$20 sps:$4 sm:$0xff]  }
 0x2b5   :  { %v12848_v35 = vpop.f32.mrb[16].mxu1  ;;  %v14530_v28 = vld [vmem:[%s19024_s1 + $0x1398] ss:$20 sps:$4 sm:$0xff]  }
 0x2b6   :  { %v12849_v36 = vpop.f32.mrb[17].mxu1 }
 0x2b7   :  { %v17342_v37 = vadd.f32 %v12849_v36, %v12848_v35  ;;  %v12851_v38 = vpop.f32.mrb[18].mxu1  ;;  %5949 = vmatpush1.bf16.msra.mxu0 %v14493_v29  ;;  %6113 = vmatpush1.bf16.msra.mxu1 %v14496_v32  ;;  %v14531_v32 = vld [vmem:[%s19024_s1 + $0xfd8] ss:$20 sps:$4 sm:$0xff]   ;;  %v14534_v35 = vld [vmem:[%s19024_s1 + $0x13c0] ss:$20 sps:$4 sm:$0xff]  }
 0x2b8   :  { %v12852_v41 = vpop.f32.mrb[19].mxu1  ;;  %5950 = vmatprep.subr.bf16.mxu0 %v14501_v33  ;;  %6114 = vmatprep.subr.bf16.mxu1 %v14504_v34  ;;  %v14532_v33 = vld [vmem:[%s19024_s1 + $0x1258] ss:$20 sps:$4 sm:$0xff]   ;;  %v14533_v34 = vld [vmem:[%s19024_s1 + $0x1140] ss:$20 sps:$4 sm:$0xff]  }
 0x2bb   :  { %5951 = vmatpush1.bf16.msra.mxu0 %v14499_v39  ;;  %6115 = vmatpush1.bf16.msra.mxu1 %v14502_v40 }
 0x2bc   :  { %5952 = vmatprep.subr.bf16.mxu0 %v14507_v46  ;;  %6116 = vmatprep.subr.bf16.mxu1 %v14510_v47  ;;  %v14535_v47 = vld [vmem:[%s19024_s1 + $0x1000] ss:$20 sps:$4 sm:$0xff]  }
 0x2bf   :  { %5953 = vmatpush1.bf16.msra.mxu0 %v14505_v49  ;;  %6117 = vmatpush1.bf16.msra.mxu1 %v14508_v50  ;;  %v14536_v49 = vld [vmem:[%s19024_s1 + $0x1280] ss:$20 sps:$4 sm:$0xff]  }
 0x2c0   :  { %6127 = vmatprep.subr.bf16.mxu1 %v14513_v7  ;;  %5963 = vmatprep.subr.bf16.mxu0 %v14516_v51  ;;  %v14537_v51 = vld [vmem:[%s19024_s1 + $0x1168] ss:$20 sps:$4 sm:$0xff]  }
 0x2c2   :  { %5955 = vmatmul.mubr.bf16.vlgmr.msra.gmra.mrb[24].mxu0 %v15770_v20  ;;  %6119 = vmatmul.mubr.bf16.vlgmr.msra.gmra.mrb[24].mxu1 %v15770_v20 }
 0x2c3   :  { %6128 = vmatpush1.bf16.msra.mxu1 %v14511_v54  ;;  %5964 = vmatpush1.bf16.msra.mxu0 %v14514_v55  ;;  %v14539_v55 = vld [vmem:[%s19024_s1 + $0x1028] ss:$20 sps:$4 sm:$0xff]  }
 0x2c4   :  { %11790 = vmatprep.subr.msk.bf16.mxu1 %vm1643_vm0, %v11786_v56  ;;  %11788 = vmatprep.subr.msk.bf16.mxu0 %vm1643_vm0, %v11784_v57  ;;  %v14540_v56 = vld [vmem:[%s19024_s1 + $0x12a8] ss:$20 sps:$4 sm:$0xff]   ;;  %v14541_v57 = vld [vmem:[%s19024_s1 + $0x1190] ss:$20 sps:$4 sm:$0xff]  }
 0x2c5   :  { %5995 = vmatprep.mubr.bf16.mxu0 %v15098_v31  ;;  %6159 = vmatprep.mubr.bf16.mxu1 %v15098_v31 }
 0x2c7   :  { %6130 = vmatpush1.bf16.msra.mxu1 %v5832_v60  ;;  %5966 = vmatpush1.bf16.msra.mxu0 %v5826_v61  ;;  %v14543_v60 = vld [vmem:[%s19024_s1 + $0x1050] ss:$20 sps:$4 sm:$0xff]  }
 0x2c8   :  { %12901 = vmatprep.subr.bf16.mxu0 %v14521_v62  ;;  %12923 = vmatprep.subr.bf16.mxu1 %v14522_v63  ;;  %v14544_v61 = vld [vmem:[%s19024_s1 + $0x12d0] ss:$20 sps:$4 sm:$0xff]   ;;  %v14545_v62 = vld [vmem:[%s19024_s1 + $0x11b8] ss:$20 sps:$4 sm:$0xff]  }
 0x2c9   :  { %v14546_v63 = vld [vmem:[%s19024_s1 + $0x1438] ss:$20 sps:$4 sm:$0xff]  }
 0x2cd   :  { %v12870_v6 = vpop.f32.mrb[16].mxu0 }
 0x2ce   :  { %v12871_v8 = vpop.f32.mrb[17].mxu0  ;;  %11789 = vmatmul.mubr.msk.bf16.vlgmr.msra.gmra.mrb[24].mxu0 %vm1639_vm1, %v17409_v9  ;;  %11791 = vmatmul.mubr.msk.bf16.vlgmr.msra.gmra.mrb[24].mxu1 %vm1639_vm1, %v17409_v9 }
 0x2cf   :  { %v12872_v11 = vadd.f32 %v12871_v8, %v12870_v6  ;;  %12902 = vmatpush3.bf16.msra.mxu0 %v14523_v0  ;;  %12924 = vmatpush3.bf16.msra.mxu1 %v14524_v1  ;;  %v12873_v19 = vpop.f32.mrb[18].mxu0  ;;  %v14547_v0 = vld [vmem:[%s19024_s1 + $0x1078] ss:$20 sps:$4 sm:$0xff]   ;;  %v14551_v6 = vld [vmem:[%s19024_s1 + $0x10a0] ss:$20 sps:$4 sm:$0xff]  }
 0x2d0   :  { %12903 = vmatprep.subr.bf16.mxu0 %v14525_v2  ;;  %12925 = vmatprep.subr.bf16.mxu1 %v14526_v3  ;;  %v12874_v13 = vpop.f32.mrb[19].mxu0  ;;  %v14548_v1 = vld [vmem:[%s19024_s1 + $0x12f8] ss:$20 sps:$4 sm:$0xff]   ;;  %v14549_v2 = vld [vmem:[%s19024_s1 + $0x11e0] ss:$20 sps:$4 sm:$0xff]  }
 0x2d1   :  { %v4150_v29 = vadd.f32 %v12872_v11, %v17342_v37  ;;  %6200 = vmatprep.mubr.bf16.mxu0 %v15285_v48  ;;  %6240 = vmatprep.mubr.bf16.mxu1 %v15429_v30  ;;  %v14550_v3 = vld [vmem:[%s19024_s1 + $0x1460] ss:$20 sps:$4 sm:$0xff]   ;;  %v14553_v11 = vld [vmem:[%s19024_s1 + $0x15c8] ss:$20 sps:$4 sm:$0xff]   ;;  %v14558_v13 = vld [vmem:[%s19024_s1 + $0x1730] ss:$0 sps:$4 sm:$0xff]  }
 0x2d2   :  { %v14552_v8 = vld [vmem:[%s19024_s1 + $0x1320] ss:$20 sps:$4 sm:$0xff]   ;;  %v14554_v19 = vld [vmem:[%s19024_s1 + $0x1488] ss:$20 sps:$4 sm:$0xff]  }
 0x2d3   :  { %12904 = vmatpush3.bf16.msra.mxu0 %v14527_v21  ;;  %12926 = vmatpush3.bf16.msra.mxu1 %v14528_v22  ;;  %v14555_v21 = vld [vmem:[%s19024_s1 + $0x1708] ss:$20 sps:$4 sm:$0xff]   ;;  %v14556_v22 = vld [vmem:[%s19024_s1 + $0x15f0] ss:$20 sps:$4 sm:$0xff]  }
 0x2d4   :  { %12905 = vmatprep.subr.bf16.mxu0 %v14529_v27  ;;  %12927 = vmatprep.subr.bf16.mxu1 %v14530_v28  ;;  %v14557_v27 = vld [vmem:[%s19024_s1 + $0x14b0] ss:$20 sps:$4 sm:$0xff]   ;;  %v5838_v28 = vsel %vm1643_vm0, %v14558_v13, 0 }
 0x2d5   :  { %v12892_v36 = vpop.f32.mrb[20].mxu1  ;;  %v4229_v37 = vpop.f32.mrb[20].mxu0  ;;  %v14607_v13 = vld [vmem:[%s19024_s1 + $0x189c] ss:$20 sps:$4 sm:$0xff]  }
 0x2d6   :  { %v12893_v38 = vpop.f32.mrb[21].mxu1  ;;  %v13283_v39 = vpop.f32.mrb[21].mxu0 }
 0x2d7   :  { %v12894_v40 = vadd.f32 %v12893_v38, %v12892_v36  ;;  %12906 = vmatpush3.bf16.msra.mxu0 %v14531_v32  ;;  %12928 = vmatpush3.bf16.msra.mxu1 %v14532_v33  ;;  %v12895_v41 = vpop.f32.mrb[22].mxu1  ;;  %v4232_v46 = vpop.f32.mrb[22].mxu0  ;;  %v14562_v32 = vld [vmem:[%s19024_s1 + $0x1738] ss:$20 sps:$4 sm:$0xff]   ;;  %v14560_v33 = vld [vmem:[%s19024_s1 + $0x1734] ss:$20 sps:$4 sm:$0xff]  }
 0x2d8   :  { %v12896_v50 = vpop.f32.mrb[23].mxu1  ;;  %12907 = vmatprep.subr.bf16.mxu0 %v14533_v34  ;;  %12929 = vmatprep.subr.bf16.mxu1 %v14534_v35  ;;  %v13284_v7 = vpop.f32.mrb[23].mxu0  ;;  %v14563_v34 = vld [vmem:[%s19024_s1 + $0x14d8] ss:$20 sps:$4 sm:$0xff]   ;;  %v14564_v35 = vld [vmem:[%s19024_s1 + $0x1640] ss:$20 sps:$4 sm:$0xff]  }
 0x2d9   :  { %v4190_v53 = vadd.f32 %v12894_v40, %v4150_v29  ;;  %v14559_v29 = vld [vmem:[%s19024_s1 + $0x1618] ss:$20 sps:$4 sm:$0xff]   ;;  %v14567_v36 = vld [vmem:[%s19024_s1 + $0x1760] ss:$20 sps:$4 sm:$0xff]   ;;  %v14569_v39 = vld [vmem:[%s19024_s1 + $0x1668] ss:$20 sps:$4 sm:$0xff]  }
 0x2da   :  { %v14568_v38 = vld [vmem:[%s19024_s1 + $0x1500] ss:$20 sps:$4 sm:$0xff]   ;;  %v14570_v40 = vld [vmem:[%s19024_s1 + $0x1784] ss:$20 sps:$4 sm:$0xff]   ;;  %v14573_v41 = vld [vmem:[%s19024_s1 + $0x1528] ss:$20 sps:$4 sm:$0xff]  }
 0x2db   :  { %v17454_v54 = vadd.f32 %v4229_v37, %v4190_v53  ;;  %12908 = vmatpush3.bf16.msra.mxu0 %v14535_v47  ;;  %12930 = vmatpush3.bf16.msra.mxu1 %v14536_v49  ;;  %v14565_v37 = vld [vmem:[%s19024_s1 + $0x175c] ss:$20 sps:$4 sm:$0xff]   ;;  %v14575_v49 = vld [vmem:[%s19024_s1 + $0x17ac] ss:$20 sps:$4 sm:$0xff]  }
 0x2dc   :  { %12909 = vmatprep.subr.bf16.mxu0 %v14537_v51  ;;  %12931 = vmatprep.subr.bf16.mxu1 %v14538_v52  ;;  %v14574_v46 = vld [vmem:[%s19024_s1 + $0x1690] ss:$20 sps:$4 sm:$0xff]   ;;  %v14579_v7 = vld [vmem:[%s19024_s1 + $0x16b8] ss:$20 sps:$4 sm:$0xff]   ;;  %v14580_v52 = vld [vmem:[%s19024_s1 + $0x17d4] ss:$20 sps:$4 sm:$0xff]  }
 0x2dd   :  { %v4239_v59 = vmax.f32 %v16693_v14, %v17454_v54  ;;  %v14577_v47 = vld [vmem:[%s19024_s1 + $0x17b0] ss:$20 sps:$4 sm:$0xff]   ;;  %v14582_v51 = vld [vmem:[%s19024_s1 + $0x17d8] ss:$20 sps:$4 sm:$0xff]  }
 0x2de   :  { %v14578_v50 = vld [vmem:[%s19024_s1 + $0x1550] ss:$20 sps:$4 sm:$0xff]   ;;  %v14583_v53 = vld [vmem:[%s19024_s1 + $0x1578] ss:$20 sps:$4 sm:$0xff]  }
 0x2df   :  { %12910 = vmatpush3.bf16.msra.mxu0 %v14539_v55  ;;  %12932 = vmatpush3.bf16.msra.mxu1 %v14540_v56  ;;  %v14584_v55 = vld [vmem:[%s19024_s1 + $0x16e0] ss:$20 sps:$4 sm:$0xff]   ;;  %v14908_v14 = vld [vmem:[%s19024_s1 + $0x1ce4] ss:$20 sps:$4 sm:$0xff]   ;;  %v14909_v54 = vld [vmem:[%s19024_s1 + $0x1c1c] ss:$20 sps:$4 sm:$0xff]  }
 0x2e0   :  { %12911 = vmatprep.subr.bf16.mxu0 %v14541_v57  ;;  %12933 = vmatprep.subr.bf16.mxu1 %v14542_v58  ;;  %v14587_v56 = vld [vmem:[%s19024_s1 + $0x1800] ss:$20 sps:$4 sm:$0xff]   ;;  %v14585_v57 = vld [vmem:[%s19024_s1 + $0x17fc] ss:$20 sps:$4 sm:$0xff]  }
 0x2e1   :  { %v14588_v58 = vld [vmem:[%s19024_s1 + $0x15a0] ss:$20 sps:$4 sm:$0xff]  }
 0x2e3   :  { %12912 = vmatpush3.bf16.msra.mxu0 %v14543_v60  ;;  %12934 = vmatpush3.bf16.msra.mxu1 %v14544_v61  ;;  %v14591_v60 = vld [vmem:[%s19024_s1 + $0x1828] ss:$20 sps:$4 sm:$0xff]   ;;  %v14594_v61 = vld [vmem:[%s19024_s1 + $0x1740] ss:$20 sps:$4 sm:$0xff]  }
 0x2e4   :  { %12913 = vmatprep.subr.bf16.mxu0 %v14545_v62  ;;  %12935 = vmatprep.subr.bf16.mxu1 %v14546_v63  ;;  %v14589_v62 = vld [vmem:[%s19024_s1 + $0x1824] ss:$20 sps:$4 sm:$0xff]   ;;  %v14592_v63 = vld [vmem:[%s19024_s1 + $0x173c] ss:$20 sps:$4 sm:$0xff]  }
 0x2e7   :  { %12914 = vmatpush3.bf16.msra.mxu0 %v14547_v0  ;;  %12936 = vmatpush3.bf16.msra.mxu1 %v14548_v1  ;;  %v14597_v0 = vld [vmem:[%s19024_s1 + $0x1850] ss:$20 sps:$4 sm:$0xff]   ;;  %v14600_v1 = vld [vmem:[%s19024_s1 + $0x1768] ss:$20 sps:$4 sm:$0xff]  }
 0x2e8   :  { %12915 = vmatprep.subr.bf16.mxu0 %v14549_v2  ;;  %12937 = vmatprep.subr.bf16.mxu1 %v14550_v3  ;;  %v14595_v2 = vld [vmem:[%s19024_s1 + $0x184c] ss:$20 sps:$4 sm:$0xff]   ;;  %v14598_v3 = vld [vmem:[%s19024_s1 + $0x1764] ss:$20 sps:$4 sm:$0xff]  }
 0x2eb   :  { %12916 = vmatpush3.bf16.msra.mxu0 %v14551_v6  ;;  %12938 = vmatpush3.bf16.msra.mxu1 %v14552_v8  ;;  %v14603_v6 = vld [vmem:[%s19024_s1 + $0x1878] ss:$20 sps:$4 sm:$0xff]   ;;  %v14606_v8 = vld [vmem:[%s19024_s1 + $0x1790] ss:$20 sps:$4 sm:$0xff]  }
 0x2ec   :  { %12945 = vmatprep.subr.bf16.mxu0 %v14553_v11  ;;  %13285 = vmatprep.subr.bf16.mxu1 %v15099_v4  ;;  %v14601_v11 = vld [vmem:[%s19024_s1 + $0x1874] ss:$20 sps:$4 sm:$0xff]  }
 0x2ee   :  { %6201 = vmatmul.mubr.bf16.vlgmr.msra.gmra.mrb[28].mxu0 %v15349_v5  ;;  %6241 = vmatmul.mubr.bf16.vlgmr.msra.gmra.mrb[28].mxu1 %v15558_v10 }
 0x2ef   :  { %12946 = vmatpush3.bf16.msra.mxu0 %v14554_v19  ;;  %13286 = vmatpush3.bf16.msra.mxu1 %v14555_v21  ;;  %v14604_v19 = vld [vmem:[%s19024_s1 + $0x178c] ss:$20 sps:$4 sm:$0xff]  }
 0x2f0   :  { %12947 = vmatprep.subr.bf16.mxu0 %v14556_v22  ;;  %13287 = vmatprep.subr.bf16.mxu1 %v15099_v4  ;;  %v14609_v21 = vld [vmem:[%s19024_s1 + $0x18a0] ss:$20 sps:$4 sm:$0xff]   ;;  %v14612_v22 = vld [vmem:[%s19024_s1 + $0x17b8] ss:$20 sps:$4 sm:$0xff]  }
 0x2f1   :  { %13289 = vmatprep.mubr.msk.bf16.mxu1 %vm15100_vm2, %v15099_v4  ;;  %6280 = vmatprep.mubr.bf16.mxu0 %v15576_v15 }
 0x2f3   :  { %12948 = vmatpush3.bf16.msra.mxu0 %v14557_v27  ;;  %13288 = vmatpush3.bf16.msra.mxu1 %v5838_v28  ;;  %v14610_v27 = vld [vmem:[%s19024_s1 + $0x17b4] ss:$20 sps:$4 sm:$0xff]  }
 0x2f4   :  { %12949 = vmatprep.subr.bf16.mxu0 %v14559_v29  ;;  %7933 = vmatprep.subr.bf16.mxu1 %v14562_v32  ;;  %v14615_v28 = vld [vmem:[%s19024_s1 + $0x18c8] ss:$20 sps:$4 sm:$0xff]   ;;  %v14618_v29 = vld [vmem:[%s19024_s1 + $0x17e0] ss:$20 sps:$4 sm:$0xff]   ;;  %v14613_v32 = vld [vmem:[%s19024_s1 + $0x18c4] ss:$20 sps:$4 sm:$0xff]  }
 0x2f6   :  { %13290 = vmatmul.mubr.msk.bf16.vlgmr.msra.gmra.mrb[32].mxu1 %vm1639_vm1, %v17409_v9  ;;  %v14572_v9 = vld [vmem:[%s19024_s1 + $0x1788] ss:$20 sps:$4 sm:$0xff]  }
 0x2f7   :  { %12950 = vmatpush3.bf16.msra.mxu0 %v14563_v34  ;;  %7934 = vmatpush1.bf16.msra.mxu1 %v14560_v33  ;;  %v14616_v33 = vld [vmem:[%s19024_s1 + $0x17dc] ss:$20 sps:$4 sm:$0xff]  }
 0x2f8   :  { %12951 = vmatprep.subr.bf16.mxu0 %v14564_v35  ;;  %7935 = vmatprep.subr.bf16.mxu1 %v14567_v36  ;;  %v14621_v34 = vld [vmem:[%s19024_s1 + $0x18f0] ss:$20 sps:$4 sm:$0xff]   ;;  %v14624_v35 = vld [vmem:[%s19024_s1 + $0x1808] ss:$20 sps:$4 sm:$0xff]   ;;  %v14619_v36 = vld [vmem:[%s19024_s1 + $0x18ec] ss:$20 sps:$4 sm:$0xff]  }
 0x2f9   :  { %7965 = vmatprep.mubr.bf16.mxu1 %v15285_v48 }
 0x2fb   :  { %12952 = vmatpush3.bf16.msra.mxu0 %v14568_v38  ;;  %7936 = vmatpush1.bf16.msra.mxu1 %v14565_v37  ;;  %v14622_v37 = vld [vmem:[%s19024_s1 + $0x1804] ss:$20 sps:$4 sm:$0xff]  }
 0x2fc   :  { %12953 = vmatprep.subr.bf16.mxu0 %v14569_v39  ;;  %7937 = vmatprep.subr.bf16.mxu1 %v14572_v9  ;;  %v14627_v38 = vld [vmem:[%s19024_s1 + $0x1918] ss:$20 sps:$4 sm:$0xff]   ;;  %v14630_v39 = vld [vmem:[%s19024_s1 + $0x1830] ss:$20 sps:$4 sm:$0xff]   ;;  %v14625_v9 = vld [vmem:[%s19024_s1 + $0x1914] ss:$20 sps:$4 sm:$0xff]  }
 0x2ff   :  { %12954 = vmatpush3.bf16.msra.mxu0 %v14573_v41  ;;  %7938 = vmatpush1.bf16.msra.mxu1 %v14570_v40  ;;  %v14628_v40 = vld [vmem:[%s19024_s1 + $0x182c] ss:$20 sps:$4 sm:$0xff]  }
 0x300   :  { %12955 = vmatprep.subr.bf16.mxu0 %v14574_v46  ;;  %7939 = vmatprep.subr.bf16.mxu1 %v14577_v47  ;;  %v14633_v41 = vld [vmem:[%s19024_s1 + $0x1940] ss:$20 sps:$4 sm:$0xff]   ;;  %v14636_v46 = vld [vmem:[%s19024_s1 + $0x1858] ss:$20 sps:$4 sm:$0xff]   ;;  %v14631_v47 = vld [vmem:[%s19024_s1 + $0x193c] ss:$20 sps:$4 sm:$0xff]  }
 0x303   :  { %12956 = vmatpush3.bf16.msra.mxu0 %v14578_v50  ;;  %7940 = vmatpush1.bf16.msra.mxu1 %v14575_v49  ;;  %v14634_v49 = vld [vmem:[%s19024_s1 + $0x1854] ss:$20 sps:$4 sm:$0xff]  }
 0x304   :  { %12957 = vmatprep.subr.bf16.mxu0 %v14579_v7  ;;  %7941 = vmatprep.subr.bf16.mxu1 %v14582_v51  ;;  %v14639_v50 = vld [vmem:[%s19024_s1 + $0x1968] ss:$20 sps:$4 sm:$0xff]   ;;  %v14642_v7 = vld [vmem:[%s19024_s1 + $0x1880] ss:$20 sps:$4 sm:$0xff]   ;;  %v14637_v51 = vld [vmem:[%s19024_s1 + $0x1964] ss:$20 sps:$4 sm:$0xff]  }
 0x307   :  { %12958 = vmatpush3.bf16.msra.mxu0 %v14583_v53  ;;  %7942 = vmatpush1.bf16.msra.mxu1 %v14580_v52  ;;  %v14640_v52 = vld [vmem:[%s19024_s1 + $0x187c] ss:$20 sps:$4 sm:$0xff]  }
 0x308   :  { %12959 = vmatprep.subr.bf16.mxu0 %v14584_v55  ;;  %7943 = vmatprep.subr.bf16.mxu1 %v14587_v56  ;;  %v14645_v53 = vld [vmem:[%s19024_s1 + $0x1990] ss:$20 sps:$4 sm:$0xff]   ;;  %v14648_v55 = vld [vmem:[%s19024_s1 + $0x18a8] ss:$20 sps:$4 sm:$0xff]   ;;  %v14643_v56 = vld [vmem:[%s19024_s1 + $0x198c] ss:$20 sps:$4 sm:$0xff]  }
 0x30b   :  { %12960 = vmatpush3.bf16.msra.mxu0 %v14588_v58  ;;  %7944 = vmatpush1.bf16.msra.mxu1 %v14585_v57  ;;  %v14646_v57 = vld [vmem:[%s19024_s1 + $0x18a4] ss:$20 sps:$4 sm:$0xff]  }
 0x30c   :  { %7945 = vmatprep.subr.bf16.mxu1 %v14591_v60  ;;  %8097 = vmatprep.subr.bf16.mxu0 %v14594_v61  ;;  %v14651_v58 = vld [vmem:[%s19024_s1 + $0x19b8] ss:$20 sps:$4 sm:$0xff]   ;;  %v14654_v60 = vld [vmem:[%s19024_s1 + $0x18d0] ss:$20 sps:$4 sm:$0xff]   ;;  %v14649_v61 = vld [vmem:[%s19024_s1 + $0x19b4] ss:$20 sps:$4 sm:$0xff]  }
 0x30e   :  { %6281 = vmatmul.mubr.bf16.vlgmr.msra.gmra.mrb[32].mxu0 %v15770_v20 }
 0x30f   :  { %7946 = vmatpush1.bf16.msra.mxu1 %v14589_v62  ;;  %8098 = vmatpush1.bf16.msra.mxu0 %v14592_v63  ;;  %v14652_v62 = vld [vmem:[%s19024_s1 + $0x18cc] ss:$20 sps:$4 sm:$0xff]  }
 0x310   :  { %7947 = vmatprep.subr.bf16.mxu1 %v14597_v0  ;;  %8099 = vmatprep.subr.bf16.mxu0 %v14600_v1  ;;  %v14657_v63 = vld [vmem:[%s19024_s1 + $0x19e0] ss:$20 sps:$4 sm:$0xff]   ;;  %v14660_v0 = vld [vmem:[%s19024_s1 + $0x18f8] ss:$20 sps:$4 sm:$0xff]   ;;  %v14655_v1 = vld [vmem:[%s19024_s1 + $0x19dc] ss:$20 sps:$4 sm:$0xff]  }
 0x311   :  { %8129 = vmatprep.mubr.bf16.mxu0 %v15285_v48 }
 0x313   :  { %7948 = vmatpush1.bf16.msra.mxu1 %v14595_v2  ;;  %8100 = vmatpush1.bf16.msra.mxu0 %v14598_v3  ;;  %v14658_v2 = vld [vmem:[%s19024_s1 + $0x18f4] ss:$20 sps:$4 sm:$0xff]  }
 0x314   :  { %7949 = vmatprep.subr.bf16.mxu1 %v14603_v6  ;;  %8101 = vmatprep.subr.bf16.mxu0 %v14606_v8  ;;  %v14663_v3 = vld [vmem:[%s19024_s1 + $0x1a08] ss:$20 sps:$4 sm:$0xff]   ;;  %v14666_v6 = vld [vmem:[%s19024_s1 + $0x1920] ss:$20 sps:$4 sm:$0xff]   ;;  %v14661_v8 = vld [vmem:[%s19024_s1 + $0x1a04] ss:$20 sps:$4 sm:$0xff]  }
 0x317   :  { %7950 = vmatpush1.bf16.msra.mxu1 %v14601_v11  ;;  %8102 = vmatpush1.bf16.msra.mxu0 %v14604_v19  ;;  %v14664_v11 = vld [vmem:[%s19024_s1 + $0x191c] ss:$20 sps:$4 sm:$0xff]  }
 0x318   :  { %7951 = vmatprep.subr.bf16.mxu1 %v14609_v21  ;;  %8103 = vmatprep.subr.bf16.mxu0 %v14612_v22  ;;  %v14669_v19 = vld [vmem:[%s19024_s1 + $0x1a30] ss:$20 sps:$4 sm:$0xff]   ;;  %v14672_v21 = vld [vmem:[%s19024_s1 + $0x1948] ss:$20 sps:$4 sm:$0xff]   ;;  %v14667_v22 = vld [vmem:[%s19024_s1 + $0x1a2c] ss:$20 sps:$4 sm:$0xff]  }
 0x31b   :  { %7952 = vmatpush1.bf16.msra.mxu1 %v14607_v13  ;;  %8104 = vmatpush1.bf16.msra.mxu0 %v14610_v27  ;;  %v14670_v13 = vld [vmem:[%s19024_s1 + $0x1944] ss:$20 sps:$4 sm:$0xff]  }
 0x31c   :  { %7953 = vmatprep.subr.bf16.mxu1 %v14615_v28  ;;  %8105 = vmatprep.subr.bf16.mxu0 %v14618_v29  ;;  %v14675_v27 = vld [vmem:[%s19024_s1 + $0x1a58] ss:$20 sps:$4 sm:$0xff]   ;;  %v14678_v28 = vld [vmem:[%s19024_s1 + $0x1970] ss:$20 sps:$4 sm:$0xff]   ;;  %v14673_v29 = vld [vmem:[%s19024_s1 + $0x1a54] ss:$20 sps:$4 sm:$0xff]  }
 0x31f   :  { %7954 = vmatpush1.bf16.msra.mxu1 %v14613_v32  ;;  %8106 = vmatpush1.bf16.msra.mxu0 %v14616_v33  ;;  %v14676_v32 = vld [vmem:[%s19024_s1 + $0x196c] ss:$20 sps:$4 sm:$0xff]  }
 0x320   :  { %7955 = vmatprep.subr.bf16.mxu1 %v14621_v34  ;;  %8107 = vmatprep.subr.bf16.mxu0 %v14624_v35  ;;  %v14681_v33 = vld [vmem:[%s19024_s1 + $0x1a80] ss:$20 sps:$4 sm:$0xff]   ;;  %v14684_v34 = vld [vmem:[%s19024_s1 + $0x1998] ss:$20 sps:$4 sm:$0xff]   ;;  %v14679_v35 = vld [vmem:[%s19024_s1 + $0x1a7c] ss:$20 sps:$4 sm:$0xff]  }
 0x323   :  { %7956 = vmatpush1.bf16.msra.mxu1 %v14619_v36  ;;  %8108 = vmatpush1.bf16.msra.mxu0 %v14622_v37  ;;  %v14682_v36 = vld [vmem:[%s19024_s1 + $0x1994] ss:$20 sps:$4 sm:$0xff]  }
 0x324   :  { %7957 = vmatprep.subr.bf16.mxu1 %v14627_v38  ;;  %8109 = vmatprep.subr.bf16.mxu0 %v14630_v39  ;;  %v14687_v37 = vld [vmem:[%s19024_s1 + $0x1aa8] ss:$20 sps:$4 sm:$0xff]   ;;  %v14690_v38 = vld [vmem:[%s19024_s1 + $0x19c0] ss:$20 sps:$4 sm:$0xff]   ;;  %v14685_v39 = vld [vmem:[%s19024_s1 + $0x1aa4] ss:$20 sps:$4 sm:$0xff]  }
 0x327   :  { %7958 = vmatpush1.bf16.msra.mxu1 %v14625_v9  ;;  %8110 = vmatpush1.bf16.msra.mxu0 %v14628_v40  ;;  %v14688_v9 = vld [vmem:[%s19024_s1 + $0x19bc] ss:$20 sps:$4 sm:$0xff]  }
 0x328   :  { %7959 = vmatprep.subr.bf16.mxu1 %v14633_v41  ;;  %8111 = vmatprep.subr.bf16.mxu0 %v14636_v46  ;;  %v14693_v40 = vld [vmem:[%s19024_s1 + $0x1ad0] ss:$20 sps:$4 sm:$0xff]   ;;  %v14696_v41 = vld [vmem:[%s19024_s1 + $0x19e8] ss:$20 sps:$4 sm:$0xff]   ;;  %v14691_v46 = vld [vmem:[%s19024_s1 + $0x1acc] ss:$20 sps:$4 sm:$0xff]  }
 0x32b   :  { %7960 = vmatpush1.bf16.msra.mxu1 %v14631_v47  ;;  %8112 = vmatpush1.bf16.msra.mxu0 %v14634_v49  ;;  %v14694_v47 = vld [vmem:[%s19024_s1 + $0x19e4] ss:$20 sps:$4 sm:$0xff]  }
 0x32c   :  { %7961 = vmatprep.subr.bf16.mxu1 %v14639_v50  ;;  %8113 = vmatprep.subr.bf16.mxu0 %v14642_v7  ;;  %v14699_v49 = vld [vmem:[%s19024_s1 + $0x1af8] ss:$20 sps:$4 sm:$0xff]   ;;  %v14702_v50 = vld [vmem:[%s19024_s1 + $0x1a10] ss:$20 sps:$4 sm:$0xff]   ;;  %v14697_v7 = vld [vmem:[%s19024_s1 + $0x1af4] ss:$20 sps:$4 sm:$0xff]  }
 0x32f   :  { %7962 = vmatpush1.bf16.msra.mxu1 %v14637_v51  ;;  %8114 = vmatpush1.bf16.msra.mxu0 %v14640_v52  ;;  %v14700_v51 = vld [vmem:[%s19024_s1 + $0x1a0c] ss:$20 sps:$4 sm:$0xff]  }
 0x330   :  { %7963 = vmatprep.subr.bf16.mxu1 %v14645_v53  ;;  %8115 = vmatprep.subr.bf16.mxu0 %v14648_v55  ;;  %v14705_v52 = vld [vmem:[%s19024_s1 + $0x1b20] ss:$20 sps:$4 sm:$0xff]   ;;  %v14708_v53 = vld [vmem:[%s19024_s1 + $0x1a38] ss:$20 sps:$4 sm:$0xff]   ;;  %v14703_v55 = vld [vmem:[%s19024_s1 + $0x1b1c] ss:$20 sps:$4 sm:$0xff]  }
 0x333   :  { %7964 = vmatpush1.bf16.msra.mxu1 %v14643_v56  ;;  %8116 = vmatpush1.bf16.msra.mxu0 %v14646_v57  ;;  %v14706_v56 = vld [vmem:[%s19024_s1 + $0x1a34] ss:$20 sps:$4 sm:$0xff]  }
 0x334   :  { %7974 = vmatprep.subr.bf16.mxu1 %v14651_v58  ;;  %8117 = vmatprep.subr.bf16.mxu0 %v14654_v60  ;;  %v14711_v57 = vld [vmem:[%s19024_s1 + $0x1b48] ss:$20 sps:$4 sm:$0xff]   ;;  %v14714_v58 = vld [vmem:[%s19024_s1 + $0x1a60] ss:$20 sps:$4 sm:$0xff]   ;;  %v14709_v60 = vld [vmem:[%s19024_s1 + $0x1b44] ss:$20 sps:$4 sm:$0xff]  }
 0x336   :  { %7966 = vmatmul.mubr.bf16.vlgmr.msra.gmra.mrb[36].mxu1 %v15349_v5 }
 0x337   :  { %7975 = vmatpush1.bf16.msra.mxu1 %v14649_v61  ;;  %8118 = vmatpush1.bf16.msra.mxu0 %v14652_v62  ;;  %v14712_v61 = vld [vmem:[%s19024_s1 + $0x1a5c] ss:$20 sps:$4 sm:$0xff]  }
 0x338   :  { %7976 = vmatprep.subr.bf16.mxu1 %v14657_v63  ;;  %8119 = vmatprep.subr.bf16.mxu0 %v14660_v0  ;;  %v14717_v62 = vld [vmem:[%s19024_s1 + $0x1b70] ss:$20 sps:$4 sm:$0xff]   ;;  %v14720_v63 = vld [vmem:[%s19024_s1 + $0x1a88] ss:$20 sps:$4 sm:$0xff]   ;;  %v14715_v0 = vld [vmem:[%s19024_s1 + $0x1b6c] ss:$20 sps:$4 sm:$0xff]  }
 0x339   :  { %8006 = vmatprep.mubr.bf16.mxu1 %v15429_v30 }
 0x33b   :  { %7977 = vmatpush1.bf16.msra.mxu1 %v14655_v1  ;;  %8120 = vmatpush1.bf16.msra.mxu0 %v14658_v2  ;;  %v14718_v1 = vld [vmem:[%s19024_s1 + $0x1a84] ss:$20 sps:$4 sm:$0xff]  }
 0x33c   :  { %7978 = vmatprep.subr.bf16.mxu1 %v14663_v3  ;;  %8121 = vmatprep.subr.bf16.mxu0 %v14666_v6  ;;  %v14723_v2 = vld [vmem:[%s19024_s1 + $0x1b98] ss:$20 sps:$4 sm:$0xff]   ;;  %v14726_v3 = vld [vmem:[%s19024_s1 + $0x1ab0] ss:$20 sps:$4 sm:$0xff]   ;;  %v14721_v6 = vld [vmem:[%s19024_s1 + $0x1b94] ss:$20 sps:$4 sm:$0xff]  }
 0x33f   :  { %7979 = vmatpush1.bf16.msra.mxu1 %v14661_v8  ;;  %8122 = vmatpush1.bf16.msra.mxu0 %v14664_v11  ;;  %v14724_v8 = vld [vmem:[%s19024_s1 + $0x1aac] ss:$20 sps:$4 sm:$0xff]  }
 0x340   :  { %7980 = vmatprep.subr.bf16.mxu1 %v14669_v19  ;;  %8123 = vmatprep.subr.bf16.mxu0 %v14672_v21  ;;  %v14729_v11 = vld [vmem:[%s19024_s1 + $0x1bc0] ss:$20 sps:$4 sm:$0xff]   ;;  %v14732_v19 = vld [vmem:[%s19024_s1 + $0x1ad8] ss:$20 sps:$4 sm:$0xff]   ;;  %v14727_v21 = vld [vmem:[%s19024_s1 + $0x1bbc] ss:$20 sps:$4 sm:$0xff]  }
 0x343   :  { %7981 = vmatpush1.bf16.msra.mxu1 %v14667_v22  ;;  %8124 = vmatpush1.bf16.msra.mxu0 %v14670_v13  ;;  %v14730_v22 = vld [vmem:[%s19024_s1 + $0x1ad4] ss:$20 sps:$4 sm:$0xff]  }
 0x344   :  { %7982 = vmatprep.subr.bf16.mxu1 %v14675_v27  ;;  %8125 = vmatprep.subr.bf16.mxu0 %v14678_v28  ;;  %v14735_v13 = vld [vmem:[%s19024_s1 + $0x1be8] ss:$20 sps:$4 sm:$0xff]   ;;  %v14738_v27 = vld [vmem:[%s19024_s1 + $0x1b00] ss:$20 sps:$4 sm:$0xff]   ;;  %v14733_v28 = vld [vmem:[%s19024_s1 + $0x1be4] ss:$20 sps:$4 sm:$0xff]  }
 0x347   :  { %7983 = vmatpush1.bf16.msra.mxu1 %v14673_v29  ;;  %8126 = vmatpush1.bf16.msra.mxu0 %v14676_v32  ;;  %v14736_v29 = vld [vmem:[%s19024_s1 + $0x1afc] ss:$20 sps:$4 sm:$0xff]  }
 0x348   :  { %7984 = vmatprep.subr.bf16.mxu1 %v14681_v33  ;;  %8127 = vmatprep.subr.bf16.mxu0 %v14684_v34  ;;  %v14741_v32 = vld [vmem:[%s19024_s1 + $0x1c10] ss:$20 sps:$4 sm:$0xff]   ;;  %v14744_v33 = vld [vmem:[%s19024_s1 + $0x1b28] ss:$20 sps:$4 sm:$0xff]   ;;  %v14739_v34 = vld [vmem:[%s19024_s1 + $0x1c0c] ss:$20 sps:$4 sm:$0xff]  }
 0x34b   :  { %7985 = vmatpush1.bf16.msra.mxu1 %v14679_v35  ;;  %8128 = vmatpush1.bf16.msra.mxu0 %v14682_v36  ;;  %v14742_v35 = vld [vmem:[%s19024_s1 + $0x1b24] ss:$20 sps:$4 sm:$0xff]  }
 0x34c   :  { %7986 = vmatprep.subr.bf16.mxu1 %v14687_v37  ;;  %8138 = vmatprep.subr.bf16.mxu0 %v14690_v38  ;;  %v14747_v36 = vld [vmem:[%s19024_s1 + $0x1c38] ss:$20 sps:$4 sm:$0xff]   ;;  %v14750_v37 = vld [vmem:[%s19024_s1 + $0x1b50] ss:$20 sps:$4 sm:$0xff]   ;;  %v14745_v38 = vld [vmem:[%s19024_s1 + $0x1c34] ss:$20 sps:$4 sm:$0xff]  }
 0x34e   :  { %8130 = vmatmul.mubr.bf16.vlgmr.msra.gmra.mrb[36].mxu0 %v15349_v5 }
 0x34f   :  { %7987 = vmatpush1.bf16.msra.mxu1 %v14685_v39  ;;  %8139 = vmatpush1.bf16.msra.mxu0 %v14688_v9  ;;  %v14748_v39 = vld [vmem:[%s19024_s1 + $0x1b4c] ss:$20 sps:$4 sm:$0xff]  }
 0x350   :  { %7988 = vmatprep.subr.bf16.mxu1 %v14693_v40  ;;  %8140 = vmatprep.subr.bf16.mxu0 %v14696_v41  ;;  %v14753_v9 = vld [vmem:[%s19024_s1 + $0x1c60] ss:$20 sps:$4 sm:$0xff]   ;;  %v14756_v40 = vld [vmem:[%s19024_s1 + $0x1b78] ss:$20 sps:$4 sm:$0xff]   ;;  %v14751_v41 = vld [vmem:[%s19024_s1 + $0x1c5c] ss:$20 sps:$4 sm:$0xff]  }
 0x351   :  { %8170 = vmatprep.mubr.bf16.mxu0 %v15429_v30 }
 0x353   :  { %7989 = vmatpush1.bf16.msra.mxu1 %v14691_v46  ;;  %8141 = vmatpush1.bf16.msra.mxu0 %v14694_v47  ;;  %v14754_v46 = vld [vmem:[%s19024_s1 + $0x1b74] ss:$20 sps:$4 sm:$0xff]  }
 0x354   :  { %7990 = vmatprep.subr.bf16.mxu1 %v14699_v49  ;;  %8142 = vmatprep.subr.bf16.mxu0 %v14702_v50  ;;  %v14759_v47 = vld [vmem:[%s19024_s1 + $0x1c88] ss:$20 sps:$4 sm:$0xff]   ;;  %v14762_v49 = vld [vmem:[%s19024_s1 + $0x1ba0] ss:$20 sps:$4 sm:$0xff]   ;;  %v14757_v50 = vld [vmem:[%s19024_s1 + $0x1c84] ss:$20 sps:$4 sm:$0xff]  }
 0x357   :  { %7991 = vmatpush1.bf16.msra.mxu1 %v14697_v7  ;;  %8143 = vmatpush1.bf16.msra.mxu0 %v14700_v51  ;;  %v14760_v7 = vld [vmem:[%s19024_s1 + $0x1b9c] ss:$20 sps:$4 sm:$0xff]  }
 0x358   :  { %7992 = vmatprep.subr.bf16.mxu1 %v14705_v52  ;;  %8144 = vmatprep.subr.bf16.mxu0 %v14708_v53  ;;  %v14765_v51 = vld [vmem:[%s19024_s1 + $0x1cb0] ss:$20 sps:$4 sm:$0xff]   ;;  %v14768_v52 = vld [vmem:[%s19024_s1 + $0x1bc8] ss:$20 sps:$4 sm:$0xff]   ;;  %v14763_v53 = vld [vmem:[%s19024_s1 + $0x1cac] ss:$20 sps:$4 sm:$0xff]  }
 0x35b   :  { %7993 = vmatpush1.bf16.msra.mxu1 %v14703_v55  ;;  %8145 = vmatpush1.bf16.msra.mxu0 %v14706_v56  ;;  %v14766_v55 = vld [vmem:[%s19024_s1 + $0x1bc4] ss:$20 sps:$4 sm:$0xff]  }
 0x35c   :  { %7994 = vmatprep.subr.bf16.mxu1 %v14711_v57  ;;  %8146 = vmatprep.subr.bf16.mxu0 %v14714_v58  ;;  %v14771_v56 = vld [vmem:[%s19024_s1 + $0x1cd8] ss:$20 sps:$4 sm:$0xff]   ;;  %v14774_v57 = vld [vmem:[%s19024_s1 + $0x1bf0] ss:$20 sps:$4 sm:$0xff]   ;;  %v14769_v58 = vld [vmem:[%s19024_s1 + $0x1cd4] ss:$20 sps:$4 sm:$0xff]  }
 0x35f   :  { %7995 = vmatpush1.bf16.msra.mxu1 %v14709_v60  ;;  %8147 = vmatpush1.bf16.msra.mxu0 %v14712_v61  ;;  %v14772_v60 = vld [vmem:[%s19024_s1 + $0x1bec] ss:$20 sps:$4 sm:$0xff]  }
 0x360   :  { %7996 = vmatprep.subr.bf16.mxu1 %v14717_v62  ;;  %8148 = vmatprep.subr.bf16.mxu0 %v14720_v63  ;;  %v14777_v61 = vld [vmem:[%s19024_s1 + $0x1d00] ss:$20 sps:$4 sm:$0xff]   ;;  %v14780_v62 = vld [vmem:[%s19024_s1 + $0x1c18] ss:$20 sps:$4 sm:$0xff]   ;;  %v14775_v63 = vld [vmem:[%s19024_s1 + $0x1cfc] ss:$20 sps:$4 sm:$0xff]  }
 0x363   :  { %7997 = vmatpush1.bf16.msra.mxu1 %v14715_v0  ;;  %8149 = vmatpush1.bf16.msra.mxu0 %v14718_v1  ;;  %v14778_v0 = vld [vmem:[%s19024_s1 + $0x1c14] ss:$20 sps:$4 sm:$0xff]  }
 0x364   :  { %7998 = vmatprep.subr.bf16.mxu1 %v14723_v2  ;;  %8150 = vmatprep.subr.bf16.mxu0 %v14726_v3  ;;  %v14783_v1 = vld [vmem:[%s19024_s1 + $0x1d28] ss:$20 sps:$4 sm:$0xff]   ;;  %v14786_v2 = vld [vmem:[%s19024_s1 + $0x1c40] ss:$20 sps:$4 sm:$0xff]   ;;  %v14781_v3 = vld [vmem:[%s19024_s1 + $0x1d24] ss:$20 sps:$4 sm:$0xff]  }
 0x367   :  { %7999 = vmatpush1.bf16.msra.mxu1 %v14721_v6  ;;  %8151 = vmatpush1.bf16.msra.mxu0 %v14724_v8  ;;  %v14784_v6 = vld [vmem:[%s19024_s1 + $0x1c3c] ss:$20 sps:$4 sm:$0xff]  }
 0x368   :  { %8000 = vmatprep.subr.bf16.mxu1 %v14729_v11  ;;  %8152 = vmatprep.subr.bf16.mxu0 %v14732_v19  ;;  %v14789_v8 = vld [vmem:[%s19024_s1 + $0x1d50] ss:$20 sps:$4 sm:$0xff]   ;;  %v14792_v11 = vld [vmem:[%s19024_s1 + $0x1c68] ss:$20 sps:$4 sm:$0xff]   ;;  %v14787_v19 = vld [vmem:[%s19024_s1 + $0x1d4c] ss:$20 sps:$4 sm:$0xff]  }
 0x36b   :  { %8001 = vmatpush1.bf16.msra.mxu1 %v14727_v21  ;;  %8153 = vmatpush1.bf16.msra.mxu0 %v14730_v22  ;;  %v14790_v21 = vld [vmem:[%s19024_s1 + $0x1c64] ss:$20 sps:$4 sm:$0xff]  }
 0x36c   :  { %8002 = vmatprep.subr.bf16.mxu1 %v14735_v13  ;;  %8154 = vmatprep.subr.bf16.mxu0 %v14738_v27  ;;  %v14795_v22 = vld [vmem:[%s19024_s1 + $0x1d78] ss:$20 sps:$4 sm:$0xff]   ;;  %v14798_v13 = vld [vmem:[%s19024_s1 + $0x1c90] ss:$20 sps:$4 sm:$0xff]   ;;  %v18027_v27 = vld [vmem:[%s19024_s1 + $0x1edc] sm:$0xff] }
 0x36f   :  { %8003 = vmatpush1.bf16.msra.mxu1 %v14733_v28  ;;  %8155 = vmatpush1.bf16.msra.mxu0 %v14736_v29  ;;  %v14793_v28 = vld [vmem:[%s19024_s1 + $0x1d74] ss:$20 sps:$4 sm:$0xff]   ;;  %v14796_v29 = vld [vmem:[%s19024_s1 + $0x1c8c] ss:$20 sps:$4 sm:$0xff]  }
 0x370   :  { %8004 = vmatprep.subr.bf16.mxu1 %v14741_v32  ;;  %8156 = vmatprep.subr.bf16.mxu0 %v14744_v33  ;;  %v14801_v32 = vld [vmem:[%s19024_s1 + $0x1da0] ss:$20 sps:$4 sm:$0xff]   ;;  %v14804_v33 = vld [vmem:[%s19024_s1 + $0x1cb8] ss:$20 sps:$4 sm:$0xff]  }
 0x373   :  { %8005 = vmatpush1.bf16.msra.mxu1 %v14739_v34  ;;  %8157 = vmatpush1.bf16.msra.mxu0 %v14742_v35  ;;  %v12335_v34 = vcombine.low %v18027_v27, %v18027_v27  ;;  %v14799_v35 = vld [vmem:[%s19024_s1 + $0x1d9c] ss:$20 sps:$4 sm:$0xff]  }
 0x374   :  { %8015 = vmatprep.subr.bf16.mxu1 %v14747_v36  ;;  %8158 = vmatprep.subr.bf16.mxu0 %v14750_v37  ;;  %v14802_v36 = vld [vmem:[%s19024_s1 + $0x1cb4] ss:$20 sps:$4 sm:$0xff]  }
 0x375   :  { %v14807_v37 = vld [vmem:[%s19024_s1 + $0x1dc8] ss:$20 sps:$4 sm:$0xff]  }
 0x376   :  { %8007 = vmatmul.mubr.bf16.vlgmr.msra.gmra.mrb[36].mxu1 %v15558_v10 }
 0x377   :  { %8016 = vmatpush1.bf16.msra.mxu1 %v14745_v38  ;;  %8159 = vmatpush1.bf16.msra.mxu0 %v14748_v39  ;;  %v14810_v38 = vld [vmem:[%s19024_s1 + $0x1ce0] ss:$20 sps:$4 sm:$0xff]   ;;  %v18057_v39 = vsel %vm1643_vm0, %v12335_v34, 0 }
 0x378   :  { %8017 = vmatprep.subr.bf16.mxu1 %v14753_v9  ;;  %8160 = vmatprep.subr.bf16.mxu0 %v14756_v40  ;;  %v14805_v9 = vld [vmem:[%s19024_s1 + $0x1dc4] ss:$20 sps:$4 sm:$0xff]   ;;  %v14808_v40 = vld [vmem:[%s19024_s1 + $0x1cdc] ss:$20 sps:$4 sm:$0xff]   ;;  %v14860_v34 = vld [vmem:[%s19024_s1 + $0x18ac] ss:$20 sps:$4 sm:$0xff]  }
 0x379   :  { %8047 = vmatprep.mubr.bf16.mxu1 %v15576_v15 }
 0x37b   :  { %8018 = vmatpush1.bf16.msra.mxu1 %v14751_v41  ;;  %8161 = vmatpush1.bf16.msra.mxu0 %v14754_v46  ;;  %v14813_v41 = vld [vmem:[%s19024_s1 + $0x1df0] ss:$20 sps:$4 sm:$0xff]   ;;  %v14816_v46 = vld [vmem:[%s19024_s1 + $0x1d08] ss:$20 sps:$4 sm:$0xff]  }
 0x37c   :  { %8019 = vmatprep.subr.bf16.mxu1 %v14759_v47  ;;  %8162 = vmatprep.subr.bf16.mxu0 %v14762_v49  ;;  %v14811_v47 = vld [vmem:[%s19024_s1 + $0x1dec] ss:$20 sps:$4 sm:$0xff]   ;;  %v14814_v49 = vld [vmem:[%s19024_s1 + $0x1d04] ss:$20 sps:$4 sm:$0xff]  }
 0x37f   :  { %8020 = vmatpush1.bf16.msra.mxu1 %v14757_v50  ;;  %8163 = vmatpush1.bf16.msra.mxu0 %v14760_v7  ;;  %v14819_v50 = vld [vmem:[%s19024_s1 + $0x1e18] ss:$20 sps:$4 sm:$0xff]   ;;  %v14822_v7 = vld [vmem:[%s19024_s1 + $0x1d30] ss:$20 sps:$4 sm:$0xff]  }
 0x380   :  { %8021 = vmatprep.subr.bf16.mxu1 %v14765_v51  ;;  %8164 = vmatprep.subr.bf16.mxu0 %v14768_v52 }
 0x383   :  { %8022 = vmatpush1.bf16.msra.mxu1 %v14763_v53  ;;  %8165 = vmatpush1.bf16.msra.mxu0 %v14766_v55  ;;  %v14817_v53 = vld [vmem:[%s19024_s1 + $0x1e14] ss:$20 sps:$4 sm:$0xff]   ;;  %v14820_v55 = vld [vmem:[%s19024_s1 + $0x1d2c] ss:$20 sps:$4 sm:$0xff]  }
 0x384   :  { %8023 = vmatprep.subr.bf16.mxu1 %v14771_v56  ;;  %8166 = vmatprep.subr.bf16.mxu0 %v14774_v57 }
 0x387   :  { %8024 = vmatpush1.bf16.msra.mxu1 %v14769_v58  ;;  %8167 = vmatpush1.bf16.msra.mxu0 %v14772_v60 }
 0x388   :  { %8025 = vmatprep.subr.bf16.mxu1 %v14777_v61  ;;  %8168 = vmatprep.subr.bf16.mxu0 %v14780_v62  ;;  %v14825_v61 = vld [vmem:[%s19024_s1 + $0x1e40] ss:$20 sps:$4 sm:$0xff]   ;;  %v14828_v62 = vld [vmem:[%s19024_s1 + $0x1d58] ss:$20 sps:$4 sm:$0xff]  }
 0x38b   :  { %8026 = vmatpush1.bf16.msra.mxu1 %v14775_v63  ;;  %8169 = vmatpush1.bf16.msra.mxu0 %v14778_v0  ;;  %v14823_v63 = vld [vmem:[%s19024_s1 + $0x1e3c] ss:$20 sps:$4 sm:$0xff]  }
 0x38c   :  { %8027 = vmatprep.subr.bf16.mxu1 %v14783_v1  ;;  %8179 = vmatprep.subr.bf16.mxu0 %v14786_v2  ;;  %v14840_v0 = vld [vmem:[%s19024_s1 + $0x1da8] ss:$20 sps:$4 sm:$0xff]   ;;  %v14835_v1 = vld [vmem:[%s19024_s1 + $0x1e8c] ss:$20 sps:$4 sm:$0xff]   ;;  %v14838_v2 = vld [vmem:[%s19024_s1 + $0x1da4] ss:$20 sps:$4 sm:$0xff]  }
 0x38e   :  { %8171 = vmatmul.mubr.bf16.vlgmr.msra.gmra.mrb[36].mxu0 %v15558_v10 }
 0x38f   :  { %8028 = vmatpush1.bf16.msra.mxu1 %v14781_v3  ;;  %8180 = vmatpush1.bf16.msra.mxu0 %v14784_v6  ;;  %v14843_v3 = vld [vmem:[%s19024_s1 + $0x1eb8] ss:$20 sps:$4 sm:$0xff]   ;;  %v14846_v6 = vld [vmem:[%s19024_s1 + $0x1dd0] ss:$20 sps:$4 sm:$0xff]  }
 0x390   :  { %8029 = vmatprep.subr.bf16.mxu1 %v14789_v8  ;;  %8181 = vmatprep.subr.bf16.mxu0 %v14792_v11  ;;  %v14841_v8 = vld [vmem:[%s19024_s1 + $0x1eb4] ss:$20 sps:$4 sm:$0xff]   ;;  %v14844_v11 = vld [vmem:[%s19024_s1 + $0x1dcc] ss:$20 sps:$4 sm:$0xff]  }
 0x391   :  { %8211 = vmatprep.mubr.bf16.mxu0 %v15576_v15 }
 0x393   :  { %8030 = vmatpush1.bf16.msra.mxu1 %v14787_v19  ;;  %8182 = vmatpush1.bf16.msra.mxu0 %v14790_v21  ;;  %v14849_v19 = vld [vmem:[%s19024_s1 + $0x1df8] ss:$20 sps:$4 sm:$0xff]   ;;  %v12336_v21 = vcombine.high %v18027_v27, %v18027_v27  ;;  %v14852_v27 = vld [vmem:[%s19024_s1 + $0x1e1c] ss:$20 sps:$4 sm:$0xff]  }
 0x394   :  { %8031 = vmatprep.subr.bf16.mxu1 %v14795_v22  ;;  %8183 = vmatprep.subr.bf16.mxu0 %v14798_v13  ;;  %v14847_v22 = vld [vmem:[%s19024_s1 + $0x1df4] ss:$20 sps:$4 sm:$0xff]  }
 0x395   :  { %v14854_v13 = vld [vmem:[%s19024_s1 + $0x1e20] ss:$20 sps:$4 sm:$0xff]  }
 0x397   :  { %8032 = vmatpush1.bf16.msra.mxu1 %v14793_v28  ;;  %8184 = vmatpush1.bf16.msra.mxu0 %v14796_v29  ;;  %v14855_v28 = vld [vmem:[%s19024_s1 + $0x1884] ss:$20 sps:$4 sm:$0xff]   ;;  %v14858_v29 = vld [vmem:[%s19024_s1 + $0x1e48] ss:$20 sps:$4 sm:$0xff]  }
 0x398   :  { %8033 = vmatprep.subr.bf16.mxu1 %v14801_v32  ;;  %8185 = vmatprep.subr.bf16.mxu0 %v14804_v33  ;;  %v14856_v32 = vld [vmem:[%s19024_s1 + $0x1e44] ss:$20 sps:$4 sm:$0xff]  }
 0x399   :  { %v14859_v33 = vld [vmem:[%s19024_s1 + $0x1744] ss:$20 sps:$4 sm:$0xff]  }
 0x39b   :  { %8034 = vmatpush1.bf16.msra.mxu1 %v14799_v35  ;;  %8186 = vmatpush1.bf16.msra.mxu0 %v14802_v36  ;;  %v14863_v35 = vld [vmem:[%s19024_s1 + $0x1e70] ss:$20 sps:$4 sm:$0xff]  }
 0x39c   :  { %8035 = vmatprep.subr.bf16.mxu1 %v14807_v37  ;;  %8187 = vmatprep.subr.bf16.mxu0 %v14810_v38  ;;  %v14861_v38 = vld [vmem:[%s19024_s1 + $0x1e6c] ss:$20 sps:$4 sm:$0xff]  }
 0x39f   :  { %8036 = vmatpush1.bf16.msra.mxu1 %v14805_v9  ;;  %8188 = vmatpush1.bf16.msra.mxu0 %v14808_v40 }
 0x3a0   :  { %8037 = vmatprep.subr.bf16.mxu1 %v14813_v41  ;;  %8189 = vmatprep.subr.bf16.mxu0 %v14816_v46  ;;  %v18202_v41 = vld [vmem:[%s19025_s0 + $0x18] ss:$0 sps:$4 sm:$0xff]   ;;  %v14865_v46 = vld [vmem:[%s19024_s1 + $0x18d4] ss:$20 sps:$4 sm:$0xff]  }
 0x3a1   :  { %v5997_v51 = vpop.f32.mrb[24].mxu0  ;;  %v6161_v52 = vpop.f32.mrb[24].mxu1 }
 0x3a2   :  { %v18092_v56 = vmax.f32 %v4235_v43, %v5997_v51  ;;  %v18097_v57 = vmax.f32 %v4237_v16, %v6161_v52  ;;  %v5999_v58 = vpop.f32.mrb[25].mxu0  ;;  %v6163_v60 = vpop.f32.mrb[25].mxu1  ;;  %v12088_v52 = vld [vmem:[%s19024_s1 + $0x1ee4] sm:$0xff] }
 0x3a3   :  { %v18108_v23 = vmax.f32 %v4236_v45, %v5999_v58  ;;  %v18113_v24 = vmax.f32 %v4238_v18, %v6163_v60  ;;  %8038 = vmatpush1.bf16.msra.mxu1 %v14811_v47  ;;  %8190 = vmatpush1.bf16.msra.mxu0 %v14814_v49  ;;  %v6001_v42 = vpop.f32.mrb[26].mxu0  ;;  %v6165_v43 = vpop.f32.mrb[26].mxu1  ;;  %v14829_v45 = vld [vmem:[%s19024_s1 + $0x1e64] ss:$20 sps:$4 sm:$0xff]   ;;  %v14866_v60 = vld [vmem:[%s19024_s1 + $0x1e94] ss:$20 sps:$4 sm:$0xff]  }
 0x3a4   :  { %v6002_v12 = vpop.f32.mrb[27].mxu0  ;;  %v6166_v16 = vpop.f32.mrb[27].mxu1  ;;  %8039 = vmatprep.subr.bf16.mxu1 %v14819_v50  ;;  %8191 = vmatprep.subr.bf16.mxu0 %v14822_v7  ;;  %v14837_v18 = vld [vmem:[%s19024_s1 + $0x1e90] ss:$20 sps:$4 sm:$0xff]   ;;  %v14868_v47 = vld [vmem:[%s19024_s1 + $0x1e98] ss:$20 sps:$4 sm:$0xff]   ;;  %v12337_v43 = vcombine.low %v12088_v52, %v12088_v52 }
 0x3a5   :  { %v14874_v42 = vld [vmem:[%s19024_s1 + $0x1ec0] ss:$20 sps:$4 sm:$0xff]   ;;  %v14871_v16 = vld [vmem:[%s19024_s1 + $0x17bc] ss:$20 sps:$4 sm:$0xff]  }
 0x3a7   :  { %8040 = vmatpush1.bf16.msra.mxu1 %v14817_v53  ;;  %8192 = vmatpush1.bf16.msra.mxu0 %v14820_v55 }
 0x3a8   :  { %8041 = vmatprep.subr.bf16.mxu1 %v14825_v61  ;;  %8193 = vmatprep.subr.bf16.mxu0 %v14828_v62  ;;  %v14869_v61 = vld [vmem:[%s19024_s1 + $0x1794] ss:$20 sps:$4 sm:$0xff]   ;;  %v14870_v62 = vld [vmem:[%s19024_s1 + $0x18fc] ss:$20 sps:$4 sm:$0xff]  }
 0x3ab   :  { %8042 = vmatpush1.bf16.msra.mxu1 %v14823_v63  ;;  %8194 = vmatpush1.bf16.msra.mxu0 %v14826_v25  ;;  %v14875_v25 = vld [vmem:[%s19024_s1 + $0x1924] ss:$20 sps:$4 sm:$0xff]  }
 0x3ac   :  { %8043 = vmatprep.subr.bf16.mxu1 %v14831_v26  ;;  %8195 = vmatprep.subr.bf16.mxu0 %v14834_v44 }
 0x3af   :  { %8044 = vmatpush1.bf16.msra.mxu1 %v14829_v45  ;;  %8196 = vmatpush1.bf16.msra.mxu0 %v14832_v17  ;;  %v12338_v45 = vcombine.high %v12088_v52, %v12088_v52  ;;  %v7925_v17 = vsel %vm1643_vm0, %v12337_v43, 0  ;;  %v14905_v52 = vld [vmem:[%s19024_s1 + $0x1bf4] ss:$20 sps:$4 sm:$0xff]   ;;  %v14915_v43 = vld [vmem:[%s19024_s1 + $0x1e9c] ss:$20 sps:$4 sm:$0xff]  }
 0x3b0   :  { %8045 = vmatprep.subr.bf16.mxu1 %v14837_v18  ;;  %8197 = vmatprep.subr.bf16.mxu0 %v14840_v0  ;;  %v14876_v18 = vld [vmem:[%s19024_s1 + $0x17e4] ss:$20 sps:$4 sm:$0xff]   ;;  %v14878_v0 = vld [vmem:[%s19024_s1 + $0x194c] ss:$20 sps:$4 sm:$0xff]  }
 0x3b3   :  { %8046 = vmatpush1.bf16.msra.mxu1 %v14835_v1  ;;  %8198 = vmatpush1.bf16.msra.mxu0 %v14838_v2  ;;  %v14882_v1 = vld [vmem:[%s19024_s1 + $0x1b04] ss:$20 sps:$4 sm:$0xff]   ;;  %v14880_v2 = vld [vmem:[%s19024_s1 + $0x180c] ss:$20 sps:$4 sm:$0xff]  }
 0x3b4   :  { %8056 = vmatprep.subr.bf16.mxu1 %v14843_v3  ;;  %8199 = vmatprep.subr.bf16.mxu0 %v14846_v6  ;;  %v14881_v3 = vld [vmem:[%s19024_s1 + $0x1974] ss:$20 sps:$4 sm:$0xff]  }
 0x3b5   :  { %v14883_v6 = vld [vmem:[%s19024_s1 + $0x1834] ss:$20 sps:$4 sm:$0xff]  }
 0x3b6   :  { %8048 = vmatmul.mubr.bf16.vlgmr.msra.gmra.mrb[36].mxu1 %v15770_v20 }
 0x3b7   :  { %8057 = vmatpush1.bf16.msra.mxu1 %v14841_v8  ;;  %8200 = vmatpush1.bf16.msra.mxu0 %v14844_v11  ;;  %v14884_v8 = vld [vmem:[%s19024_s1 + $0x19c4] ss:$20 sps:$4 sm:$0xff]   ;;  %v14886_v11 = vld [vmem:[%s19024_s1 + $0x1b2c] ss:$20 sps:$4 sm:$0xff]  }
 0x3b8   :  { %8201 = vmatprep.subr.bf16.mxu0 %v14849_v19  ;;  %12340 = vmatprep.subr.msk.bf16.mxu1 %vm1643_vm0, %v12336_v21  ;;  %v14887_v19 = vld [vmem:[%s19024_s1 + $0x185c] ss:$20 sps:$4 sm:$0xff]   ;;  %v14888_v21 = vld [vmem:[%s19024_s1 + $0x19ec] ss:$20 sps:$4 sm:$0xff]  }
 0x3b9   :  { %8088 = vmatprep.mubr.bf16.mxu1 %v15098_v31 }
 0x3bb   :  { %8202 = vmatpush1.bf16.msra.mxu0 %v14847_v22  ;;  %8059 = vmatpush1.bf16.msra.mxu1 %v18057_v39  ;;  %v14864_v39 = vld [vmem:[%s19024_s1 + $0x176c] ss:$20 sps:$4 sm:$0xff]   ;;  %v14889_v22 = vld [vmem:[%s19024_s1 + $0x1b54] ss:$20 sps:$4 sm:$0xff]  }
 0x3bc   :  { %8203 = vmatprep.subr.bf16.mxu0 %v14854_v13  ;;  %12970 = vmatprep.subr.bf16.mxu1 %v14855_v28  ;;  %v14890_v13 = vld [vmem:[%s19024_s1 + $0x1d84] ss:$20 sps:$4 sm:$0xff]   ;;  %v14891_v28 = vld [vmem:[%s19024_s1 + $0x1a14] ss:$20 sps:$4 sm:$0xff]  }
 0x3bf   :  { %8204 = vmatpush1.bf16.msra.mxu0 %v14852_v27  ;;  %v14892_v27 = vld [vmem:[%s19024_s1 + $0x1c44] ss:$20 sps:$4 sm:$0xff]  }
 0x3c0   :  { %8205 = vmatprep.subr.bf16.mxu0 %v14858_v29  ;;  %v14893_v29 = vld [vmem:[%s19024_s1 + $0x1b7c] ss:$20 sps:$4 sm:$0xff]  }
 0x3c1   :  { %v12917_v36 = vpop.f32.mrb[28].mxu0  ;;  %v12939_v37 = vpop.f32.mrb[28].mxu1 }
 0x3c2   :  { %v12918_v9 = vpop.f32.mrb[29].mxu0  ;;  %v12940_v40 = vpop.f32.mrb[29].mxu1  ;;  %12341 = vmatmul.mubr.msk.bf16.vlgmr.msra.gmra.mrb[36].mxu1 %vm1639_vm1, %v18202_v41 }
 0x3c3   :  { %v12919_v49 = vadd.f32 %v12918_v9, %v12917_v36  ;;  %v12941_v50 = vadd.f32 %v12940_v40, %v12939_v37  ;;  %12971 = vmatpush3.bf16.msra.mxu1 %v14859_v33  ;;  %v12942_v7 = vpop.f32.mrb[30].mxu1  ;;  %8206 = vmatpush1.bf16.msra.mxu0 %v14856_v32  ;;  %v12920_v51 = vpop.f32.mrb[30].mxu0  ;;  %v14894_v32 = vld [vmem:[%s19024_s1 + $0x1dac] ss:$20 sps:$4 sm:$0xff]   ;;  %v14897_v36 = vld [vmem:[%s19024_s1 + $0x1ba4] ss:$20 sps:$4 sm:$0xff]  }
 0x3c4   :  { %v12943_v53 = vpop.f32.mrb[31].mxu1  ;;  %12972 = vmatprep.subr.bf16.mxu1 %v14860_v34  ;;  %8207 = vmatprep.subr.bf16.mxu0 %v14863_v35  ;;  %v12921_v55 = vpop.f32.mrb[31].mxu0  ;;  %v14895_v34 = vld [vmem:[%s19024_s1 + $0x1a3c] ss:$20 sps:$4 sm:$0xff]   ;;  %v14898_v37 = vld [vmem:[%s19024_s1 + $0x1dd4] ss:$20 sps:$4 sm:$0xff]  }
 0x3c5   :  { %v18215_v58 = vadd.f32 %v12941_v50, %v12919_v49  ;;  %8293 = vmatprep.mubr.bf16.mxu1 %v15285_v48  ;;  %v14872_v48 = vld [vmem:[%s19024_s1 + $0x1ebc] ss:$20 sps:$4 sm:$0xff]   ;;  %v14903_v7 = vld [vmem:[%s19024_s1 + $0x1a8c] ss:$20 sps:$4 sm:$0xff]   ;;  %v14906_v53 = vld [vmem:[%s19024_s1 + $0x1e24] ss:$20 sps:$4 sm:$0xff]  }
 0x3c6   :  { %v14902_v49 = vld [vmem:[%s19024_s1 + $0x1dfc] ss:$20 sps:$4 sm:$0xff]   ;;  %v14907_v55 = vld [vmem:[%s19024_s1 + $0x1ab4] ss:$20 sps:$4 sm:$0xff]  }
 0x3c7   :  { %12973 = vmatpush3.bf16.msra.mxu1 %v14864_v39  ;;  %8208 = vmatpush1.bf16.msra.mxu0 %v14861_v38 }
 0x3c8   :  { %12974 = vmatprep.subr.bf16.mxu1 %v14865_v46  ;;  %8209 = vmatprep.subr.bf16.mxu0 %v14868_v47  ;;  %v14900_v46 = vld [vmem:[%s19024_s1 + $0x1c94] ss:$20 sps:$4 sm:$0xff]   ;;  %v14901_v47 = vld [vmem:[%s19024_s1 + $0x1bcc] ss:$20 sps:$4 sm:$0xff]  }
 0x3c9   :  { %v18230_v12 = vpop.f32.mrb[32].mxu1 }
 0x3ca   :  { %v13291_v63 = vpop.f32.mrb[33].mxu1 }
 0x3cb   :  { %12975 = vmatpush3.bf16.msra.mxu1 %v14869_v61  ;;  %v6325_v26 = vpop.f32.mrb[34].mxu1  ;;  %8210 = vmatpush1.bf16.msra.mxu0 %v14866_v60  ;;  %v14912_v60 = vld [vmem:[%s19024_s1 + $0x1d0c] ss:$20 sps:$4 sm:$0xff]   ;;  %v14913_v61 = vld [vmem:[%s19024_s1 + $0x1e74] ss:$20 sps:$4 sm:$0xff]  }
 0x3cc   :  { %v13292_v44 = vpop.f32.mrb[35].mxu1  ;;  %12976 = vmatprep.subr.bf16.mxu1 %v14870_v62  ;;  %8220 = vmatprep.subr.bf16.mxu0 %v14874_v42  ;;  %v14914_v62 = vld [vmem:[%s19024_s1 + $0x1d34] ss:$20 sps:$4 sm:$0xff]   ;;  %v14916_v42 = vld [vmem:[%s19024_s1 + $0x1ec4] ss:$20 sps:$4 sm:$0xff]  }
 0x3cd   :  { %v14919_v63 = vld [vmem:[%s19026_s2 + $0x40] sm:$0xff]   ;;  %v14921_v44 = vld [vmem:[%s19026_s2 + $0x48] sm:$0xff]  }
 0x3ce   :  { %8212 = vmatmul.mubr.bf16.vlgmr.msra.gmra.mrb[36].mxu0 %v15770_v20  ;;  %v14933_v26 = vld [vmem:[%s19026_s2 + $0x80] sm:$0xff]  }
 0x3cf   :  { %12977 = vmatpush3.bf16.msra.mxu1 %v14871_v16  ;;  %8221 = vmatpush1.bf16.msra.mxu0 %v14872_v48  ;;  %v14917_v16 = vld [vmem:[%s19024_s1 + $0x1d5c] ss:$20 sps:$4 sm:$0xff]  }
 0x3d0   :  { %12978 = vmatprep.subr.bf16.mxu1 %v14875_v25  ;;  %12342 = vmatprep.subr.msk.bf16.mxu0 %vm1643_vm0, %v12338_v45  ;;  %v14931_v25 = vld [vmem:[%s19026_s2 + $0xc0] sm:$0xff]   ;;  %v14922_v45 = vld [vmem:[%s19026_s2 + $0x8] sm:$0xff]  }
 0x3d1   :  { %8252 = vmatprep.mubr.bf16.mxu0 %v15098_v31  ;;  %v14885_v31 = vld [vmem:[%s19024_s1 + $0x199c] ss:$20 sps:$4 sm:$0xff]  }
 0x3d3   :  { %12979 = vmatpush3.bf16.msra.mxu1 %v14876_v18  ;;  %8223 = vmatpush1.bf16.msra.mxu0 %v7925_v17  ;;  %v14923_v17 = vld [vmem:[%s19026_s2 + $0x50] sm:$0xff]  }
 0x3d4   :  { %12980 = vmatprep.subr.bf16.mxu1 %v14878_v0  ;;  %12992 = vmatprep.subr.bf16.mxu0 %v14882_v1  ;;  %v14924_v18 = vld [vmem:[%s19026_s2 + $0x10] sm:$0xff]   ;;  %v14927_v0 = vld [vmem:[%s19026_s2 + $0x60] sm:$0xff]  }
 0x3d5   :  { %v14928_v1 = vld [vmem:[%s19026_s2 + $0x20] sm:$0xff]  }
 0x3d7   :  { %12981 = vmatpush3.bf16.msra.mxu1 %v14880_v2  ;;  %v14929_v2 = vld [vmem:[%s19026_s2 + $0x68] sm:$0xff]  }
 0x3d8   :  { %12982 = vmatprep.subr.bf16.mxu1 %v14881_v3  ;;  %v14930_v3 = vld [vmem:[%s19026_s2 + $0x28] sm:$0xff]  }
 0x3da   :  { %12343 = vmatmul.mubr.msk.bf16.vlgmr.msra.gmra.mrb[36].mxu0 %vm1639_vm1, %v18202_v41 }
 0x3db   :  { %12983 = vmatpush3.bf16.msra.mxu1 %v14883_v6  ;;  %12993 = vmatpush3.bf16.msra.mxu0 %v14884_v8  ;;  %v14932_v6 = vld [vmem:[%s19026_s2 + $0x70] sm:$0xff]   ;;  %v14935_v8 = vld [vmem:[%s19026_s2 + $0xc8] sm:$0xff]  }
 0x3dc   :  { %12984 = vmatprep.subr.bf16.mxu1 %v14885_v31  ;;  %12994 = vmatprep.subr.bf16.mxu0 %v14886_v11  ;;  %v14934_v31 = vld [vmem:[%s19026_s2 + $0x30] sm:$0xff]   ;;  %v14937_v11 = vld [vmem:[%s19026_s2 + $0x88] sm:$0xff]  }
 0x3dd   :  { %8333 = vmatprep.mubr.bf16.mxu0 %v15429_v30  ;;  %v14896_v30 = vld [vmem:[%s19024_s1 + $0x1c6c] ss:$20 sps:$4 sm:$0xff]  }
 0x3df   :  { %12985 = vmatpush3.bf16.msra.mxu1 %v14887_v19  ;;  %12995 = vmatpush3.bf16.msra.mxu0 %v14888_v21  ;;  %v14936_v19 = vld [vmem:[%s19026_s2 + $0x78] sm:$0xff]   ;;  %v14939_v21 = vld [vmem:[%s19026_s2 + $0xd0] sm:$0xff]  }
 0x3e0   :  { %12996 = vmatprep.subr.bf16.mxu0 %v14889_v22  ;;  %13014 = vmatprep.subr.bf16.mxu1 %v14890_v13  ;;  %v14938_v22 = vld [vmem:[%s19026_s2 + $0x38] sm:$0xff]   ;;  %v14940_v13 = vld [vmem:[%s19026_s2 + $0x90] sm:$0xff]  }
 0x3e1   :  { %v12961_v33 = vpop.f32.mrb[32].mxu0 }
 0x3e2   :  { %8294 = vmatmul.mubr.bf16.vlgmr.msra.gmra.mrb[40].mxu1 %v15349_v5  ;;  %v12962_v35 = vpop.f32.mrb[33].mxu0  ;;  %v14899_v5 = vld [vmem:[%s19024_s1 + $0x1a64] ss:$20 sps:$4 sm:$0xff]  }
 0x3e3   :  { %v12963_v38 = vadd.f32 %v12962_v35, %v12961_v33  ;;  %12997 = vmatpush3.bf16.msra.mxu0 %v14891_v28  ;;  %13015 = vmatpush3.bf16.msra.mxu1 %v14892_v27  ;;  %v12964_v39 = vpop.f32.mrb[34].mxu0  ;;  %v14941_v28 = vld [vmem:[%s19026_s2 + $0xd8] sm:$0xff]   ;;  %v14945_v33 = vld [vmem:[%s19026_s2 + $0xe8] sm:$0xff]   ;;  %v14948_v35 = vld [vmem:[%s19026_s2 + $0xb0] sm:$0xff]  }
 0x3e4   :  { %12998 = vmatprep.subr.bf16.mxu0 %v14893_v29  ;;  %13016 = vmatprep.subr.bf16.mxu1 %v14894_v32  ;;  %v12965_v9 = vpop.f32.mrb[35].mxu0  ;;  %v14942_v27 = vld [vmem:[%s19026_s2 + $0x98] sm:$0xff]   ;;  %v14943_v29 = vld [vmem:[%s19026_s2 + $0xe0] sm:$0xff]  }
 0x3e5   :  { %v6283_v40 = vadd.f32 %v12963_v38, %v18215_v58  ;;  %8373 = vmatprep.mubr.bf16.mxu1 %v15576_v15  ;;  %v14904_v15 = vld [vmem:[%s19024_s1 + $0x1cbc] ss:$20 sps:$4 sm:$0xff]   ;;  %v14944_v32 = vld [vmem:[%s19026_s2 + $0xa0] sm:$0xff]  }
 0x3e6   :  { %v14911_v58 = vld [vmem:[%s19024_s1 + $0x1adc] ss:$20 sps:$4 sm:$0xff]   ;;  %v14951_v38 = vld [vmem:[%s19026_s2 + $0x180] sm:$0xff]  }
 0x3e7   :  { %v6323_v50 = vadd.f32 %v18230_v12, %v6283_v40  ;;  %12999 = vmatpush3.bf16.msra.mxu0 %v14895_v34  ;;  %13017 = vmatpush3.bf16.msra.mxu1 %v14896_v30  ;;  %v14918_v12 = vld [vmem:[%s19024_s1 + $0x1eec] ss:$0 sps:$4 sm:$0xff]   ;;  %v14947_v30 = vld [vmem:[%s19026_s2 + $0xf0] sm:$0xff]  }
 0x3e8   :  { %13000 = vmatprep.subr.bf16.mxu0 %v14897_v36  ;;  %13018 = vmatprep.subr.bf16.mxu1 %v14898_v37  ;;  %v7931_v48 = vsel %vm1643_vm0, %v14918_v12, 0  ;;  %v14946_v34 = vld [vmem:[%s19026_s2 + $0xa8] sm:$0xff]   ;;  %v14949_v36 = vld [vmem:[%s19026_s2 + $0xf8] sm:$0xff]  }
 0x3e9   :  { %v18336_v51 = vmax.f32 %v4239_v59, %v6323_v50  ;;  %v14910_v59 = vld [vmem:[%s19024_s1 + $0x1e4c] ss:$20 sps:$4 sm:$0xff]   ;;  %v14950_v37 = vld [vmem:[%s19026_s2 + $0xb8] sm:$0xff]  }
 0x3ea   :  { %v14958_v50 = vld [vmem:[%s19026_s2 + $0x100] sm:$0xff]   ;;  %v14954_v12 = vld [vmem:[%s19026_s2 + $0x148] sm:$0xff]  }
 0x3eb   :  { %13001 = vmatpush3.bf16.msra.mxu0 %v14899_v5  ;;  %13019 = vmatpush3.bf16.msra.mxu1 %v14900_v46 }
 0x3ec   :  { %13002 = vmatprep.subr.bf16.mxu0 %v14901_v47  ;;  %13020 = vmatprep.subr.bf16.mxu1 %v14902_v49 }
 0x3ef   :  { %13003 = vmatpush3.bf16.msra.mxu0 %v14903_v7  ;;  %13021 = vmatpush3.bf16.msra.mxu1 %v14904_v15  ;;  %v14967_v15 = vld [vmem:[%s19026_s2 + $0x118] sm:$0xff]  }
 0x3f0   :  { %13004 = vmatprep.subr.bf16.mxu0 %v14905_v52  ;;  %13022 = vmatprep.subr.bf16.mxu1 %v14906_v53  ;;  %v14970_v52 = vld [vmem:[%s19026_s2 + $0x120] sm:$0xff]  }
 0x3f3   :  { %13005 = vmatpush3.bf16.msra.mxu0 %v14907_v55  ;;  %13023 = vmatpush3.bf16.msra.mxu1 %v14908_v14  ;;  %v14972_v55 = vld [vmem:[%s19026_s2 + $0x128] sm:$0xff]  }
 0x3f4   :  { %13006 = vmatprep.subr.bf16.mxu0 %v14909_v54  ;;  %13024 = vmatprep.subr.bf16.mxu1 %v14910_v59 }
 0x3f7   :  { %13007 = vmatpush3.bf16.msra.mxu0 %v14911_v58  ;;  %13025 = vmatpush3.bf16.msra.mxu1 %v14912_v60 }
 0x3f8   :  { %13026 = vmatprep.subr.bf16.mxu1 %v14913_v61  ;;  %13293 = vmatprep.subr.bf16.mxu0 %v15099_v4 }
 0x3fa   :  { %8334 = vmatmul.mubr.bf16.vlgmr.msra.gmra.mrb[40].mxu0 %v15558_v10  ;;  %v14920_v10 = vld [vmem:[%s19026_s2] sm:$0xff]  }
 0x3fb   :  { %13027 = vmatpush3.bf16.msra.mxu1 %v14914_v62  ;;  %13294 = vmatpush3.bf16.msra.mxu0 %v14916_v42  ;;  %v14952_v62 = vld [vmem:[%s19026_s2 + $0x140] sm:$0xff]  }
 0x3fc   :  { %13028 = vmatprep.subr.bf16.mxu1 %v14915_v43  ;;  %13295 = vmatprep.subr.bf16.mxu0 %v15099_v4 }
 0x3fd   :  { %13297 = vmatprep.mubr.msk.bf16.mxu0 %vm15100_vm2, %v15099_v4 }
 0x3ff   :  { %13029 = vmatpush3.bf16.msra.mxu1 %v14917_v16  ;;  %13296 = vmatpush3.bf16.msra.mxu0 %v7931_v48  ;;  %v14955_v48 = vld [vmem:[%s19026_s2 + $0x190] sm:$0xff]  }
 0x400   :  { %13039 = vmatprep.subr.bf16.mxu0 %v14919_v63  ;;  %13061 = vmatprep.subr.bf16.mxu1 %v14931_v25  ;;  %v14976_v63 = vld [vmem:[%s19026_s2 + $0x138] sm:$0xff]  }
 0x402   :  { %8374 = vmatmul.mubr.bf16.vlgmr.msra.gmra.mrb[44].mxu1 %v15770_v20  ;;  %13298 = vmatmul.mubr.msk.bf16.vlgmr.msra.gmra.mrb[44].mxu0 %vm1639_vm1, %v18202_v41  ;;  %v14925_v20 = vld [vmem:[%s19026_s2 + $0x58] sm:$0xff]  }
 0x403   :  { %13040 = vmatpush3.bf16.msra.mxu0 %v14920_v10  ;;  %13062 = vmatpush3.bf16.msra.mxu1 %v14933_v26  ;;  %v14926_v41 = vld [vmem:[%s19026_s2 + $0x18] sm:$0xff]   ;;  %v14978_v26 = vld [vmem:[%s19026_s2 + $0x200] sm:$0xff]  }
 0x404   :  { %13041 = vmatprep.subr.bf16.mxu0 %v14921_v44  ;;  %13063 = vmatprep.subr.bf16.mxu1 %v14935_v8 }
 0x407   :  { %13042 = vmatpush3.bf16.msra.mxu0 %v14922_v45  ;;  %13064 = vmatpush3.bf16.msra.mxu1 %v14937_v11  ;;  %v14956_v45 = vld [vmem:[%s19026_s2 + $0x150] sm:$0xff]  }
 0x408   :  { %13043 = vmatprep.subr.bf16.mxu0 %v14923_v17  ;;  %13065 = vmatprep.subr.bf16.mxu1 %v14939_v21  ;;  %v14957_v17 = vld [vmem:[%s19026_s2 + $0x198] sm:$0xff]  }
 0x40b   :  { %13044 = vmatpush3.bf16.msra.mxu0 %v14924_v18  ;;  %13066 = vmatpush3.bf16.msra.mxu1 %v14940_v13  ;;  %v14959_v18 = vld [vmem:[%s19026_s2 + $0x158] sm:$0xff]  }
 0x40c   :  { %13045 = vmatprep.subr.bf16.mxu0 %v14925_v20  ;;  %13067 = vmatprep.subr.bf16.mxu1 %v14941_v28  ;;  %v14960_v20 = vld [vmem:[%s19026_s2 + $0x1a0] sm:$0xff]  }
 0x40d   :  { %v14973_v28 = vld [vmem:[%s19026_s2 + $0x240] sm:$0xff]  }
 0x40f   :  { %13046 = vmatpush3.bf16.msra.mxu0 %v14926_v41  ;;  %13068 = vmatpush3.bf16.msra.mxu1 %v14942_v27  ;;  %v14962_v41 = vld [vmem:[%s19026_s2 + $0x160] sm:$0xff]  }
 0x410   :  { %13047 = vmatprep.subr.bf16.mxu0 %v14927_v0  ;;  %13069 = vmatprep.subr.bf16.mxu1 %v14943_v29  ;;  %v14963_v0 = vld [vmem:[%s19026_s2 + $0x1a8] sm:$0xff]  }
 0x413   :  { %13048 = vmatpush3.bf16.msra.mxu0 %v14928_v1  ;;  %13070 = vmatpush3.bf16.msra.mxu1 %v14944_v32  ;;  %v14965_v1 = vld [vmem:[%s19026_s2 + $0x168] sm:$0xff]  }
 0x414   :  { %13049 = vmatprep.subr.bf16.mxu0 %v14929_v2  ;;  %13071 = vmatprep.subr.bf16.mxu1 %v14945_v33  ;;  %v14966_v2 = vld [vmem:[%s19026_s2 + $0x1b0] sm:$0xff]   ;;  %v14975_v32 = vld [vmem:[%s19026_s2 + $0x248] sm:$0xff]  }
 0x417   :  { %13050 = vmatpush3.bf16.msra.mxu0 %v14930_v3  ;;  %13072 = vmatpush3.bf16.msra.mxu1 %v14946_v34  ;;  %v14968_v3 = vld [vmem:[%s19026_s2 + $0x170] sm:$0xff]  }
 0x418   :  { %13051 = vmatprep.subr.bf16.mxu0 %v14932_v6  ;;  %13073 = vmatprep.subr.bf16.mxu1 %v14947_v30  ;;  %v14969_v6 = vld [vmem:[%s19026_s2 + $0x1b8] sm:$0xff]  }
 0x41b   :  { %13052 = vmatpush3.bf16.msra.mxu0 %v14934_v31  ;;  %13074 = vmatpush3.bf16.msra.mxu1 %v14948_v35  ;;  %v14971_v31 = vld [vmem:[%s19026_s2 + $0x178] sm:$0xff]  }
 0x41c   :  { %13053 = vmatprep.subr.bf16.mxu0 %v14936_v19  ;;  %13075 = vmatprep.subr.bf16.mxu1 %v14949_v36 }
 0x41f   :  { %13054 = vmatpush3.bf16.msra.mxu0 %v14938_v22  ;;  %13076 = vmatpush3.bf16.msra.mxu1 %v14950_v37 }
 0x420   :  { %13301 = vmatprep.subr.bf16.mxu0 %v15099_v4  ;;  %13092 = vmatprep.subr.bf16.mxu1 %v14951_v38 }
 0x495   :  { %v8090_v39 = vpop.f32.mrb[36].mxu1 }
 0x496   :  { %v8421_v9 = vmax.f32 %v18092_v56, %v8090_v39  ;;  %v8092_v40 = vpop.f32.mrb[37].mxu1  ;;  %v14961_v56 = vld [vmem:[%s19026_s2 + $0x108] sm:$0xff]  }
 0x497   :  { %v8422_v5 = vmax.f32 %v18108_v23, %v8092_v40  ;;  %v8094_v46 = vpop.f32.mrb[38].mxu1  ;;  %v14964_v23 = vld [vmem:[%s19026_s2 + $0x110] sm:$0xff]  }
 0x498   :  { %v8095_v47 = vpop.f32.mrb[39].mxu1  ;;  %v18496_v7 = vpack.c.bf16 %v8421_v9, %v8421_v9  ;;  %v14977_v9 = vld [vmem:[%s19026_s2 + $0x250] sm:$0xff]   ;;  %v14980_v46 = vld [vmem:[%s19026_s2 + $0x258] sm:$0xff]  }
 0x499   :  { %v18491_v49 = vpack.c.bf16 %v8422_v5, %v8422_v5  ;;  %v14979_v47 = vld [vmem:[%s19026_s2 + $0x1c0] sm:$0xff]  }
 0x49b   :  { %8783 = vmatprep.mubr.bf16.mxu0 %v18491_v49 }
 0x49c   :  { %8784 = vmatmul.mubr.bf16.vlgmr.msra.gmra.mrb[48].mxu0 %v18496_v7 }
 0x49d   :  { %13302 = vmatpush3.bf16.msra.mxu0 %v14958_v50  ;;  %13317 = vmatprep.mubr.msk.bf16.mxu0 %vm15100_vm2, %v15099_v4 }
 0x49e   :  { %13303 = vmatprep.subr.bf16.mxu0 %v15099_v4 }
 0x4a1   :  { %13304 = vmatpush3.bf16.msra.mxu0 %v14961_v56  ;;  %v14981_v56 = vld [vmem:[%s19026_s2 + $0x208] sm:$0xff]  }
 0x4a2   :  { %13305 = vmatprep.subr.bf16.mxu0 %v15099_v4 }
 0x4a5   :  { %13306 = vmatpush3.bf16.msra.mxu0 %v14964_v23  ;;  %v14982_v23 = vld [vmem:[%s19026_s2 + $0x1c8] sm:$0xff]  }
 0x4a6   :  { %13307 = vmatprep.subr.bf16.mxu0 %v15099_v4 }
 0x4a9   :  { %13308 = vmatpush3.bf16.msra.mxu0 %v14967_v15  ;;  %v14984_v15 = vld [vmem:[%s19026_s2 + $0x210] sm:$0xff]  }
 0x4aa   :  { %13309 = vmatprep.subr.bf16.mxu0 %v15099_v4 }
 0x4ad   :  { %v8254_v53 = vpop.f32.mrb[36].mxu0  ;;  %13310 = vmatpush3.bf16.msra.mxu0 %v14970_v52  ;;  %v14986_v52 = vld [vmem:[%s19026_s2 + $0x268] sm:$0xff]  }
 0x4ae   :  { %v8423_v14 = vmax.f32 %v18097_v57, %v8254_v53  ;;  %v8256_v54 = vpop.f32.mrb[37].mxu0  ;;  %13311 = vmatprep.subr.bf16.mxu0 %v15099_v4  ;;  %v14953_v57 = vld [vmem:[%s19026_s2 + $0x188] sm:$0xff]   ;;  %v14985_v53 = vld [vmem:[%s19026_s2 + $0x1d0] sm:$0xff]  }
 0x4af   :  { %v8424_v59 = vmax.f32 %v18113_v24, %v8256_v54  ;;  %v8258_v58 = vpop.f32.mrb[38].mxu0  ;;  %v14974_v24 = vld [vmem:[%s19026_s2 + $0x130] sm:$0xff]   ;;  %v14988_v54 = vld [vmem:[%s19026_s2 + $0x1d8] sm:$0xff]  }
 0x4b0   :  { %v8259_v60 = vpop.f32.mrb[39].mxu0  ;;  %v18529_v42 = vpack.c.bf16 %v8423_v14, %v8423_v14  ;;  %v14989_v14 = vld [vmem:[%s19026_s2 + $0x270] sm:$0xff]   ;;  %v14992_v58 = vld [vmem:[%s19026_s2 + $0x278] sm:$0xff]  }
 0x4b1   :  { %v18524_v61 = vpack.c.bf16 %v8424_v59, %v8424_v59  ;;  %13312 = vmatpush3.bf16.msra.mxu0 %v14972_v55  ;;  %v14987_v55 = vld [vmem:[%s19026_s2 + $0x218] sm:$0xff]   ;;  %v14990_v59 = vld [vmem:[%s19026_s2 + $0x220] sm:$0xff]  }
 0x4b2   :  { %13313 = vmatprep.subr.bf16.mxu0 %v15099_v4  ;;  %v14991_v60 = vld [vmem:[%s19026_s2 + $0x1e0] sm:$0xff]  }
 0x4b3   :  { %8823 = vmatprep.mubr.bf16.mxu1 %v18524_v61 }
 0x4b4   :  { %8824 = vmatmul.mubr.bf16.vlgmr.msra.gmra.mrb[48].mxu1 %v18529_v42 }
 0x4b5   :  { %v12986_v43 = vpop.f32.mrb[40].mxu1  ;;  %13093 = vmatpush3.bf16.msra.mxu1 %v14952_v62  ;;  %9224 = vmatprep.mubr.bf16.mxu1 %v18491_v49  ;;  %v14994_v62 = vld [vmem:[%s19026_s2 + $0x340] sm:$0xff]  }
 0x4b6   :  { %v12987_v16 = vpop.f32.mrb[41].mxu1  ;;  %13094 = vmatprep.subr.bf16.mxu1 %v14953_v57  ;;  %13314 = vmatpush3.bf16.msra.mxu0 %v14974_v24  ;;  %v14993_v57 = vld [vmem:[%s19026_s2 + $0x228] sm:$0xff]   ;;  %v14996_v24 = vld [vmem:[%s19026_s2 + $0x300] sm:$0xff]  }
 0x4b7   :  { %v12988_v25 = vadd.f32 %v12987_v16, %v12986_v43  ;;  %v12989_v10 = vpop.f32.mrb[42].mxu1  ;;  %13315 = vmatprep.subr.bf16.mxu0 %v15099_v4  ;;  %v14995_v43 = vld [vmem:[%s19026_s2 + $0x1e8] sm:$0xff]   ;;  %v14997_v16 = vld [vmem:[%s19026_s2 + $0x230] sm:$0xff]  }
 0x4b8   :  { %v12990_v44 = vpop.f32.mrb[43].mxu1  ;;  %v15001_v10 = vld [vmem:[%s19026_s2 + $0x238] sm:$0xff]  }
 0x4b9   :  { %13095 = vmatpush3.bf16.msra.mxu1 %v14954_v12  ;;  %v14998_v12 = vld [vmem:[%s19026_s2 + $0x348] sm:$0xff]   ;;  %v15003_v44 = vld [vmem:[%s19026_s2 + $0x1f8] sm:$0xff]  }
 0x4ba   :  { %13096 = vmatprep.subr.bf16.mxu1 %v14955_v48  ;;  %13316 = vmatpush3.bf16.msra.mxu0 %v14976_v63  ;;  %v15000_v48 = vld [vmem:[%s19026_s2 + $0x308] sm:$0xff]   ;;  %v14999_v63 = vld [vmem:[%s19026_s2 + $0x1f0] sm:$0xff]  }
 0x4bb   :  { %13114 = vmatprep.subr.bf16.mxu0 %v14978_v26  ;;  %v15004_v26 = vld [vmem:[%s19026_s2 + $0x310] sm:$0xff]  }
 0x4bd   :  { %13097 = vmatpush3.bf16.msra.mxu1 %v14956_v45  ;;  %v15006_v45 = vld [vmem:[%s19026_s2 + $0x358] sm:$0xff]  }
 0x4be   :  { %13098 = vmatprep.subr.bf16.mxu1 %v14957_v17  ;;  %v15005_v17 = vld [vmem:[%s19026_s2 + $0x2c0] sm:$0xff]  }
 0x4c1   :  { %13099 = vmatpush3.bf16.msra.mxu1 %v14959_v18  ;;  %v15008_v18 = vld [vmem:[%s19026_s2 + $0x318] sm:$0xff]  }
 0x4c2   :  { %13100 = vmatprep.subr.bf16.mxu1 %v14960_v20  ;;  %v15007_v20 = vld [vmem:[%s19026_s2 + $0x280] sm:$0xff]  }
 0x4c5   :  { %13101 = vmatpush3.bf16.msra.mxu1 %v14962_v41  ;;  %v15009_v41 = vld [vmem:[%s19026_s2 + $0x2c8] sm:$0xff]  }
 0x4c6   :  { %13102 = vmatprep.subr.bf16.mxu1 %v14963_v0  ;;  %v15010_v0 = vld [vmem:[%s19026_s2 + $0x360] sm:$0xff]  }
 0x4c9   :  { %13103 = vmatpush3.bf16.msra.mxu1 %v14965_v1  ;;  %v15012_v1 = vld [vmem:[%s19026_s2 + $0x320] sm:$0xff]  }
 0x4ca   :  { %13104 = vmatprep.subr.bf16.mxu1 %v14966_v2  ;;  %v15011_v2 = vld [vmem:[%s19026_s2 + $0x288] sm:$0xff]  }
 0x4cd   :  { %v13008_v8 = vpop.f32.mrb[40].mxu0  ;;  %13105 = vmatpush3.bf16.msra.mxu1 %v14968_v3  ;;  %v15014_v3 = vld [vmem:[%s19026_s2 + $0x368] sm:$0xff]  }
 0x4ce   :  { %v13009_v11 = vpop.f32.mrb[41].mxu0  ;;  %13106 = vmatprep.subr.bf16.mxu1 %v14969_v6  ;;  %v15013_v6 = vld [vmem:[%s19026_s2 + $0x2d0] sm:$0xff]  }
 0x4cf   :  { %v13010_v19 = vadd.f32 %v13009_v11, %v13008_v8  ;;  %v13011_v21 = vpop.f32.mrb[42].mxu0  ;;  %v15016_v8 = vld [vmem:[%s19026_s2 + $0x328] sm:$0xff]   ;;  %v15018_v11 = vld [vmem:[%s19026_s2 + $0x370] sm:$0xff]  }
 0x4d0   :  { %v13012_v22 = vpop.f32.mrb[43].mxu0  ;;  %v15020_v21 = vld [vmem:[%s19026_s2 + $0x330] sm:$0xff]  }
 0x4d1   :  { %v8336_v13 = vadd.f32 %v13010_v19, %v12988_v25  ;;  %13107 = vmatpush3.bf16.msra.mxu1 %v14971_v31  ;;  %v15002_v25 = vld [vmem:[%s19026_s2 + $0x350] sm:$0xff]   ;;  %v15017_v19 = vld [vmem:[%s19026_s2 + $0x2d8] sm:$0xff]  }
 0x4d2   :  { %13321 = vmatprep.subr.bf16.mxu1 %v15099_v4  ;;  %v15015_v31 = vld [vmem:[%s19026_s2 + $0x290] sm:$0xff]   ;;  %v15019_v22 = vld [vmem:[%s19026_s2 + $0x298] sm:$0xff]  }
 0x4d4   :  { %9225 = vmatmul.mubr.bf16.vlgmr.msra.gmra.mrb[52].mxu1 %v18496_v7 }
 0x4d5   :  { %v13030_v27 = vpop.f32.mrb[44].mxu1  ;;  %13322 = vmatpush3.bf16.msra.mxu1 %v14973_v28  ;;  %v8415_v29 = vpop.f32.mrb[44].mxu0  ;;  %13337 = vmatprep.mubr.msk.bf16.mxu1 %vm15100_vm2, %v15099_v4  ;;  %v15021_v28 = vld [vmem:[%s19026_s2 + $0x2e0] sm:$0xff]  }
 0x4d6   :  { %v13031_v33 = vpop.f32.mrb[45].mxu1  ;;  %13323 = vmatprep.subr.bf16.mxu1 %v15099_v4  ;;  %v13299_v34 = vpop.f32.mrb[45].mxu0 }
 0x4d7   :  { %v13032_v30 = vadd.f32 %v13031_v33, %v13030_v27  ;;  %v13033_v35 = vpop.f32.mrb[46].mxu1  ;;  %v8418_v36 = vpop.f32.mrb[46].mxu0  ;;  %v15024_v27 = vld [vmem:[%s19026_s2 + $0x338] sm:$0xff]   ;;  %v15025_v33 = vld [vmem:[%s19026_s2 + $0x2e8] sm:$0xff]   ;;  %v15028_v34 = vld [vmem:[%s19026_s2 + $0x3c0] sm:$0xff]  }
 0x4d8   :  { %v13034_v37 = vpop.f32.mrb[47].mxu1  ;;  %v13300_v38 = vpop.f32.mrb[47].mxu0  ;;  %v15030_v35 = vld [vmem:[%s19026_s2 + $0x408] sm:$0xff]   ;;  %v15029_v36 = vld [vmem:[%s19026_s2 + $0x2f0] sm:$0xff]  }
 0x4d9   :  { %v8376_v39 = vadd.f32 %v13032_v30, %v8336_v13  ;;  %13324 = vmatpush3.bf16.msra.mxu1 %v14975_v32  ;;  %v15022_v13 = vld [vmem:[%s19026_s2 + $0x378] sm:$0xff]   ;;  %v15026_v32 = vld [vmem:[%s19026_s2 + $0x400] sm:$0xff]   ;;  %v15027_v30 = vld [vmem:[%s19026_s2 + $0x2a8] sm:$0xff]  }
 0x4da   :  { %13325 = vmatprep.subr.bf16.mxu1 %v15099_v4  ;;  %v15032_v37 = vld [vmem:[%s19026_s2 + $0x3c8] sm:$0xff]   ;;  %v15031_v38 = vld [vmem:[%s19026_s2 + $0x2b0] sm:$0xff]  }
 0x4db   :  { %v8416_v40 = vadd.f32 %v8415_v29, %v8376_v39  ;;  %v15023_v29 = vld [vmem:[%s19026_s2 + $0x2a0] sm:$0xff]   ;;  %v15034_v39 = vld [vmem:[%s19026_s2 + $0x410] sm:$0xff]  }
 0x4dd   :  { %v8425_v5 = vmax.f32 %v18336_v51, %v8416_v40  ;;  %13326 = vmatpush3.bf16.msra.mxu1 %v14977_v9  ;;  %v14983_v51 = vld [vmem:[%s19026_s2 + $0x260] sm:$0xff]   ;;  %v15033_v9 = vld [vmem:[%s19026_s2 + $0x2f8] sm:$0xff]  }
 0x4de   :  { %13327 = vmatprep.subr.bf16.mxu1 %v15099_v4  ;;  %v15035_v40 = vld [vmem:[%s19026_s2 + $0x2b8] sm:$0xff]  }
 0x4df   :  { %v18610_v50 = vpack.c.bf16 %v8425_v5, %v8425_v5  ;;  %v15037_v5 = vld [vmem:[%s19026_s2 + $0x418] sm:$0xff]  }
 0x4e1   :  { %13318 = vmatmul.mubr.bf16.vlgmr.msra.gmra.mrb[52].mxu0 %v18610_v50  ;;  %13328 = vmatpush3.bf16.msra.mxu1 %v14980_v46  ;;  %v15039_v46 = vld [vmem:[%s19026_s2 + $0x3d8] sm:$0xff]  }
 0x4e2   :  { %13115 = vmatpush3.bf16.msra.mxu0 %v14979_v47  ;;  %9264 = vmatprep.mubr.bf16.mxu0 %v18524_v61  ;;  %v15038_v47 = vld [vmem:[%s19026_s2 + $0x380] sm:$0xff]  }
 0x4e3   :  { %13116 = vmatprep.subr.bf16.mxu0 %v14981_v56  ;;  %13329 = vmatprep.subr.bf16.mxu1 %v15099_v4  ;;  %v15040_v56 = vld [vmem:[%s19026_s2 + $0x420] sm:$0xff]  }
 0x4e5   :  { %13330 = vmatpush3.bf16.msra.mxu1 %v14983_v51  ;;  %v15042_v51 = vld [vmem:[%s19026_s2 + $0x3e0] sm:$0xff]  }
 0x4e6   :  { %13117 = vmatpush3.bf16.msra.mxu0 %v14982_v23  ;;  %13331 = vmatprep.subr.bf16.mxu1 %v15099_v4  ;;  %v15041_v23 = vld [vmem:[%s19026_s2 + $0x388] sm:$0xff]  }
 0x4e7   :  { %13118 = vmatprep.subr.bf16.mxu0 %v14984_v15  ;;  %v15043_v15 = vld [vmem:[%s19026_s2 + $0x428] sm:$0xff]  }
 0x4e9   :  { %13332 = vmatpush3.bf16.msra.mxu1 %v14986_v52  ;;  %v15045_v52 = vld [vmem:[%s19026_s2 + $0x3e8] sm:$0xff]  }
 0x4ea   :  { %13119 = vmatpush3.bf16.msra.mxu0 %v14985_v53  ;;  %13333 = vmatprep.subr.bf16.mxu1 %v15099_v4  ;;  %v15044_v53 = vld [vmem:[%s19026_s2 + $0x390] sm:$0xff]  }
 0x4eb   :  { %13120 = vmatprep.subr.bf16.mxu0 %v14987_v55  ;;  %v15046_v55 = vld [vmem:[%s19026_s2 + $0x430] sm:$0xff]  }
 0x4ed   :  { %13334 = vmatpush3.bf16.msra.mxu1 %v14989_v14  ;;  %v15048_v14 = vld [vmem:[%s19026_s2 + $0x3f0] sm:$0xff]  }
 0x4ee   :  { %13121 = vmatpush3.bf16.msra.mxu0 %v14988_v54  ;;  %13335 = vmatprep.subr.bf16.mxu1 %v15099_v4  ;;  %v15047_v54 = vld [vmem:[%s19026_s2 + $0x398] sm:$0xff]  }
 0x4ef   :  { %13122 = vmatprep.subr.bf16.mxu0 %v14990_v59  ;;  %v15049_v59 = vld [vmem:[%s19026_s2 + $0x438] sm:$0xff]  }
 0x4f1   :  { %13336 = vmatpush3.bf16.msra.mxu1 %v14992_v58  ;;  %v15051_v58 = vld [vmem:[%s19026_s2 + $0x3f8] sm:$0xff]  }
 0x4f2   :  { %13123 = vmatpush3.bf16.msra.mxu0 %v14991_v60  ;;  %13167 = vmatprep.subr.bf16.mxu1 %v14994_v62  ;;  %v15050_v60 = vld [vmem:[%s19026_s2 + $0x3a0] sm:$0xff]  }
 0x4f3   :  { %13124 = vmatprep.subr.bf16.mxu0 %v14993_v57  ;;  %v15053_v62 = vld [vmem:[%s19026_s2 + $0x4c0] sm:$0xff]   ;;  %v15052_v57 = vld [vmem:[%s19026_s2 + $0x3a8] sm:$0xff]  }
 0x4f4   :  { %13338 = vmatmul.mubr.bf16.vlgmr.msra.gmra.mrb[56].mxu1 %v18610_v50 }
 0x4f5   :  { %13168 = vmatpush3.bf16.msra.mxu1 %v14996_v24  ;;  %9706 = vmatprep.mubr.bf16.mxu1 %v18524_v61  ;;  %v15055_v24 = vld [vmem:[%s19026_s2 + $0x4c8] sm:$0xff]  }
 0x4f6   :  { %13125 = vmatpush3.bf16.msra.mxu0 %v14995_v43  ;;  %13169 = vmatprep.subr.bf16.mxu1 %v14998_v12  ;;  %v15054_v43 = vld [vmem:[%s19026_s2 + $0x3b0] sm:$0xff]   ;;  %v15056_v12 = vld [vmem:[%s19026_s2 + $0x3b8] sm:$0xff]  }
 0x4f7   :  { %13126 = vmatprep.subr.bf16.mxu0 %v14997_v16  ;;  %v15058_v16 = vld [vmem:[%s19026_s2 + $0x480] sm:$0xff]  }
 0x4f9   :  { %13170 = vmatpush3.bf16.msra.mxu1 %v15000_v48  ;;  %v15060_v48 = vld [vmem:[%s19026_s2 + $0x4d8] sm:$0xff]  }
 0x4fa   :  { %13127 = vmatpush3.bf16.msra.mxu0 %v14999_v63  ;;  %13171 = vmatprep.subr.bf16.mxu1 %v15002_v25  ;;  %v15059_v63 = vld [vmem:[%s19026_s2 + $0x440] sm:$0xff]   ;;  %v15061_v25 = vld [vmem:[%s19026_s2 + $0x488] sm:$0xff]  }
 0x4fb   :  { %13128 = vmatprep.subr.bf16.mxu0 %v15001_v10  ;;  %v15063_v10 = vld [vmem:[%s19026_s2 + $0x4e0] sm:$0xff]  }
 0x4fd   :  { %13172 = vmatpush3.bf16.msra.mxu1 %v15004_v26  ;;  %v15062_v26 = vld [vmem:[%s19026_s2 + $0x448] sm:$0xff]  }
 0x4fe   :  { %13129 = vmatpush3.bf16.msra.mxu0 %v15003_v44  ;;  %13173 = vmatprep.subr.bf16.mxu1 %v15006_v45  ;;  %v15064_v44 = vld [vmem:[%s19026_s2 + $0x490] sm:$0xff]   ;;  %v15066_v45 = vld [vmem:[%s19026_s2 + $0x4e8] sm:$0xff]  }
 0x4ff   :  { %13145 = vmatprep.subr.bf16.mxu0 %v15005_v17  ;;  %v15067_v17 = vld [vmem:[%s19026_s2 + $0x498] sm:$0xff]  }
 0x501   :  { %9265 = vmatmul.mubr.bf16.vlgmr.msra.gmra.mrb[56].mxu0 %v18529_v42  ;;  %13174 = vmatpush3.bf16.msra.mxu1 %v15008_v18  ;;  %v15069_v18 = vld [vmem:[%s19026_s2 + $0x4f0] sm:$0xff]  }
 0x502   :  { %13146 = vmatpush3.bf16.msra.mxu0 %v15007_v20  ;;  %9666 = vmatprep.mubr.bf16.mxu0 %v18491_v49  ;;  %v15068_v20 = vld [vmem:[%s19026_s2 + $0x458] sm:$0xff]  }
 0x503   :  { %13147 = vmatprep.subr.bf16.mxu0 %v15009_v41  ;;  %13175 = vmatprep.subr.bf16.mxu1 %v15010_v0  ;;  %v15070_v41 = vld [vmem:[%s19026_s2 + $0x4a0] sm:$0xff]   ;;  %v15072_v0 = vld [vmem:[%s19026_s2 + $0x4f8] sm:$0xff]  }
 0x505   :  { %13176 = vmatpush3.bf16.msra.mxu1 %v15012_v1  ;;  %v15071_v1 = vld [vmem:[%s19026_s2 + $0x460] sm:$0xff]  }
 0x506   :  { %13148 = vmatpush3.bf16.msra.mxu0 %v15011_v2  ;;  %13177 = vmatprep.subr.bf16.mxu1 %v15014_v3  ;;  %v15073_v2 = vld [vmem:[%s19026_s2 + $0x4a8] sm:$0xff]  }
 0x507   :  { %13149 = vmatprep.subr.bf16.mxu0 %v15013_v6  ;;  %v15074_v3 = vld [vmem:[%s19026_s2 + $0x468] sm:$0xff]   ;;  %v15075_v6 = vld [vmem:[%s19026_s2 + $0x4b0] sm:$0xff]  }
 0x509   :  { %13178 = vmatpush3.bf16.msra.mxu1 %v15016_v8  ;;  %v15076_v8 = vld [vmem:[%s19026_s2 + $0x470] sm:$0xff]  }
 0x50a   :  { %13150 = vmatpush3.bf16.msra.mxu0 %v15015_v31  ;;  %13179 = vmatprep.subr.bf16.mxu1 %v15018_v11  ;;  %v15077_v31 = vld [vmem:[%s19026_s2 + $0x4b8] sm:$0xff]  }
 0x50b   :  { %13151 = vmatprep.subr.bf16.mxu0 %v15017_v19  ;;  %v15078_v11 = vld [vmem:[%s19026_s2 + $0x478] sm:$0xff]  }
 0x50d   :  { %13180 = vmatpush3.bf16.msra.mxu1 %v15020_v21 }
 0x50e   :  { %13152 = vmatpush3.bf16.msra.mxu0 %v15019_v22  ;;  %13181 = vmatprep.subr.bf16.mxu1 %v15022_v13 }
 0x50f   :  { %13153 = vmatprep.subr.bf16.mxu0 %v15021_v28 }
 0x511   :  { %13182 = vmatpush3.bf16.msra.mxu1 %v15024_v27 }
 0x512   :  { %13154 = vmatpush3.bf16.msra.mxu0 %v15023_v29  ;;  %13198 = vmatprep.subr.bf16.mxu1 %v15026_v32 }
 0x513   :  { %13155 = vmatprep.subr.bf16.mxu0 %v15025_v33 }
 0x514   :  { %9707 = vmatmul.mubr.bf16.vlgmr.msra.gmra.mrb[60].mxu1 %v18529_v42 }
 0x515   :  { %13199 = vmatpush3.bf16.msra.mxu1 %v15028_v34  ;;  %10108 = vmatprep.mubr.bf16.mxu1 %v18491_v49  ;;  %v15036_v49 = vld [vmem:[%s19026_s2 + $0x3d0] sm:$0xff]  }
 0x516   :  { %13156 = vmatpush3.bf16.msra.mxu0 %v15027_v30  ;;  %13200 = vmatprep.subr.bf16.mxu1 %v15030_v35  ;;  %v15079_v30 = vld [vmem:[%s19027_s3] sm:$0xff]  }
 0x517   :  { %13157 = vmatprep.subr.bf16.mxu0 %v15029_v36  ;;  %v15081_v36 = vld [vmem:[%s19027_s3 + $0x10] sm:$0xff]  }
 0x519   :  { %13201 = vmatpush3.bf16.msra.mxu1 %v15032_v37 }
 0x51a   :  { %13158 = vmatpush3.bf16.msra.mxu0 %v15031_v38  ;;  %13202 = vmatprep.subr.bf16.mxu1 %v15034_v39 }
 0x51b   :  { %13159 = vmatprep.subr.bf16.mxu0 %v15033_v9 }
 0x51d   :  { %13203 = vmatpush3.bf16.msra.mxu1 %v15036_v49  ;;  %v15082_v49 = vld [vmem:[%s19027_s3 + $0x18] sm:$0xff]  }
 0x51e   :  { %13160 = vmatpush3.bf16.msra.mxu0 %v15035_v40  ;;  %13204 = vmatprep.subr.bf16.mxu1 %v15037_v5  ;;  %v15083_v40 = vld [vmem:[%s19027_s3 + $0x20] sm:$0xff]   ;;  %v15084_v5 = vld [vmem:[%s19027_s3 + $0x28] sm:$0xff]  }
 0x51f   :  { %13341 = vmatprep.subr.bf16.mxu0 %v15099_v4 }
 0x521   :  { %9667 = vmatmul.mubr.bf16.vlgmr.msra.gmra.mrb[60].mxu0 %v18496_v7  ;;  %13205 = vmatpush3.bf16.msra.mxu1 %v15039_v46 }
 0x522   :  { %13342 = vmatpush3.bf16.msra.mxu0 %v15038_v47  ;;  %13206 = vmatprep.subr.bf16.mxu1 %v15040_v56 }
 0x523   :  { %13343 = vmatprep.subr.bf16.mxu0 %v15099_v4  ;;  %13357 = vmatprep.mubr.msk.bf16.mxu0 %vm15100_vm2, %v15099_v4 }
 0x525   :  { %13207 = vmatpush3.bf16.msra.mxu1 %v15042_v51 }
 0x526   :  { %13344 = vmatpush3.bf16.msra.mxu0 %v15041_v23  ;;  %13208 = vmatprep.subr.bf16.mxu1 %v15043_v15  ;;  %v15085_v15 = vld [vmem:[%s19027_s3 + $0x30] sm:$0xff]  }
 0x527   :  { %13345 = vmatprep.subr.bf16.mxu0 %v15099_v4 }
 0x529   :  { %13209 = vmatpush3.bf16.msra.mxu1 %v15045_v52  ;;  %v15086_v52 = vld [vmem:[%s19027_s3 + $0x38] sm:$0xff]  }
 0x52a   :  { %13346 = vmatpush3.bf16.msra.mxu0 %v15044_v53  ;;  %13210 = vmatprep.subr.bf16.mxu1 %v15046_v55  ;;  %v15087_v53 = vld [vmem:[%s19028_s5] sm:$0xff]   ;;  %v15088_v55 = vld [vmem:[%s19028_s5 + $0x8] sm:$0xff]  }
 0x52b   :  { %13347 = vmatprep.subr.bf16.mxu0 %v15099_v4 }
 0x52d   :  { %13211 = vmatpush3.bf16.msra.mxu1 %v15048_v14 }
 0x52e   :  { %13348 = vmatpush3.bf16.msra.mxu0 %v15047_v54  ;;  %13212 = vmatprep.subr.bf16.mxu1 %v15049_v59  ;;  %v15089_v54 = vld [vmem:[%s19028_s5 + $0x10] sm:$0xff]  }
 0x52f   :  { %13349 = vmatprep.subr.bf16.mxu0 %v15099_v4 }
 0x531   :  { %13213 = vmatpush3.bf16.msra.mxu1 %v15051_v58 }
 0x532   :  { %13350 = vmatpush3.bf16.msra.mxu0 %v15050_v60  ;;  %13361 = vmatprep.subr.bf16.mxu1 %v15099_v4 }
 0x533   :  { %13351 = vmatprep.subr.bf16.mxu0 %v15099_v4 }
 0x534   :  { %10109 = vmatmul.mubr.bf16.vlgmr.msra.gmra.mrb[64].mxu1 %v18496_v7  ;;  %v15057_v7 = vld [vmem:[%s19026_s2 + $0x4d0] sm:$0xff]  }
 0x535   :  { %13362 = vmatpush3.bf16.msra.mxu1 %v15053_v62  ;;  %13377 = vmatprep.mubr.msk.bf16.mxu1 %vm15100_vm2, %v15099_v4  ;;  %v15090_v62 = vld [vmem:[%s19028_s5 + $0x18] sm:$0xff]  }
 0x536   :  { %13352 = vmatpush3.bf16.msra.mxu0 %v15052_v57  ;;  %13363 = vmatprep.subr.bf16.mxu1 %v15099_v4  ;;  %v15091_v57 = vld [vmem:[%s19028_s5 + $0x20] sm:$0xff]  }
 0x537   :  { %13353 = vmatprep.subr.bf16.mxu0 %v15099_v4 }
 0x539   :  { %13364 = vmatpush3.bf16.msra.mxu1 %v15055_v24  ;;  %v15092_v24 = vld [vmem:[%s19028_s5 + $0x28] sm:$0xff]  }
 0x53a   :  { %13354 = vmatpush3.bf16.msra.mxu0 %v15054_v43  ;;  %13365 = vmatprep.subr.bf16.mxu1 %v15099_v4 }
 0x53b   :  { %13355 = vmatprep.subr.bf16.mxu0 %v15099_v4 }
 0x53d   :  { %13366 = vmatpush3.bf16.msra.mxu1 %v15057_v7 }
 0x53e   :  { %13356 = vmatpush3.bf16.msra.mxu0 %v15056_v12  ;;  %13367 = vmatprep.subr.bf16.mxu1 %v15099_v4 }
 0x53f   :  { %13220 = vmatprep.subr.bf16.mxu0 %v15058_v16 }
 0x541   :  { %13358 = vmatmul.mubr.bf16.vlgmr.msra.gmra.mrb[64].mxu0 %v18610_v50  ;;  %13368 = vmatpush3.bf16.msra.mxu1 %v15060_v48 }
 0x542   :  { %13221 = vmatpush3.bf16.msra.mxu0 %v15059_v63  ;;  %10148 = vmatprep.mubr.bf16.mxu0 %v18524_v61  ;;  %v15065_v61 = vld [vmem:[%s19026_s2 + $0x450] sm:$0xff]  }
 0x543   :  { %13222 = vmatprep.subr.bf16.mxu0 %v15061_v25  ;;  %13369 = vmatprep.subr.bf16.mxu1 %v15099_v4 }
 0x545   :  { %13370 = vmatpush3.bf16.msra.mxu1 %v15063_v10 }
 0x546   :  { %13223 = vmatpush3.bf16.msra.mxu0 %v15062_v26  ;;  %13371 = vmatprep.subr.bf16.mxu1 %v15099_v4 }
 0x547   :  { %13224 = vmatprep.subr.bf16.mxu0 %v15064_v44 }
 0x549   :  { %13372 = vmatpush3.bf16.msra.mxu1 %v15066_v45 }
 0x54a   :  { %13225 = vmatpush3.bf16.msra.mxu0 %v15065_v61  ;;  %13373 = vmatprep.subr.bf16.mxu1 %v15099_v4 }
 0x54b   :  { %13226 = vmatprep.subr.bf16.mxu0 %v15067_v17 }
 0x54d   :  { %13374 = vmatpush3.bf16.msra.mxu1 %v15069_v18 }
 0x54e   :  { %13227 = vmatpush3.bf16.msra.mxu0 %v15068_v20  ;;  %13375 = vmatprep.subr.bf16.mxu1 %v15099_v4 }
 0x54f   :  { %13228 = vmatprep.subr.bf16.mxu0 %v15070_v41 }
 0x551   :  { %13376 = vmatpush3.bf16.msra.mxu1 %v15072_v0 }
 0x552   :  { %13229 = vmatpush3.bf16.msra.mxu0 %v15071_v1  ;;  %13401 = vmatprep.subr.bf16.mxu1 %v15099_v4 }
 0x553   :  { %13230 = vmatprep.subr.bf16.mxu0 %v15073_v2 }
 0x554   :  { %13378 = vmatmul.mubr.bf16.vlgmr.msra.gmra.mrb[68].mxu1 %v18610_v50 }
 0x555   :  { %13417 = vmatprep.mubr.msk.bf16.mxu1 %vm15100_vm2, %v15099_v4  ;;  %13402 = vmatpush3.bf16.msra.mxu1 %v15087_v53 }
 0x556   :  { %13231 = vmatpush3.bf16.msra.mxu0 %v15074_v3  ;;  %13403 = vmatprep.subr.bf16.mxu1 %v15099_v4 }
 0x557   :  { %13232 = vmatprep.subr.bf16.mxu0 %v15075_v6 }
 0x559   :  { %13404 = vmatpush3.bf16.msra.mxu1 %v15088_v55 }
 0x55a   :  { %13233 = vmatpush3.bf16.msra.mxu0 %v15076_v8  ;;  %13405 = vmatprep.subr.bf16.mxu1 %v15099_v4 }
 0x55b   :  { %13234 = vmatprep.subr.bf16.mxu0 %v15077_v31 }
 0x55d   :  { %13406 = vmatpush3.bf16.msra.mxu1 %v15089_v54 }
 0x55e   :  { %13235 = vmatpush3.bf16.msra.mxu0 %v15078_v11  ;;  %13407 = vmatprep.subr.bf16.mxu1 %v15099_v4 }
 0x55f   :  { %13381 = vmatprep.subr.bf16.mxu0 %v15099_v4 }
 0x561   :  { %10149 = vmatmul.mubr.bf16.vlgmr.msra.gmra.mrb[68].mxu0 %v18529_v42  ;;  %v15080_v42 = vld [vmem:[%s19027_s3 + $0x8] sm:$0xff]   ;;  %13408 = vmatpush3.bf16.msra.mxu1 %v15090_v62 }
 0x562   :  { %13397 = vmatprep.mubr.msk.bf16.mxu0 %vm15100_vm2, %v15099_v4  ;;  %13382 = vmatpush3.bf16.msra.mxu0 %v15079_v30 }
 0x563   :  { %13383 = vmatprep.subr.bf16.mxu0 %v15099_v4  ;;  %13409 = vmatprep.subr.bf16.mxu1 %v15099_v4 }
 0x565   :  { %13410 = vmatpush3.bf16.msra.mxu1 %v15091_v57 }
 0x566   :  { %13384 = vmatpush3.bf16.msra.mxu0 %v15080_v42  ;;  %13411 = vmatprep.subr.bf16.mxu1 %v15099_v4 }
 0x567   :  { %13385 = vmatprep.subr.bf16.mxu0 %v15099_v4 }
 0x569   :  { %13412 = vmatpush3.bf16.msra.mxu1 %v15092_v24 }
 0x56a   :  { %13386 = vmatpush3.bf16.msra.mxu0 %v15081_v36  ;;  %13413 = vmatprep.subr.bf16.mxu1 %v15099_v4 }
 0x56b   :  { %13387 = vmatprep.subr.bf16.mxu0 %v15099_v4 }
 0x56e   :  { %13388 = vmatpush3.bf16.msra.mxu0 %v15082_v49  ;;  %v15093_v49 = vld [vmem:[%s19028_s5 + $0x30] sm:$0xff]  }
 0x56f   :  { %v13055_v50 = vpop.f32.mrb[48].mxu0  ;;  %13389 = vmatprep.subr.bf16.mxu0 %v15099_v4  ;;  %13414 = vmatpush3.bf16.msra.mxu1 %v15093_v49 }
 0x570   :  { %v13056_v19 = vpop.f32.mrb[49].mxu0  ;;  %13415 = vmatprep.subr.bf16.mxu1 %v15099_v4 }
 0x571   :  { %v13057_v21 = vadd.f32 %v13056_v19, %v13055_v50  ;;  %v13058_v22 = vpop.f32.mrb[50].mxu0 }
 0x572   :  { %v13059_v13 = vpop.f32.mrb[51].mxu0  ;;  %13390 = vmatpush3.bf16.msra.mxu0 %v15083_v40  ;;  %v15094_v40 = vld [vmem:[%s19028_s5 + $0x38] sm:$0xff]  }
 0x573   :  { %13391 = vmatprep.subr.bf16.mxu0 %v15099_v4  ;;  %13416 = vmatpush3.bf16.msra.mxu1 %v15094_v40 }
 0x576   :  { %13392 = vmatpush3.bf16.msra.mxu0 %v15084_v5  ;;  %v12745_v5 = vld [vmem:[%s19029_s4] ss:$0 sm:$0xff] }
 0x577   :  { %13393 = vmatprep.subr.bf16.mxu0 %v15099_v4 }
 0x57a   :  { %13394 = vmatpush3.bf16.msra.mxu0 %v15085_v15 }
 0x57b   :  { %13395 = vmatprep.subr.bf16.mxu0 %v15099_v4  ;;  %v12754_v4 = vld [vmem:[%s19030_s6] ss:$0 sm:$0xff] }
 0x57e   :  { %13396 = vmatpush3.bf16.msra.mxu0 %v15086_v52 }
 0x587   :  { %v13077_v28 = vpop.f32.mrb[48].mxu1 }
 0x588   :  { %v13078_v27 = vpop.f32.mrb[49].mxu1 }
 0x589   :  { %v13079_v29 = vadd.f32 %v13078_v27, %v13077_v28  ;;  %v13080_v32 = vpop.f32.mrb[50].mxu1 }
 0x58a   :  { %v13081_v33 = vpop.f32.mrb[51].mxu1 }
 0x58b   :  { %v8826_v34 = vadd.f32 %v13079_v29, %v13057_v21 }
 0x5a7   :  { %v13108_v35 = vpop.f32.mrb[52].mxu1 }
 0x5a8   :  { %v13109_v37 = vpop.f32.mrb[53].mxu1 }
 0x5a9   :  { %v13110_v38 = vadd.f32 %v13109_v37, %v13108_v35  ;;  %v13111_v39 = vpop.f32.mrb[54].mxu1 }
 0x5aa   :  { %v13112_v9 = vpop.f32.mrb[55].mxu1 }
 0x5b4   :  { %v8865_v46 = vpop.f32.mrb[52].mxu0 }
 0x5b5   :  { %v18973_v47 = vadd.f32 %v8865_v46, %v8826_v34  ;;  %v13319_v56 = vpop.f32.mrb[53].mxu0 }
 0x5b6   :  { %v8868_v51 = vpop.f32.mrb[54].mxu0 }
 0x5b7   :  { %v13320_v23 = vpop.f32.mrb[55].mxu0 }
 0x5c7   :  { %v9306_v14 = vpop.f32.mrb[56].mxu1 }
 0x5c8   :  { %v13339_v59 = vpop.f32.mrb[57].mxu1 }
 0x5c9   :  { %v9309_v58 = vpop.f32.mrb[58].mxu1 }
 0x5ca   :  { %v13340_v60 = vpop.f32.mrb[59].mxu1 }
 0x5d4   :  { %v13130_v43 = vpop.f32.mrb[56].mxu0 }
 0x5d5   :  { %v13131_v7 = vpop.f32.mrb[57].mxu0 }
 0x5d6   :  { %v13132_v12 = vadd.f32 %v13131_v7, %v13130_v43  ;;  %v13133_v16 = vpop.f32.mrb[58].mxu0 }
 0x5d7   :  { %v13134_v48 = vpop.f32.mrb[59].mxu0 }
 0x5d8   :  { %v9267_v63 = vadd.f32 %v13132_v12, %v13110_v38 }
 0x5da   :  { %v9307_v25 = vadd.f32 %v9306_v14, %v9267_v63 }
 0x5dc   :  { %v9312_v10 = vmax.f32 %v18973_v47, %v9307_v25 }
 0x5e7   :  { %v13183_v26 = vpop.f32.mrb[60].mxu1 }
 0x5e8   :  { %v13184_v44 = vpop.f32.mrb[61].mxu1 }
 0x5e9   :  { %v13185_v45 = vadd.f32 %v13184_v44, %v13183_v26  ;;  %v13186_v61 = vpop.f32.mrb[62].mxu1 }
 0x5ea   :  { %v13187_v17 = vpop.f32.mrb[63].mxu1 }
 0x5f4   :  { %v13161_v18 = vpop.f32.mrb[60].mxu0 }
 0x5f5   :  { %v13162_v20 = vpop.f32.mrb[61].mxu0 }
 0x5f6   :  { %v13163_v41 = vadd.f32 %v13162_v20, %v13161_v18  ;;  %v13164_v0 = vpop.f32.mrb[62].mxu0 }
 0x5f7   :  { %v13165_v1 = vpop.f32.mrb[63].mxu0 }
 0x5f8   :  { %v9709_v2 = vadd.f32 %v13185_v45, %v13163_v41 }
 0x607   :  { %v13214_v3 = vpop.f32.mrb[64].mxu1 }
 0x608   :  { %v13215_v6 = vpop.f32.mrb[65].mxu1 }
 0x609   :  { %v13216_v8 = vadd.f32 %v13215_v6, %v13214_v3  ;;  %v13217_v31 = vpop.f32.mrb[66].mxu1 }
 0x60a   :  { %v13218_v11 = vpop.f32.mrb[67].mxu1 }
 0x614   :  { %v9748_v50 = vpop.f32.mrb[64].mxu0 }
 0x615   :  { %v9749_v19 = vadd.f32 %v9748_v50, %v9709_v2  ;;  %v13359_v21 = vpop.f32.mrb[65].mxu0 }
 0x616   :  { %v9751_v22 = vpop.f32.mrb[66].mxu0 }
 0x617   :  { %v9754_v13 = vmax.f32 %v9312_v10, %v9749_v19  ;;  %v13360_v28 = vpop.f32.mrb[67].mxu0 }
 0x627   :  { %v10190_v27 = vpop.f32.mrb[68].mxu1 }
 0x628   :  { %v13379_v29 = vpop.f32.mrb[69].mxu1 }
 0x629   :  { %v10193_v32 = vpop.f32.mrb[70].mxu1 }
 0x62a   :  { %v13380_v33 = vpop.f32.mrb[71].mxu1 }
 0x634   :  { %v13236_v34 = vpop.f32.mrb[68].mxu0 }
 0x635   :  { %v13237_v30 = vpop.f32.mrb[69].mxu0 }
 0x636   :  { %v13238_v42 = vadd.f32 %v13237_v30, %v13236_v34  ;;  %v13239_v35 = vpop.f32.mrb[70].mxu0 }
 0x637   :  { %v13240_v36 = vpop.f32.mrb[71].mxu0 }
 0x638   :  { %v10151_v37 = vadd.f32 %v13238_v42, %v13216_v8 }
 0x63a   :  { %v10191_v38 = vadd.f32 %v10190_v27, %v10151_v37 }
 0x63c   :  { %v10196_v39 = vmax.f32 %v9754_v13, %v10191_v38 }
 0x63e   :  { %v10197_v9 = vpack.c.bf16 %v10196_v39, %v10196_v39 }
 0x640   :  { %13398 = vmatmul.mubr.bf16.vlgmr.msra.gmra.mrb[72].mxu0 %v10197_v9 }
 0x713   :  { %v10303_v46 = vpop.f32.mrb[72].mxu0 }
 0x714   :  { %v10304_v47 = vadd.f32 %v12745_v5, %v10303_v46  ;;  %v13399_v56 = vpop.f32.mrb[73].mxu0 }
 0x715   :  { %v10306_v51 = vpop.f32.mrb[74].mxu0 }
 0x716   :  { %v10309_v23 = vmax.f32 %v10304_v47, 0.0  ;;  %v13400_v15 = vpop.f32.mrb[75].mxu0 }
 0x718   :  { %v10310_v52 = vpack.c.bf16 %v10309_v23, %v10309_v23 }
 0x71a   :  { %13418 = vmatmul.mubr.bf16.vlgmr.msra.gmra.mrb[72].mxu1 %v10310_v52 }
 0x7ed   :  { %v10416_v53 = vpop.f32.mrb[72].mxu1 }
 0x7ee   :  { %v10417_v55 = vadd.f32 %v12754_v4, %v10416_v53  ;;  %v13419_v14 = vpop.f32.mrb[73].mxu1 }
 0x7ef   :  { %v10419_v54 = vpop.f32.mrb[74].mxu1 }
 0x7f0   :  { %10422 = vst [vmem:[%s19031_s7] sm:$0xff] %v10417_v55  ;;  %v13420_v59 = vpop.f32.mrb[75].mxu1 }

</bundles_post_ra>
